<compile_context>
chip_gen: v7x
topology: tpu7x:2x2x1
jax: 0.10.0
libtpu: 0.0.40
codegen_flags: <defaults>
</compile_context>

<pallas_src>
import functools

import jax
import jax.numpy as jnp
from jax.experimental import pallas as pl
from jax.experimental.pallas import tpu as pltpu


# ----------------------------------------------------------------------------
# synthetic config (original `config` module not available)
# ----------------------------------------------------------------------------
class config:
    resnet_out_feature_dim = 256
    keypoint_num = 21          # standard 21 hand keypoints
    is_inference = False
    uv_from_xD = 2             # keep the 2D-estimated uv (see forward)


_KP = config.keypoint_num
_D = config.resnet_out_feature_dim
_STEM_CH = 32                  # logical stem channels
_STEM_PAD = 128                # stem channels padded to one lane width
_SEG = 32                      # planar x|y|z segment stride (32-lane aligned)
_N_ROOT, _N_OTHER, _N_BONES = 15, 30, 20
_N_ANGLE = _N_ROOT + _N_OTHER  # 45
_HEAD = 128                    # padded width for bone-head / FK matmuls
_KP2PAD = 64                   # keypoint vector 42 padded to 64 lanes
_BB = 8                        # batch rows per grid step (sublane-dense)
_TILE_CAP = 1024               # max spatial rows per grid step


def _round_up(x, m):
    return (x + m - 1) // m * m


def _kpad(c):
    """im2col K dim (C*9) padded up to a multiple of 32."""
    return _round_up(c * 9, 32)


# ----------------------------------------------------------------------------
# The fused kernel
# ----------------------------------------------------------------------------
def _fused_kernel(p_ref, sw_ref, sb_ref, pw_ref, pb_ref,
                  w1_ref, b1_ref, w2_ref, b2_ref, w3_ref, b3_ref,
                  w4_ref, b4_ref, w5_ref, b5_ref, uvs_ref,
                  c1w_ref, c1b_ref, c2w_ref, c2b_ref, fkw_ref, fkb_ref,
                  aux_ref,
                  xyz_ref, pro_ref, kp_ref,
                  acc_ref, *, hw, inv_hw, tile, needs_mask):
    s = pl.program_id(1)

    @pl.when(s == 0)
    def _():
        acc_ref[...] = jnp.zeros_like(acc_ref)

    # ---- conv-as-matmul stem + ReLU + GAP accumulation (ones-row matmul) ----
    kpad = p_ref.shape[-1]
    bb = acc_ref.shape[0]
    p2 = p_ref[...].reshape(bb * tile, kpad)                       # bf16
    h = jnp.dot(p2, sw_ref[...], preferred_element_type=jnp.float32)
    h = jnp.maximum(h + sb_ref[...], 0.0)                          # (bb*tile, 128)

    if needs_mask:
        col = jax.lax.broadcasted_iota(jnp.int32, (1, tile), 1) + s * tile
        ones_row = (col < hw).astype(jnp.float32)                  # mask padded rows
    else:
        ones_row = jnp.ones((1, tile), jnp.float32)
    sums = [jnp.dot(ones_row, h[i * tile:(i + 1) * tile, :],
                    preferred_element_type=jnp.float32) for i in range(bb)]
    acc_ref[...] += jnp.concatenate(sums, axis=0)                  # (bb, 128)

    # ---- epilogue at last spatial tile: projection + head + FK + camera ----
    @pl.when(s == pl.num_programs(1) - 1)
    def _():
        def dense(x, w_ref, b_ref):
            return (jnp.dot(x.astype(jnp.bfloat16), w_ref[...],
                            preferred_element_type=jnp.float32) + b_ref[...])

        pooled = acc_ref[...] * inv_hw                             # (bb, 128)
        feats = dense(pooled, pw_ref, pb_ref)                      # (bb, 256)

        # twoDimPoseEstimate: 4x (Linear+ReLU) + Linear+Sigmoid, uv scaling
        h1 = jnp.maximum(dense(feats, w1_ref, b1_ref), 0.0)        # (bb, 128)
        h2 = jnp.maximum(dense(h1, w2_ref, b2_ref), 0.0)           # (bb, 64)
        h3 = jnp.maximum(dense(h2, w3_ref, b3_ref), 0.0)           # (bb, 32)
        h4 = jnp.maximum(dense(h3, w4_ref, b4_ref), 0.0)           # (bb, 16)
        # interleaved [u0,v0,...]; u = pose_x*W, v = pose_y*H folded into scale
        keypoints = jax.nn.sigmoid(dense(h4, w5_ref, b5_ref)) * uvs_ref[...]

        # bone angle + bone length heads (block-diagonal -> 2 matmuls)
        hh = jnp.maximum(dense(keypoints, c1w_ref, c1b_ref), 0.0)  # (bb, 128)
        y = dense(hh, c2w_ref, c2b_ref)                            # (bb, 128)
        lane = jax.lax.broadcasted_iota(jnp.int32, y.shape, 1)
        fk_in = jnp.where(lane < _N_ANGLE, jnp.tanh(y), jax.nn.sigmoid(y))

        # FK decoder -> relative xyz in planar x|y|z 32-lane segments
        rel = jnp.tanh(dense(fk_in, fkw_ref, fkb_ref))             # (bb, 128)

        # aux slab: [scale | root | K_row0 | K_row1 | K_row2], each value
        # pre-broadcast over its 32-lane segment -> pure elementwise FMAs here
        a = aux_ref[...]                                           # (bb, 640)
        scale_s, root = a[:, 0:128], a[:, 128:256]
        ku, kv, kw = a[:, 256:384], a[:, 384:512], a[:, 512:640]

        abs_xyz = rel * scale_s + root                             # (bb, 128)
        pu = ku * abs_xyz
        pv = kv * abs_xyz
        pw = kw * abs_xyz

        def segsum(t):                                             # 32-aligned slices
            return t[:, 0:_SEG] + t[:, _SEG:2 * _SEG] + t[:, 2 * _SEG:3 * _SEG]

        un, vn, wn = segsum(pu), segsum(pv), segsum(pw)            # (bb, 32)
        eps = jnp.float32(1e-6)
        wn = jnp.where(jnp.abs(wn) < eps, jnp.where(wn >= 0, eps, -eps), wn)
        u_pro = un / wn
        v_pro = vn / wn

        zeros64 = jnp.zeros((bb, 64), jnp.float32)
        xyz_ref[...] = abs_xyz.astype(xyz_ref.dtype)               # planar X|Y|Z
        pro_ref[...] = jnp.concatenate([u_pro, v_pro, zeros64],
                                       axis=1).astype(pro_ref.dtype)
        kp_ref[...] = jnp.concatenate([keypoints, zeros64],
                                      axis=1).astype(kp_ref.dtype)


def fused_forward(patches, params, uvscale, aux, *, hw, tile):
    b_pad, hw_pad, kpad = patches.shape
    nb = b_pad // _BB
    ns = hw_pad // tile
    needs_mask = (hw_pad != hw)

    def c2d(arr):  # constant full-array 2-D block
        return pl.BlockSpec(arr.shape, lambda b, s: (0, 0))

    out_spec = pl.BlockSpec((_BB, 128), lambda b, s: (b, 0))
    kernel = functools.partial(_fused_kernel, hw=hw, inv_hw=1.0 / hw,
                               tile=tile, needs_mask=needs_mask)
    return pl.pallas_call(
        kernel,
        out_shape=(jax.ShapeDtypeStruct((b_pad, 128), jnp.float32),
                   jax.ShapeDtypeStruct((b_pad, 128), jnp.float32),
                   jax.ShapeDtypeStruct((b_pad, 128), jnp.float32)),
        grid=(nb, ns),
        in_specs=[pl.BlockSpec((_BB, tile, kpad), lambda b, s: (b, s, 0)),
                  c2d(params["stem_w"]), c2d(params["stem_b"]),
                  c2d(params["proj_w"]), c2d(params["proj_b"]),
                  c2d(params["p_w1"]), c2d(params["p_b1"]),
                  c2d(params["p_w2"]), c2d(params["p_b2"]),
                  c2d(params["p_w3"]), c2d(params["p_b3"]),
                  c2d(params["p_w4"]), c2d(params["p_b4"]),
                  c2d(params["p_w5"]), c2d(params["p_b5"]),
                  c2d(uvscale),
                  c2d(params["c1_w"]), c2d(params["c1_b"]),
                  c2d(params["c2_w"]), c2d(params["c2_b"]),
                  c2d(params["fk_w"]), c2d(params["fk_b"]),
                  pl.BlockSpec((_BB, 5 * 128), lambda b, s: (b, 0))],
        out_specs=(out_spec, out_spec, out_spec),
        scratch_shapes=[pltpu.VMEM((_BB, _STEM_PAD), jnp.float32)],
        compiler_params=pltpu.CompilerParams(
            dimension_semantics=("parallel", "arbitrary"),
            vmem_limit_bytes=32 * 1024 * 1024),
    )(patches,
      params["stem_w"], params["stem_b"], params["proj_w"], params["proj_b"],
      params["p_w1"], params["p_b1"], params["p_w2"], params["p_b2"],
      params["p_w3"], params["p_b3"], params["p_w4"], params["p_b4"],
      params["p_w5"], params["p_b5"], uvscale,
      params["c1_w"], params["c1_b"], params["c2_w"], params["c2_b"],
      params["fk_w"], params["fk_b"], aux)


# ----------------------------------------------------------------------------
# Glue (im2col / params) in plain JAX
# ----------------------------------------------------------------------------
def im2col_3x3(img_nchw):
    """3x3, stride 1, pad 1 patches: (B,C,H,W) -> (B, H*W, C*9)."""
    B, C, H, W = img_nchw.shape
    xp = jnp.pad(img_nchw, ((0, 0), (0, 0), (1, 1), (1, 1)))
    pats = [xp[:, :, dh:dh + H, dw:dw + W] for dh in range(3) for dw in range(3)]
    p = jnp.stack(pats, axis=2)                       # (B, C, 9, H, W)
    p = p.transpose(0, 3, 4, 1, 2)                    # (B, H, W, C, 9)
    return p.reshape(B, H * W, C * 9)


def init_params(key, img_channels=3):
    D = _D
    KP2 = 2 * _KP
    kpad = _kpad(img_channels)

    def lin(k, fi, fo):
        kw, kb = jax.random.split(k)
        w = jax.random.normal(kw, (fi, fo), jnp.float32) / jnp.sqrt(fi)
        b = 0.01 * jax.random.normal(kb, (fo,), jnp.float32)
        return w, b

    def padw(w, shape):
        return jnp.zeros(shape, jnp.float32).at[:w.shape[0], :w.shape[1]].set(w)

    def padb(b, n):
        return jnp.zeros((1, n), jnp.float32).at[0, :b.shape[0]].set(b)

    ks = jax.random.split(key, 13)
    p = {}

    # TODO(synk): ResNetFeatureExtractor internals unavailable; simplified stem
    # (3x3 conv + ReLU + global-avg-pool + linear) stands in.  Weights are
    # zero-padded to lane-friendly shapes (equivalent to the unpadded stem).
    sw, sb = lin(ks[0], img_channels * 9, _STEM_CH)
    p["stem_w"] = padw(sw, (kpad, _STEM_PAD)).astype(jnp.bfloat16)
    p["stem_b"] = padb(sb, _STEM_PAD)
    pw, pb = lin(ks[1], _STEM_CH, D)
    p["proj_w"] = padw(pw, (_STEM_PAD, D)).astype(jnp.bfloat16)
    p["proj_b"] = padb(pb, D)

    # twoDimPoseEstimate MLP (exact shapes from the module __init__)
    w1, b1 = lin(ks[2], D, D // 2)
    w2, b2 = lin(ks[3], D // 2, D // 4)
    w3, b3 = lin(ks[4], D // 4, D // 8)
    w4, b4 = lin(ks[5], D // 8, D // 16)
    w5, b5 = lin(ks[6], D // 16, KP2)
    p["p_w1"], p["p_b1"] = w1.astype(jnp.bfloat16), padb(b1, D // 2)
    p["p_w2"], p["p_b2"] = w2.astype(jnp.bfloat16), padb(b2, D // 4)
    p["p_w3"], p["p_b3"] = w3.astype(jnp.bfloat16), padb(b3, D // 8)
    p["p_w4"], p["p_b4"] = w4.astype(jnp.bfloat16), padb(b4, D // 16)
    p["p_w5"] = padw(w5, (D // 16, _KP2PAD)).astype(jnp.bfloat16)
    p["p_b5"] = padb(b5, _KP2PAD)

    # TODO(synk): BoneAnglePrediction / BoneLengthPrediction architectures
    # unavailable; small deterministic MLP heads used (weights concatenated /
    # block-diagonal so both heads run in two fused matmuls).
    a_w1, a_b1 = lin(ks[7], KP2, 64)
    l_w1, l_b1 = lin(ks[10], KP2, 64)
    c1 = jnp.zeros((_KP2PAD, _HEAD), jnp.float32)
    c1 = c1.at[:KP2, :64].set(a_w1).at[:KP2, 64:128].set(l_w1)
    p["c1_w"] = c1.astype(jnp.bfloat16)
    p["c1_b"] = padb(jnp.concatenate([a_b1, l_b1]), _HEAD)

    a_wr, a_br = lin(ks[8], 64, _N_ROOT)
    a_wo, a_bo = lin(ks[9], 64, _N_OTHER)
    l_w2, l_b2 = lin(ks[11], 64, _N_BONES)
    c2 = jnp.zeros((_HEAD, _HEAD), jnp.float32)
    c2 = c2.at[:64, :_N_ROOT].set(a_wr)
    c2 = c2.at[:64, _N_ROOT:_N_ANGLE].set(a_wo)
    c2 = c2.at[64:128, _N_ANGLE:_N_ANGLE + _N_BONES].set(l_w2)
    p["c2_w"] = c2.astype(jnp.bfloat16)
    p["c2_b"] = padb(jnp.concatenate([a_br, a_bo, l_b2]), _HEAD)

    # TODO(synk): ForwardKinematics kinematic-tree traversal unavailable; a
    # linear decoder to relative xyz (planar x|y|z 32-lane segments) + exact
    # camera projection stands in.
    fkw, fkb = lin(ks[12], _N_ANGLE + _N_BONES, 3 * _KP)
    fw = jnp.zeros((_HEAD, _HEAD), jnp.float32)
    fb = jnp.zeros((1, _HEAD), jnp.float32)
    for i in range(3):
        fw = fw.at[:_N_ANGLE + _N_BONES, i * _SEG:i * _SEG + _KP].set(
            fkw[:, i * _KP:(i + 1) * _KP])
        fb = fb.at[0, i * _SEG:i * _SEG + _KP].set(fkb[i * _KP:(i + 1) * _KP])
    p["fk_w"] = fw.astype(jnp.bfloat16)
    p["fk_b"] = fb
    return p


# ----------------------------------------------------------------------------
# forward (matches the PyTorch module's forward body)
# ----------------------------------------------------------------------------
def two_dim_hand_pose_with_fk(params, img, camera_intrinsic_matrix,
                              index_root_bone_length, keypoint_xyz_root):
    B, C, H, W = img.shape
    KP = _KP
    HW = H * W
    kpad = _kpad(C)

    tile = min(_TILE_CAP, _round_up(HW, 16))
    hw_pad = _round_up(HW, tile)
    b_pad = _round_up(B, _BB)

    # --- ResNet feature extractor input (simplified) ---
    # TODO(synk): im2col is still materialized once in HBM (fused with the
    # bf16 cast / K padding); fully in-kernel im2col from raw NCHW would cut
    # stem HBM traffic further but needs manual overlapping-window DMAs.
    patches = im2col_3x3(img)                                    # (B, HW, C*9)
    patches = jnp.pad(
        patches, ((0, b_pad - B), (0, hw_pad - HW),
                  (0, kpad - patches.shape[-1]))).astype(jnp.bfloat16)

    # uv scale (u = pose_x*W, v = pose_y*H), interleaved, padded to 64 lanes
    uvscale = jnp.zeros((1, _KP2PAD), jnp.float32).at[0, :2 * KP].set(
        jnp.tile(jnp.array([W, H], jnp.float32), KP))

    # aux slabs: each scalar pre-broadcast over its 32-lane planar segment
    K = camera_intrinsic_matrix.reshape(B, 3, 3).astype(jnp.float32)
    s = index_root_bone_length.reshape(B, 1).astype(jnp.float32)
    root = keypoint_xyz_root.reshape(B, 3).astype(jnp.float32)

    def seg3(v3):                                                # (B,3) -> (B,128)
        return jnp.concatenate(
            [jnp.repeat(v3, _SEG, axis=1),
             jnp.zeros((B, 128 - 3 * _SEG), jnp.float32)], axis=1)

    aux = jnp.concatenate(
        [seg3(jnp.concatenate([s, s, s], axis=1)),               # root bone scale
         seg3(root),                                             # root xyz
         seg3(K[:, 0, :]), seg3(K[:, 1, :]), seg3(K[:, 2, :])],  # intrinsic rows
        axis=1)                                                  # (B, 640)
    aux = jnp.pad(aux, ((0, b_pad - B), (0, 0)))

    xyz_slab, pro_slab, kp_slab = fused_forward(
        patches, params, uvscale, aux, hw=HW, tile=tile)
    xyz_slab, pro_slab, kp_slab = xyz_slab[:B], pro_slab[:B], kp_slab[:B]

    keypoint_xyz21_absolute = jnp.stack(
        [xyz_slab[:, 0:KP], xyz_slab[:, _SEG:_SEG + KP],
         xyz_slab[:, 2 * _SEG:2 * _SEG + KP]], axis=-1)          # (B, KP, 3)
    kp_coord_uv21_from_pro = jnp.stack(
        [pro_slab[:, 0:KP], pro_slab[:, _SEG:_SEG + KP]], axis=-1)  # (B, KP, 2)
    keypoint_uv21 = kp_slab[:, 0:2 * KP].reshape(B, KP, 2)       # 2D estimate

    if config.is_inference:
        return ([keypoint_xyz21_absolute, kp_coord_uv21_from_pro, keypoint_uv21],
                jnp.array(0))
    if config.uv_from_xD == 2.5:
        keypoint_uv21 = (keypoint_uv21 + kp_coord_uv21_from_pro) / 2
    elif config.uv_from_xD == 3:
        keypoint_uv21 = kp_coord_uv21_from_pro
    elif config.uv_from_xD == 2:
        keypoint_uv21 = keypoint_uv21
    return ([keypoint_xyz21_absolute, keypoint_uv21, None], jnp.array(0))


# ----------------------------------------------------------------------------
if __name__ == "__main__":
    key = jax.random.PRNGKey(0)
    k_img, k_par, k_root = jax.random.split(key, 3)

    B, C, H, W = 2, 3, 16, 16
    img = jax.random.normal(k_img, (B, C, H, W), jnp.float32)

    fx = fy = 100.0
    cx, cy = W / 2.0, H / 2.0
    cam_k = jnp.tile(jnp.array([[fx, 0.0, cx],
                                [0.0, fy, cy],
                                [0.0, 0.0, 1.0]], jnp.float32)[None], (B, 1, 1))
    index_root_bone_length = jnp.array([[0.5], [0.7]], jnp.float32)      # (B,1)
    keypoint_xyz_root = jnp.concatenate(
        [0.1 * jax.random.normal(k_root, (B, 2), jnp.float32),
         jnp.full((B, 1), 4.0, jnp.float32)], axis=-1)                   # (B,3)

    params = init_params(k_par, img_channels=C)

    fwd = jax.jit(two_dim_hand_pose_with_fk)
    (outs, loss_flag) = fwd(params, img, cam_k, index_root_bone_length,
                            keypoint_xyz_root)
    keypoint_xyz21_absolute, keypoint_uv21, _ = outs

    jax.block_until_ready(keypoint_xyz21_absolute)
    jax.block_until_ready(keypoint_uv21)
    jax.block_until_ready(loss_flag)

    assert keypoint_xyz21_absolute.shape == (B, config.keypoint_num, 3)
    assert keypoint_uv21.shape == (B, config.keypoint_num, 2)
    assert bool(jnp.all(jnp.isfinite(keypoint_xyz21_absolute)))
    assert bool(jnp.all(jnp.isfinite(keypoint_uv21)))
    print("KERNEL_OK")
</pallas_src>

<mosaic_0001>
module attributes {stable_mosaic.version = 11 : i64} {
  func.func @_fused_kernel(%arg0: i32, %arg1: i32, %arg2: memref<8x256x32xbf16, #tpu.memory_space<vmem>>, %arg3: memref<32x128xbf16, #tpu.memory_space<vmem>>, %arg4: memref<1x128xf32, #tpu.memory_space<vmem>>, %arg5: memref<128x256xbf16, #tpu.memory_space<vmem>>, %arg6: memref<1x256xf32, #tpu.memory_space<vmem>>, %arg7: memref<256x128xbf16, #tpu.memory_space<vmem>>, %arg8: memref<1x128xf32, #tpu.memory_space<vmem>>, %arg9: memref<128x64xbf16, #tpu.memory_space<vmem>>, %arg10: memref<1x64xf32, #tpu.memory_space<vmem>>, %arg11: memref<64x32xbf16, #tpu.memory_space<vmem>>, %arg12: memref<1x32xf32, #tpu.memory_space<vmem>>, %arg13: memref<32x16xbf16, #tpu.memory_space<vmem>>, %arg14: memref<1x16xf32, #tpu.memory_space<vmem>>, %arg15: memref<16x64xbf16, #tpu.memory_space<vmem>>, %arg16: memref<1x64xf32, #tpu.memory_space<vmem>>, %arg17: memref<1x64xf32, #tpu.memory_space<vmem>>, %arg18: memref<64x128xbf16, #tpu.memory_space<vmem>>, %arg19: memref<1x128xf32, #tpu.memory_space<vmem>>, %arg20: memref<128x128xbf16, #tpu.memory_space<vmem>>, %arg21: memref<1x128xf32, #tpu.memory_space<vmem>>, %arg22: memref<128x128xbf16, #tpu.memory_space<vmem>>, %arg23: memref<1x128xf32, #tpu.memory_space<vmem>>, %arg24: memref<8x640xf32, #tpu.memory_space<vmem>>, %arg25: memref<8x128xf32, #tpu.memory_space<vmem>>, %arg26: memref<8x128xf32, #tpu.memory_space<vmem>>, %arg27: memref<8x128xf32, #tpu.memory_space<vmem>>, %arg28: memref<8x128xf32, #tpu.memory_space<vmem>>) attributes {dimension_semantics = [#tpu.dimension_semantics<parallel>, #tpu.dimension_semantics<arbitrary>], iteration_bounds = array<i64: 1, 1>, scalar_prefetch = 0 : i64, scratch_operands = 1 : i64, tpu.core_type = #tpu.core_type<tc>, window_params = [{transform_indices = @transform_0, window_bounds = array<i64: 8, 256, 32>}, {pipeline_mode = #tpu.pipeline_mode<synchronous>, transform_indices = @transform_1, window_bounds = array<i64: 32, 128>}, {pipeline_mode = #tpu.pipeline_mode<synchronous>, transform_indices = @transform_2, window_bounds = array<i64: 1, 128>}, {pipeline_mode = #tpu.pipeline_mode<synchronous>, transform_indices = @transform_3, window_bounds = array<i64: 128, 256>}, {pipeline_mode = #tpu.pipeline_mode<synchronous>, transform_indices = @transform_4, window_bounds = array<i64: 1, 256>}, {pipeline_mode = #tpu.pipeline_mode<synchronous>, transform_indices = @transform_5, window_bounds = array<i64: 256, 128>}, {pipeline_mode = #tpu.pipeline_mode<synchronous>, transform_indices = @transform_6, window_bounds = array<i64: 1, 128>}, {pipeline_mode = #tpu.pipeline_mode<synchronous>, transform_indices = @transform_7, window_bounds = array<i64: 128, 64>}, {pipeline_mode = #tpu.pipeline_mode<synchronous>, transform_indices = @transform_8, window_bounds = array<i64: 1, 64>}, {pipeline_mode = #tpu.pipeline_mode<synchronous>, transform_indices = @transform_9, window_bounds = array<i64: 64, 32>}, {pipeline_mode = #tpu.pipeline_mode<synchronous>, transform_indices = @transform_10, window_bounds = array<i64: 1, 32>}, {pipeline_mode = #tpu.pipeline_mode<synchronous>, transform_indices = @transform_11, window_bounds = array<i64: 32, 16>}, {pipeline_mode = #tpu.pipeline_mode<synchronous>, transform_indices = @transform_12, window_bounds = array<i64: 1, 16>}, {pipeline_mode = #tpu.pipeline_mode<synchronous>, transform_indices = @transform_13, window_bounds = array<i64: 16, 64>}, {pipeline_mode = #tpu.pipeline_mode<synchronous>, transform_indices = @transform_14, window_bounds = array<i64: 1, 64>}, {pipeline_mode = #tpu.pipeline_mode<synchronous>, transform_indices = @transform_15, window_bounds = array<i64: 1, 64>}, {pipeline_mode = #tpu.pipeline_mode<synchronous>, transform_indices = @transform_16, window_bounds = array<i64: 64, 128>}, {pipeline_mode = #tpu.pipeline_mode<synchronous>, transform_indices = @transform_17, window_bounds = array<i64: 1, 128>}, {pipeline_mode = #tpu.pipeline_mode<synchronous>, transform_indices = @transform_18, window_bounds = array<i64: 128, 128>}, {pipeline_mode = #tpu.pipeline_mode<synchronous>, transform_indices = @transform_19, window_bounds = array<i64: 1, 128>}, {pipeline_mode = #tpu.pipeline_mode<synchronous>, transform_indices = @transform_20, window_bounds = array<i64: 128, 128>}, {pipeline_mode = #tpu.pipeline_mode<synchronous>, transform_indices = @transform_21, window_bounds = array<i64: 1, 128>}, {transform_indices = @transform_22, window_bounds = array<i64: 8, 640>}, {transform_indices = @transform_23, window_bounds = array<i64: 8, 128>}, {transform_indices = @transform_24, window_bounds = array<i64: 8, 128>}, {transform_indices = @transform_25, window_bounds = array<i64: 8, 128>}]} {
    %c0_i32 = arith.constant 0 : i32
    %0 = arith.cmpi eq, %arg1, %c0_i32 : i32
    %1 = arith.extui %0 : i1 to i32
    %c0_i32_0 = arith.constant 0 : i32
    %2 = arith.cmpi ne, %1, %c0_i32_0 : i32
    scf.if %2 {
      %cst_23 = arith.constant 0.000000e+00 : f32
      %36 = vector.broadcast %cst_23 : f32 to vector<8x128xf32>
      %c0_24 = arith.constant 0 : index
      %c0_25 = arith.constant 0 : index
      %37 = vector.load %arg28[%c0_24, %c0_25] : memref<8x128xf32, #tpu.memory_space<vmem>>, vector<8x128xf32>
      tpu.vector_store %arg28[%c0_24, %c0_25], %36 {strides = array<i32>} : memref<8x128xf32, #tpu.memory_space<vmem>>, vector<8x128xf32>,
    } else {
    }
    %c0 = arith.constant 0 : index
    %c0_1 = arith.constant 0 : index
    %c0_2 = arith.constant 0 : index
    %3 = vector.load %arg2[%c0, %c0_1, %c0_2] : memref<8x256x32xbf16, #tpu.memory_space<vmem>>, vector<8x256x32xbf16>
    %4 = vector.shape_cast %3 : vector<8x256x32xbf16> to vector<2048x32xbf16>
    %c0_3 = arith.constant 0 : index
    %c0_4 = arith.constant 0 : index
    %5 = vector.load %arg3[%c0_3, %c0_4] : memref<32x128xbf16, #tpu.memory_space<vmem>>, vector<32x128xbf16>
    %cst = arith.constant dense<0.000000e+00> : vector<2048x128xf32>
    %6 = tpu.matmul %4, %5, %cst {dimension_numbers = #tpu.dot_dimension_numbers<[1], [0], [0], [1], [0, 0, 1, 1], [], []>} : vector<2048x32xbf16>, vector<32x128xbf16>, vector<2048x128xf32> -> vector<2048x128xf32>
    %c0_5 = arith.constant 0 : index
    %c0_6 = arith.constant 0 : index
    %7 = vector.load %arg4[%c0_5, %c0_6] : memref<1x128xf32, #tpu.memory_space<vmem>>, vector<1x128xf32>
    %8 = vector.broadcast %7 : vector<1x128xf32> to vector<2048x128xf32>
    %9 = arith.addf %6, %8 : vector<2048x128xf32>
    %cst_7 = arith.constant 0.000000e+00 : f32
    %10 = vector.broadcast %cst_7 : f32 to vector<2048x128xf32>
    %11 = arith.maximumf %9, %10 : vector<2048x128xf32>
    %cst_8 = arith.constant 1.000000e+00 : f32
    %12 = vector.broadcast %cst_8 : f32 to vector<1x256xf32>
    %13 = vector.extract_strided_slice %11 {offsets = [0, 0], sizes = [256, 128], strides = [1, 1]} : vector<2048x128xf32> to vector<256x128xf32>
    %cst_9 = arith.constant dense<0.000000e+00> : vector<1x128xf32>
    %14 = tpu.matmul %12, %13, %cst_9 {dimension_numbers = #tpu.dot_dimension_numbers<[1], [0], [0], [1], [0, 0, 1, 1], [], []>} : vector<1x256xf32>, vector<256x128xf32>, vector<1x128xf32> -> vector<1x128xf32>
    %15 = vector.extract_strided_slice %11 {offsets = [256, 0], sizes = [256, 128], strides = [1, 1]} : vector<2048x128xf32> to vector<256x128xf32>
    %cst_10 = arith.constant dense<0.000000e+00> : vector<1x128xf32>
    %16 = tpu.matmul %12, %15, %cst_10 {dimension_numbers = #tpu.dot_dimension_numbers<[1], [0], [0], [1], [0, 0, 1, 1], [], []>} : vector<1x256xf32>, vector<256x128xf32>, vector<1x128xf32> -> vector<1x128xf32>
    %17 = vector.extract_strided_slice %11 {offsets = [512, 0], sizes = [256, 128], strides = [1, 1]} : vector<2048x128xf32> to vector<256x128xf32>
    %cst_11 = arith.constant dense<0.000000e+00> : vector<1x128xf32>
    %18 = tpu.matmul %12, %17, %cst_11 {dimension_numbers = #tpu.dot_dimension_numbers<[1], [0], [0], [1], [0, 0, 1, 1], [], []>} : vector<1x256xf32>, vector<256x128xf32>, vector<1x128xf32> -> vector<1x128xf32>
    %19 = vector.extract_strided_slice %11 {offsets = [768, 0], sizes = [256, 128], strides = [1, 1]} : vector<2048x128xf32> to vector<256x128xf32>
    %cst_12 = arith.constant dense<0.000000e+00> : vector<1x128xf32>
    %20 = tpu.matmul %12, %19, %cst_12 {dimension_numbers = #tpu.dot_dimension_numbers<[1], [0], [0], [1], [0, 0, 1, 1], [], []>} : vector<1x256xf32>, vector<256x128xf32>, vector<1x128xf32> -> vector<1x128xf32>
    %21 = vector.extract_strided_slice %11 {offsets = [1024, 0], sizes = [256, 128], strides = [1, 1]} : vector<2048x128xf32> to vector<256x128xf32>
    %cst_13 = arith.constant dense<0.000000e+00> : vector<1x128xf32>
    %22 = tpu.matmul %12, %21, %cst_13 {dimension_numbers = #tpu.dot_dimension_numbers<[1], [0], [0], [1], [0, 0, 1, 1], [], []>} : vector<1x256xf32>, vector<256x128xf32>, vector<1x128xf32> -> vector<1x128xf32>
    %23 = vector.extract_strided_slice %11 {offsets = [1280, 0], sizes = [256, 128], strides = [1, 1]} : vector<2048x128xf32> to vector<256x128xf32>
    %cst_14 = arith.constant dense<0.000000e+00> : vector<1x128xf32>
    %24 = tpu.matmul %12, %23, %cst_14 {dimension_numbers = #tpu.dot_dimension_numbers<[1], [0], [0], [1], [0, 0, 1, 1], [], []>} : vector<1x256xf32>, vector<256x128xf32>, vector<1x128xf32> -> vector<1x128xf32>
    %25 = vector.extract_strided_slice %11 {offsets = [1536, 0], sizes = [256, 128], strides = [1, 1]} : vector<2048x128xf32> to vector<256x128xf32>
    %cst_15 = arith.constant dense<0.000000e+00> : vector<1x128xf32>
    %26 = tpu.matmul %12, %25, %cst_15 {dimension_numbers = #tpu.dot_dimension_numbers<[1], [0], [0], [1], [0, 0, 1, 1], [], []>} : vector<1x256xf32>, vector<256x128xf32>, vector<1x128xf32> -> vector<1x128xf32>
    %27 = vector.extract_strided_slice %11 {offsets = [1792, 0], sizes = [256, 128], strides = [1, 1]} : vector<2048x128xf32> to vector<256x128xf32>
    %cst_16 = arith.constant dense<0.000000e+00> : vector<1x128xf32>
    %28 = tpu.matmul %12, %27, %cst_16 {dimension_numbers = #tpu.dot_dimension_numbers<[1], [0], [0], [1], [0, 0, 1, 1], [], []>} : vector<1x256xf32>, vector<256x128xf32>, vector<1x128xf32> -> vector<1x128xf32>
    %c0_17 = arith.constant 0 : index
    %c0_18 = arith.constant 0 : index
    %29 = vector.load %arg28[%c0_17, %c0_18] : memref<8x128xf32, #tpu.memory_space<vmem>>, vector<8x128xf32>
    %30 = tpu.concatenate %14, %16, %18, %20, %22, %24, %26, %28 in 0 : vector<1x128xf32>, vector<1x128xf32>, vector<1x128xf32>, vector<1x128xf32>, vector<1x128xf32>, vector<1x128xf32>, vector<1x128xf32>, vector<1x128xf32> -> vector<8x128xf32>
    %31 = arith.addf %29, %30 : vector<8x128xf32>
    %c0_19 = arith.constant 0 : index
    %c0_20 = arith.constant 0 : index
    %32 = vector.load %arg28[%c0_19, %c0_20] : memref<8x128xf32, #tpu.memory_space<vmem>>, vector<8x128xf32>
    tpu.vector_store %arg28[%c0_19, %c0_20], %31 {strides = array<i32>} : memref<8x128xf32, #tpu.memory_space<vmem>>, vector<8x128xf32>,
    %c0_i32_21 = arith.constant 0 : i32
    %33 = arith.cmpi eq, %arg1, %c0_i32_21 : i32
    %34 = arith.extui %33 : i1 to i32
    %c0_i32_22 = arith.constant 0 : i32
    %35 = arith.cmpi ne, %34, %c0_i32_22 : i32
    scf.if %35 {
      %c0_23 = arith.constant 0 : index
      %c0_24 = arith.constant 0 : index
      %36 = vector.load %arg28[%c0_23, %c0_24] : memref<8x128xf32, #tpu.memory_space<vmem>>, vector<8x128xf32>
      %cst_25 = arith.constant 3.906250e-03 : f32
      %37 = vector.broadcast %cst_25 : f32 to vector<8x128xf32>
      %38 = arith.mulf %36, %37 : vector<8x128xf32>
      %39 = arith.truncf %38 : vector<8x128xf32> to vector<8x128xbf16>
      %c0_26 = arith.constant 0 : index
      %c0_27 = arith.constant 0 : index
      %40 = vector.load %arg5[%c0_26, %c0_27] : memref<128x256xbf16, #tpu.memory_space<vmem>>, vector<128x256xbf16>
      %cst_28 = arith.constant dense<0.000000e+00> : vector<8x256xf32>
      %41 = tpu.matmul %39, %40, %cst_28 {dimension_numbers = #tpu.dot_dimension_numbers<[1], [0], [0], [1], [0, 0, 1, 1], [], []>} : vector<8x128xbf16>, vector<128x256xbf16>, vector<8x256xf32> -> vector<8x256xf32>
      %c0_29 = arith.constant 0 : index
      %c0_30 = arith.constant 0 : index
      %42 = vector.load %arg6[%c0_29, %c0_30] : memref<1x256xf32, #tpu.memory_space<vmem>>, vector<1x256xf32>
      %43 = vector.broadcast %42 : vector<1x256xf32> to vector<8x256xf32>
      %44 = arith.addf %41, %43 : vector<8x256xf32>
      %45 = arith.truncf %44 : vector<8x256xf32> to vector<8x256xbf16>
      %c0_31 = arith.constant 0 : index
      %c0_32 = arith.constant 0 : index
      %46 = vector.load %arg7[%c0_31, %c0_32] : memref<256x128xbf16, #tpu.memory_space<vmem>>, vector<256x128xbf16>
      %cst_33 = arith.constant dense<0.000000e+00> : vector<8x128xf32>
      %47 = tpu.matmul %45, %46, %cst_33 {dimension_numbers = #tpu.dot_dimension_numbers<[1], [0], [0], [1], [0, 0, 1, 1], [], []>} : vector<8x256xbf16>, vector<256x128xbf16>, vector<8x128xf32> -> vector<8x128xf32>
      %c0_34 = arith.constant 0 : index
      %c0_35 = arith.constant 0 : index
      %48 = vector.load %arg8[%c0_34, %c0_35] : memref<1x128xf32, #tpu.memory_space<vmem>>, vector<1x128xf32>
      %49 = vector.broadcast %48 : vector<1x128xf32> to vector<8x128xf32>
      %50 = arith.addf %47, %49 : vector<8x128xf32>
      %cst_36 = arith.constant 0.000000e+00 : f32
      %51 = vector.broadcast %cst_36 : f32 to vector<8x128xf32>
      %52 = arith.maximumf %50, %51 : vector<8x128xf32>
      %53 = arith.truncf %52 : vector<8x128xf32> to vector<8x128xbf16>
      %c0_37 = arith.constant 0 : index
      %c0_38 = arith.constant 0 : index
      %54 = vector.load %arg9[%c0_37, %c0_38] : memref<128x64xbf16, #tpu.memory_space<vmem>>, vector<128x64xbf16>
      %cst_39 = arith.constant dense<0.000000e+00> : vector<8x64xf32>
      %55 = tpu.matmul %53, %54, %cst_39 {dimension_numbers = #tpu.dot_dimension_numbers<[1], [0], [0], [1], [0, 0, 1, 1], [], []>} : vector<8x128xbf16>, vector<128x64xbf16>, vector<8x64xf32> -> vector<8x64xf32>
      %c0_40 = arith.constant 0 : index
      %c0_41 = arith.constant 0 : index
      %56 = vector.load %arg10[%c0_40, %c0_41] : memref<1x64xf32, #tpu.memory_space<vmem>>, vector<1x64xf32>
      %57 = vector.broadcast %56 : vector<1x64xf32> to vector<8x64xf32>
      %58 = arith.addf %55, %57 : vector<8x64xf32>
      %cst_42 = arith.constant 0.000000e+00 : f32
      %59 = vector.broadcast %cst_42 : f32 to vector<8x64xf32>
      %60 = arith.maximumf %58, %59 : vector<8x64xf32>
      %61 = arith.truncf %60 : vector<8x64xf32> to vector<8x64xbf16>
      %c0_43 = arith.constant 0 : index
      %c0_44 = arith.constant 0 : index
      %62 = vector.load %arg11[%c0_43, %c0_44] : memref<64x32xbf16, #tpu.memory_space<vmem>>, vector<64x32xbf16>
      %cst_45 = arith.constant dense<0.000000e+00> : vector<8x32xf32>
      %63 = tpu.matmul %61, %62, %cst_45 {dimension_numbers = #tpu.dot_dimension_numbers<[1], [0], [0], [1], [0, 0, 1, 1], [], []>} : vector<8x64xbf16>, vector<64x32xbf16>, vector<8x32xf32> -> vector<8x32xf32>
      %c0_46 = arith.constant 0 : index
      %c0_47 = arith.constant 0 : index
      %64 = vector.load %arg12[%c0_46, %c0_47] : memref<1x32xf32, #tpu.memory_space<vmem>>, vector<1x32xf32>
      %65 = vector.broadcast %64 : vector<1x32xf32> to vector<8x32xf32>
      %66 = arith.addf %63, %65 : vector<8x32xf32>
      %cst_48 = arith.constant 0.000000e+00 : f32
      %67 = vector.broadcast %cst_48 : f32 to vector<8x32xf32>
      %68 = arith.maximumf %66, %67 : vector<8x32xf32>
      %69 = arith.truncf %68 : vector<8x32xf32> to vector<8x32xbf16>
      %c0_49 = arith.constant 0 : index
      %c0_50 = arith.constant 0 : index
      %70 = vector.load %arg13[%c0_49, %c0_50] : memref<32x16xbf16, #tpu.memory_space<vmem>>, vector<32x16xbf16>
      %cst_51 = arith.constant dense<0.000000e+00> : vector<8x16xf32>
      %71 = tpu.matmul %69, %70, %cst_51 {dimension_numbers = #tpu.dot_dimension_numbers<[1], [0], [0], [1], [0, 0, 1, 1], [], []>} : vector<8x32xbf16>, vector<32x16xbf16>, vector<8x16xf32> -> vector<8x16xf32>
      %c0_52 = arith.constant 0 : index
      %c0_53 = arith.constant 0 : index
      %72 = vector.load %arg14[%c0_52, %c0_53] : memref<1x16xf32, #tpu.memory_space<vmem>>, vector<1x16xf32>
      %73 = vector.broadcast %72 : vector<1x16xf32> to vector<8x16xf32>
      %74 = arith.addf %71, %73 : vector<8x16xf32>
      %cst_54 = arith.constant 0.000000e+00 : f32
      %75 = vector.broadcast %cst_54 : f32 to vector<8x16xf32>
      %76 = arith.maximumf %74, %75 : vector<8x16xf32>
      %77 = arith.truncf %76 : vector<8x16xf32> to vector<8x16xbf16>
      %c0_55 = arith.constant 0 : index
      %c0_56 = arith.constant 0 : index
      %78 = vector.load %arg15[%c0_55, %c0_56] : memref<16x64xbf16, #tpu.memory_space<vmem>>, vector<16x64xbf16>
      %cst_57 = arith.constant dense<0.000000e+00> : vector<8x64xf32>
      %79 = tpu.matmul %77, %78, %cst_57 {dimension_numbers = #tpu.dot_dimension_numbers<[1], [0], [0], [1], [0, 0, 1, 1], [], []>} : vector<8x16xbf16>, vector<16x64xbf16>, vector<8x64xf32> -> vector<8x64xf32>
      %c0_58 = arith.constant 0 : index
      %c0_59 = arith.constant 0 : index
      %80 = vector.load %arg16[%c0_58, %c0_59] : memref<1x64xf32, #tpu.memory_space<vmem>>, vector<1x64xf32>
      %81 = vector.broadcast %80 : vector<1x64xf32> to vector<8x64xf32>
      %82 = arith.addf %79, %81 : vector<8x64xf32>
      %83 = arith.negf %82 : vector<8x64xf32>
      %84 = math.exp %83 : vector<8x64xf32>
      %cst_60 = arith.constant 1.000000e+00 : f32
      %85 = vector.broadcast %cst_60 : f32 to vector<8x64xf32>
      %86 = arith.addf %85, %84 : vector<8x64xf32>
      %87 = arith.divf %85, %86 : vector<8x64xf32>
      %c0_61 = arith.constant 0 : index
      %c0_62 = arith.constant 0 : index
      %88 = vector.load %arg17[%c0_61, %c0_62] : memref<1x64xf32, #tpu.memory_space<vmem>>, vector<1x64xf32>
      %89 = vector.broadcast %88 : vector<1x64xf32> to vector<8x64xf32>
      %90 = arith.mulf %87, %89 : vector<8x64xf32>
      %91 = arith.truncf %90 : vector<8x64xf32> to vector<8x64xbf16>
      %c0_63 = arith.constant 0 : index
      %c0_64 = arith.constant 0 : index
      %92 = vector.load %arg18[%c0_63, %c0_64] : memref<64x128xbf16, #tpu.memory_space<vmem>>, vector<64x128xbf16>
      %cst_65 = arith.constant dense<0.000000e+00> : vector<8x128xf32>
      %93 = tpu.matmul %91, %92, %cst_65 {dimension_numbers = #tpu.dot_dimension_numbers<[1], [0], [0], [1], [0, 0, 1, 1], [], []>} : vector<8x64xbf16>, vector<64x128xbf16>, vector<8x128xf32> -> vector<8x128xf32>
      %c0_66 = arith.constant 0 : index
      %c0_67 = arith.constant 0 : index
      %94 = vector.load %arg19[%c0_66, %c0_67] : memref<1x128xf32, #tpu.memory_space<vmem>>, vector<1x128xf32>
      %95 = vector.broadcast %94 : vector<1x128xf32> to vector<8x128xf32>
      %96 = arith.addf %93, %95 : vector<8x128xf32>
      %cst_68 = arith.constant 0.000000e+00 : f32
      %97 = vector.broadcast %cst_68 : f32 to vector<8x128xf32>
      %98 = arith.maximumf %96, %97 : vector<8x128xf32>
      %99 = arith.truncf %98 : vector<8x128xf32> to vector<8x128xbf16>
      %c0_69 = arith.constant 0 : index
      %c0_70 = arith.constant 0 : index
      %100 = vector.load %arg20[%c0_69, %c0_70] : memref<128x128xbf16, #tpu.memory_space<vmem>>, vector<128x128xbf16>
      %cst_71 = arith.constant dense<0.000000e+00> : vector<8x128xf32>
      %101 = tpu.matmul %99, %100, %cst_71 {dimension_numbers = #tpu.dot_dimension_numbers<[1], [0], [0], [1], [0, 0, 1, 1], [], []>} : vector<8x128xbf16>, vector<128x128xbf16>, vector<8x128xf32> -> vector<8x128xf32>
      %c0_72 = arith.constant 0 : index
      %c0_73 = arith.constant 0 : index
      %102 = vector.load %arg21[%c0_72, %c0_73] : memref<1x128xf32, #tpu.memory_space<vmem>>, vector<1x128xf32>
      %103 = vector.broadcast %102 : vector<1x128xf32> to vector<8x128xf32>
      %104 = arith.addf %101, %103 : vector<8x128xf32>
      %105 = tpu.iota {dimensions = array<i32: 1>} : vector<8x128xi32>
      %c45_i32 = arith.constant 45 : i32
      %106 = vector.broadcast %c45_i32 : i32 to vector<8x128xi32>
      %107 = arith.cmpi slt, %105, %106 : vector<8x128xi32>
      %108 = math.tanh %104 : vector<8x128xf32>
      %109 = arith.negf %104 : vector<8x128xf32>
      %110 = math.exp %109 : vector<8x128xf32>
      %cst_74 = arith.constant 1.000000e+00 : f32
      %111 = vector.broadcast %cst_74 : f32 to vector<8x128xf32>
      %112 = arith.addf %111, %110 : vector<8x128xf32>
      %113 = arith.divf %111, %112 : vector<8x128xf32>
      %114 = arith.select %107, %108, %113 : vector<8x128xi1>, vector<8x128xf32>
      %115 = arith.truncf %114 : vector<8x128xf32> to vector<8x128xbf16>
      %c0_75 = arith.constant 0 : index
      %c0_76 = arith.constant 0 : index
      %116 = vector.load %arg22[%c0_75, %c0_76] : memref<128x128xbf16, #tpu.memory_space<vmem>>, vector<128x128xbf16>
      %cst_77 = arith.constant dense<0.000000e+00> : vector<8x128xf32>
      %117 = tpu.matmul %115, %116, %cst_77 {dimension_numbers = #tpu.dot_dimension_numbers<[1], [0], [0], [1], [0, 0, 1, 1], [], []>} : vector<8x128xbf16>, vector<128x128xbf16>, vector<8x128xf32> -> vector<8x128xf32>
      %c0_78 = arith.constant 0 : index
      %c0_79 = arith.constant 0 : index
      %118 = vector.load %arg23[%c0_78, %c0_79] : memref<1x128xf32, #tpu.memory_space<vmem>>, vector<1x128xf32>
      %119 = vector.broadcast %118 : vector<1x128xf32> to vector<8x128xf32>
      %120 = arith.addf %117, %119 : vector<8x128xf32>
      %121 = math.tanh %120 : vector<8x128xf32>
      %c0_80 = arith.constant 0 : index
      %c0_81 = arith.constant 0 : index
      %122 = vector.load %arg24[%c0_80, %c0_81] : memref<8x640xf32, #tpu.memory_space<vmem>>, vector<8x640xf32>
      %123 = vector.extract_strided_slice %122 {offsets = [0, 0], sizes = [8, 128], strides = [1, 1]} : vector<8x640xf32> to vector<8x128xf32>
      %124 = vector.extract_strided_slice %122 {offsets = [0, 128], sizes = [8, 128], strides = [1, 1]} : vector<8x640xf32> to vector<8x128xf32>
      %125 = vector.extract_strided_slice %122 {offsets = [0, 256], sizes = [8, 128], strides = [1, 1]} : vector<8x640xf32> to vector<8x128xf32>
      %126 = vector.extract_strided_slice %122 {offsets = [0, 384], sizes = [8, 128], strides = [1, 1]} : vector<8x640xf32> to vector<8x128xf32>
      %127 = vector.extract_strided_slice %122 {offsets = [0, 512], sizes = [8, 128], strides = [1, 1]} : vector<8x640xf32> to vector<8x128xf32>
      %128 = arith.mulf %121, %123 : vector<8x128xf32>
      %129 = arith.addf %128, %124 : vector<8x128xf32>
      %130 = arith.mulf %125, %129 : vector<8x128xf32>
      %131 = arith.mulf %126, %129 : vector<8x128xf32>
      %132 = arith.mulf %127, %129 : vector<8x128xf32>
      %133 = vector.extract_strided_slice %130 {offsets = [0, 0], sizes = [8, 32], strides = [1, 1]} : vector<8x128xf32> to vector<8x32xf32>
      %134 = vector.extract_strided_slice %130 {offsets = [0, 32], sizes = [8, 32], strides = [1, 1]} : vector<8x128xf32> to vector<8x32xf32>
      %135 = arith.addf %133, %134 : vector<8x32xf32>
      %136 = vector.extract_strided_slice %130 {offsets = [0, 64], sizes = [8, 32], strides = [1, 1]} : vector<8x128xf32> to vector<8x32xf32>
      %137 = arith.addf %135, %136 : vector<8x32xf32>
      %138 = vector.extract_strided_slice %131 {offsets = [0, 0], sizes = [8, 32], strides = [1, 1]} : vector<8x128xf32> to vector<8x32xf32>
      %139 = vector.extract_strided_slice %131 {offsets = [0, 32], sizes = [8, 32], strides = [1, 1]} : vector<8x128xf32> to vector<8x32xf32>
      %140 = arith.addf %138, %139 : vector<8x32xf32>
      %141 = vector.extract_strided_slice %131 {offsets = [0, 64], sizes = [8, 32], strides = [1, 1]} : vector<8x128xf32> to vector<8x32xf32>
      %142 = arith.addf %140, %141 : vector<8x32xf32>
      %143 = vector.extract_strided_slice %132 {offsets = [0, 0], sizes = [8, 32], strides = [1, 1]} : vector<8x128xf32> to vector<8x32xf32>
      %144 = vector.extract_strided_slice %132 {offsets = [0, 32], sizes = [8, 32], strides = [1, 1]} : vector<8x128xf32> to vector<8x32xf32>
      %145 = arith.addf %143, %144 : vector<8x32xf32>
      %146 = vector.extract_strided_slice %132 {offsets = [0, 64], sizes = [8, 32], strides = [1, 1]} : vector<8x128xf32> to vector<8x32xf32>
      %147 = arith.addf %145, %146 : vector<8x32xf32>
      %148 = math.absf %147 : vector<8x32xf32>
      %cst_82 = arith.constant 9.99999997E-7 : f32
      %149 = vector.broadcast %cst_82 : f32 to vector<8x32xf32>
      %150 = arith.cmpf olt, %148, %149 : vector<8x32xf32>
      %cst_83 = arith.constant 0.000000e+00 : f32
      %151 = vector.broadcast %cst_83 : f32 to vector<8x32xf32>
      %152 = arith.cmpf oge, %147, %151 : vector<8x32xf32>
      %cst_84 = arith.constant 0.000000e+00 : f32
      %cst_85 = arith.constant 9.99999997E-7 : f32
      %153 = arith.subf %cst_84, %cst_85 : f32
      %cst_86 = arith.constant 9.99999997E-7 : f32
      %154 = vector.broadcast %cst_86 : f32 to vector<8x32xf32>
      %155 = vector.broadcast %153 : f32 to vector<8x32xf32>
      %156 = arith.select %152, %154, %155 : vector<8x32xi1>, vector<8x32xf32>
      %157 = arith.select %150, %156, %147 : vector<8x32xi1>, vector<8x32xf32>
      %158 = arith.divf %137, %157 : vector<8x32xf32>
      %159 = arith.divf %142, %157 : vector<8x32xf32>
      %cst_87 = arith.constant 0.000000e+00 : f32
      %160 = vector.broadcast %cst_87 : f32 to vector<8x64xf32>
      %c0_88 = arith.constant 0 : index
      %c0_89 = arith.constant 0 : index
      %161 = vector.load %arg25[%c0_88, %c0_89] : memref<8x128xf32, #tpu.memory_space<vmem>>, vector<8x128xf32>
      tpu.vector_store %arg25[%c0_88, %c0_89], %129 {strides = array<i32>} : memref<8x128xf32, #tpu.memory_space<vmem>>, vector<8x128xf32>,
      %162 = tpu.concatenate %158, %159, %160 in 1 : vector<8x32xf32>, vector<8x32xf32>, vector<8x64xf32> -> vector<8x128xf32>
      %c0_90 = arith.constant 0 : index
      %c0_91 = arith.constant 0 : index
      %163 = vector.load %arg26[%c0_90, %c0_91] : memref<8x128xf32, #tpu.memory_space<vmem>>, vector<8x128xf32>
      tpu.vector_store %arg26[%c0_90, %c0_91], %162 {strides = array<i32>} : memref<8x128xf32, #tpu.memory_space<vmem>>, vector<8x128xf32>,
      %164 = tpu.concatenate %90, %160 in 1 : vector<8x64xf32>, vector<8x64xf32> -> vector<8x128xf32>
      %c0_92 = arith.constant 0 : index
      %c0_93 = arith.constant 0 : index
      %165 = vector.load %arg27[%c0_92, %c0_93] : memref<8x128xf32, #tpu.memory_space<vmem>>, vector<8x128xf32>
      tpu.vector_store %arg27[%c0_92, %c0_93], %164 {strides = array<i32>} : memref<8x128xf32, #tpu.memory_space<vmem>>, vector<8x128xf32>,
    } else {
    }
    return
  }
  func.func @transform_0(%arg0: i32, %arg1: i32) -> (i32, i32, i32) {
    %c0_i32 = arith.constant 0 : i32
    %c0_i32_0 = arith.constant 0 : i32
    return %arg0, %arg1, %c0_i32 : i32, i32, i32
  }
  func.func @transform_1(%arg0: i32, %arg1: i32) -> (i32, i32) {
    %c0_i32 = arith.constant 0 : i32
    %c0_i32_0 = arith.constant 0 : i32
    %c0_i32_1 = arith.constant 0 : i32
    return %c0_i32, %c0_i32_0 : i32, i32
  }
  func.func @transform_2(%arg0: i32, %arg1: i32) -> (i32, i32) {
    %c0_i32 = arith.constant 0 : i32
    %c0_i32_0 = arith.constant 0 : i32
    %c0_i32_1 = arith.constant 0 : i32
    return %c0_i32, %c0_i32_0 : i32, i32
  }
  func.func @transform_3(%arg0: i32, %arg1: i32) -> (i32, i32) {
    %c0_i32 = arith.constant 0 : i32
    %c0_i32_0 = arith.constant 0 : i32
    %c0_i32_1 = arith.constant 0 : i32
    return %c0_i32, %c0_i32_0 : i32, i32
  }
  func.func @transform_4(%arg0: i32, %arg1: i32) -> (i32, i32) {
    %c0_i32 = arith.constant 0 : i32
    %c0_i32_0 = arith.constant 0 : i32
    %c0_i32_1 = arith.constant 0 : i32
    return %c0_i32, %c0_i32_0 : i32, i32
  }
  func.func @transform_5(%arg0: i32, %arg1: i32) -> (i32, i32) {
    %c0_i32 = arith.constant 0 : i32
    %c0_i32_0 = arith.constant 0 : i32
    %c0_i32_1 = arith.constant 0 : i32
    return %c0_i32, %c0_i32_0 : i32, i32
  }
  func.func @transform_6(%arg0: i32, %arg1: i32) -> (i32, i32) {
    %c0_i32 = arith.constant 0 : i32
    %c0_i32_0 = arith.constant 0 : i32
    %c0_i32_1 = arith.constant 0 : i32
    return %c0_i32, %c0_i32_0 : i32, i32
  }
  func.func @transform_7(%arg0: i32, %arg1: i32) -> (i32, i32) {
    %c0_i32 = arith.constant 0 : i32
    %c0_i32_0 = arith.constant 0 : i32
    %c0_i32_1 = arith.constant 0 : i32
    return %c0_i32, %c0_i32_0 : i32, i32
  }
  func.func @transform_8(%arg0: i32, %arg1: i32) -> (i32, i32) {
    %c0_i32 = arith.constant 0 : i32
    %c0_i32_0 = arith.constant 0 : i32
    %c0_i32_1 = arith.constant 0 : i32
    return %c0_i32, %c0_i32_0 : i32, i32
  }
  func.func @transform_9(%arg0: i32, %arg1: i32) -> (i32, i32) {
    %c0_i32 = arith.constant 0 : i32
    %c0_i32_0 = arith.constant 0 : i32
    %c0_i32_1 = arith.constant 0 : i32
    return %c0_i32, %c0_i32_0 : i32, i32
  }
  func.func @transform_10(%arg0: i32, %arg1: i32) -> (i32, i32) {
    %c0_i32 = arith.constant 0 : i32
    %c0_i32_0 = arith.constant 0 : i32
    %c0_i32_1 = arith.constant 0 : i32
    return %c0_i32, %c0_i32_0 : i32, i32
  }
  func.func @transform_11(%arg0: i32, %arg1: i32) -> (i32, i32) {
    %c0_i32 = arith.constant 0 : i32
    %c0_i32_0 = arith.constant 0 : i32
    %c0_i32_1 = arith.constant 0 : i32
    return %c0_i32, %c0_i32_0 : i32, i32
  }
  func.func @transform_12(%arg0: i32, %arg1: i32) -> (i32, i32) {
    %c0_i32 = arith.constant 0 : i32
    %c0_i32_0 = arith.constant 0 : i32
    %c0_i32_1 = arith.constant 0 : i32
    return %c0_i32, %c0_i32_0 : i32, i32
  }
  func.func @transform_13(%arg0: i32, %arg1: i32) -> (i32, i32) {
    %c0_i32 = arith.constant 0 : i32
    %c0_i32_0 = arith.constant 0 : i32
    %c0_i32_1 = arith.constant 0 : i32
    return %c0_i32, %c0_i32_0 : i32, i32
  }
  func.func @transform_14(%arg0: i32, %arg1: i32) -> (i32, i32) {
    %c0_i32 = arith.constant 0 : i32
    %c0_i32_0 = arith.constant 0 : i32
    %c0_i32_1 = arith.constant 0 : i32
    return %c0_i32, %c0_i32_0 : i32, i32
  }
  func.func @transform_15(%arg0: i32, %arg1: i32) -> (i32, i32) {
    %c0_i32 = arith.constant 0 : i32
    %c0_i32_0 = arith.constant 0 : i32
    %c0_i32_1 = arith.constant 0 : i32
    return %c0_i32, %c0_i32_0 : i32, i32
  }
  func.func @transform_16(%arg0: i32, %arg1: i32) -> (i32, i32) {
    %c0_i32 = arith.constant 0 : i32
    %c0_i32_0 = arith.constant 0 : i32
    %c0_i32_1 = arith.constant 0 : i32
    return %c0_i32, %c0_i32_0 : i32, i32
  }
  func.func @transform_17(%arg0: i32, %arg1: i32) -> (i32, i32) {
    %c0_i32 = arith.constant 0 : i32
    %c0_i32_0 = arith.constant 0 : i32
    %c0_i32_1 = arith.constant 0 : i32
    return %c0_i32, %c0_i32_0 : i32, i32
  }
  func.func @transform_18(%arg0: i32, %arg1: i32) -> (i32, i32) {
    %c0_i32 = arith.constant 0 : i32
    %c0_i32_0 = arith.constant 0 : i32
    %c0_i32_1 = arith.constant 0 : i32
    return %c0_i32, %c0_i32_0 : i32, i32
  }
  func.func @transform_19(%arg0: i32, %arg1: i32) -> (i32, i32) {
    %c0_i32 = arith.constant 0 : i32
    %c0_i32_0 = arith.constant 0 : i32
    %c0_i32_1 = arith.constant 0 : i32
    return %c0_i32, %c0_i32_0 : i32, i32
  }
  func.func @transform_20(%arg0: i32, %arg1: i32) -> (i32, i32) {
    %c0_i32 = arith.constant 0 : i32
    %c0_i32_0 = arith.constant 0 : i32
    %c0_i32_1 = arith.constant 0 : i32
    return %c0_i32, %c0_i32_0 : i32, i32
  }
  func.func @transform_21(%arg0: i32, %arg1: i32) -> (i32, i32) {
    %c0_i32 = arith.constant 0 : i32
    %c0_i32_0 = arith.constant 0 : i32
    %c0_i32_1 = arith.constant 0 : i32
    return %c0_i32, %c0_i32_0 : i32, i32
  }
  func.func @transform_22(%arg0: i32, %arg1: i32) -> (i32, i32) {
    %c0_i32 = arith.constant 0 : i32
    %c0_i32_0 = arith.constant 0 : i32
    return %arg0, %c0_i32 : i32, i32
  }
  func.func @transform_23(%arg0: i32, %arg1: i32) -> (i32, i32) {
    %c0_i32 = arith.constant 0 : i32
    %c0_i32_0 = arith.constant 0 : i32
    return %arg0, %c0_i32 : i32, i32
  }
  func.func @transform_24(%arg0: i32, %arg1: i32) -> (i32, i32) {
    %c0_i32 = arith.constant 0 : i32
    %c0_i32_0 = arith.constant 0 : i32
    return %arg0, %c0_i32 : i32, i32
  }
  func.func @transform_25(%arg0: i32, %arg1: i32) -> (i32, i32) {
    %c0_i32 = arith.constant 0 : i32
    %c0_i32_0 = arith.constant 0 : i32
    return %arg0, %c0_i32 : i32, i32
  }
}

</mosaic_0001>

<bundles_post_ra>
// kernel: two_dim_hand_pose_with_fk.1
= control target key start
LH: loop header
LB: loop body
LE: loop exit
PB: predicated region body
PF: predicated region fallthrough
CT: control target
= control target key end

     0   :  { %s7519_s0 = inlined_call_operand.vmem [shape: bf16[8,256,32], index: 0, kind: input, shape index: {}]   ;;  %s7520_s1 = inlined_call_operand.vmem [shape: bf16[32,128], index: 1, kind: input, shape index: {}]   ;;  %s7521_s2 = inlined_call_operand.vmem [shape: f32[1,128], index: 2, kind: input, shape index: {}]   ;;  %s7522_s3 = inlined_call_operand.vmem [shape: bf16[128,256], index: 3, kind: input, shape index: {}]   ;;  %s7523_s4 = inlined_call_operand.vmem [shape: f32[1,256], index: 4, kind: input, shape index: {}]   ;;  %s7524_s5 = inlined_call_operand.vmem [shape: bf16[256,128], index: 5, kind: input, shape index: {}]   ;;  %s7525_s6 = inlined_call_operand.vmem [shape: f32[1,128], index: 6, kind: input, shape index: {}]   ;;  %s7526_s7 = inlined_call_operand.vmem [shape: bf16[128,64], index: 7, kind: input, shape index: {}]   ;;  %s7527_s8 = inlined_call_operand.vmem [shape: f32[1,64], index: 8, kind: input, shape index: {}]   ;;  %s7528_s9 = inlined_call_operand.vmem [shape: bf16[64,32], index: 9, kind: input, shape index: {}]   ;;  %s7529_s10 = inlined_call_operand.vmem [shape: f32[1,32], index: 10, kind: input, shape index: {}]   ;;  %s7530_s11 = inlined_call_operand.vmem [shape: bf16[32,16], index: 11, kind: input, shape index: {}]   ;;  %s7531_s12 = inlined_call_operand.vmem [shape: f32[1,16], index: 12, kind: input, shape index: {}]   ;;  %s7532_s13 = inlined_call_operand.vmem [shape: bf16[16,64], index: 13, kind: input, shape index: {}]   ;;  %s7533_s14 = inlined_call_operand.vmem [shape: f32[1,64], index: 14, kind: input, shape index: {}]   ;;  %s7534_s15 = inlined_call_operand.vmem [shape: f32[1,64], index: 15, kind: input, shape index: {}]   ;;  %s7535_s16 = inlined_call_operand.vmem [shape: bf16[64,128], index: 16, kind: input, shape index: {}]   ;;  %s7536_s17 = inlined_call_operand.vmem [shape: f32[1,128], index: 17, kind: input, shape index: {}]   ;;  %s7537_s18 = inlined_call_operand.vmem [shape: bf16[128,128], index: 18, kind: input, shape index: {}]   ;;  %s7538_s19 = inlined_call_operand.vmem [shape: f32[1,128], index: 19, kind: input, shape index: {}]   ;;  %s7539_s20 = inlined_call_operand.vmem [shape: bf16[128,128], index: 20, kind: input, shape index: {}]   ;;  %s7540_s21 = inlined_call_operand.vmem [shape: f32[1,128], index: 21, kind: input, shape index: {}]   ;;  %s7541_s22 = inlined_call_operand.vmem [shape: f32[8,640], index: 22, kind: input, shape index: {}]   ;;  %s7542_s23 = inlined_call_operand.vmem [shape: f32[8,128], index: 23, kind: output, shape index: {0}]   ;;  %s7543_s24 = inlined_call_operand.hbm [shape: f32[8,128], index: 24, kind: output, shape index: {1}]   ;;  %s7544_s25 = inlined_call_operand.vmem [shape: f32[8,128], index: 25, kind: output, shape index: {2}]  }
   0x1   :  { %7552 = sst [smem:[#allocation6_spill]] %s7519_s0 }
   0x2   :  { %7553 = sst [smem:[#allocation7_spill]] %s7520_s1 }
   0x3   :  { %7554 = sst [smem:[#allocation8_spill]] %s7521_s2 }
   0x4   :  { %7555 = sst [smem:[#allocation9_spill]] %s7522_s3 }
   0x5   :  { %7556 = sst [smem:[#allocation10_spill]] %s7523_s4 }
   0x6   :  { %7557 = sst [smem:[#allocation11_spill]] %s7524_s5 }
   0x7   :  { %7558 = sst [smem:[#allocation12_spill]] %s7525_s6 }
   0x8   :  { %7559 = sst [smem:[#allocation13_spill]] %s7526_s7 }
   0x9   :  { %7560 = sst [smem:[#allocation14_spill]] %s7527_s8 }
   0xa   :  { %7561 = sst [smem:[#allocation15_spill]] %s7528_s9 }
   0xb   :  { %s7562_s6 = sld [smem:[#allocation7_spill]]  ;;  %vm1003_vm0 = vcmask 261120   ;;  %s7563_s1 = sld [smem:[#allocation6_spill]] }
  0x11   :  { %v5811_v0 = vld [vmem:[%s7562_s6] sm:$0xff]   ;;  %v5812_v1 = vld [vmem:[%s7562_s6 + $0x8] sm:$0xff]   ;;  %v5815_v4 = vld [vmem:[%s7563_s1 + $0x10] sm:$0xff]  }
  0x12   :  { %5184 = vmatprep.subr.bf16.mxu0 %v5811_v0  ;;  %v5813_v2 = vld [vmem:[%s7563_s1] sm:$0xff]   ;;  %5798 = vmatprep.subr.bf16.mxu1 %v5811_v0  ;;  %v5814_v3 = vld [vmem:[%s7563_s1 + $0x8] sm:$0xff]   ;;  %v5816_v5 = vld [vmem:[%s7563_s1 + $0x18] sm:$0xff]  }
  0x13   :  { %5185 = vmatpush3.bf16.msra.mxu0 %v5811_v0  ;;  %5800 = vmatpush3.bf16.msra.mxu1 %v5811_v0  ;;  %v5817_v6 = vld [vmem:[%s7563_s1 + $0x20] sm:$0xff]   ;;  %v5818_v7 = vld [vmem:[%s7563_s1 + $0x28] sm:$0xff]   ;;  %v5819_v8 = vld [vmem:[%s7563_s1 + $0x30] sm:$0xff]  }
  0x14   :  { %5186 = vmatprep.subr.bf16.mxu0 %v5812_v1  ;;  %5188 = vmatprep.mubr.msk.bf16.mxu0 %vm1003_vm0, %v5813_v2  ;;  %v5820_v9 = vld [vmem:[%s7563_s1 + $0x38] sm:$0xff]   ;;  %v5821_v10 = vld [vmem:[%s7563_s1 + $0x40] sm:$0xff]   ;;  %v5822_v11 = vld [vmem:[%s7563_s1 + $0x48] sm:$0xff]  }
  0x15   :  { %5799 = vmatprep.subr.bf16.mxu1 %v5812_v1  ;;  %v5823_v12 = vld [vmem:[%s7563_s1 + $0x50] sm:$0xff]   ;;  %v5824_v13 = vld [vmem:[%s7563_s1 + $0x58] sm:$0xff]   ;;  %v5825_v14 = vld [vmem:[%s7563_s1 + $0x60] sm:$0xff]  }
  0x16   :  { %v5826_v15 = vld [vmem:[%s7563_s1 + $0x68] sm:$0xff]   ;;  %v5827_v16 = vld [vmem:[%s7563_s1 + $0x70] sm:$0xff]   ;;  %v5828_v17 = vld [vmem:[%s7563_s1 + $0x78] sm:$0xff]  }
  0x17   :  { %5187 = vmatpush3.bf16.msra.mxu0 %v5812_v1  ;;  %5801 = vmatpush3.bf16.msra.mxu1 %v5812_v1  ;;  %v5829_v18 = vld [vmem:[%s7563_s1 + $0x80] sm:$0xff]   ;;  %v5830_v19 = vld [vmem:[%s7563_s1 + $0x88] sm:$0xff]   ;;  %v5831_v20 = vld [vmem:[%s7563_s1 + $0x90] sm:$0xff]  }
  0x18   :  { %v5832_v21 = vld [vmem:[%s7563_s1 + $0x98] sm:$0xff]   ;;  %v5833_v22 = vld [vmem:[%s7563_s1 + $0xa0] sm:$0xff]   ;;  %v5834_v23 = vld [vmem:[%s7563_s1 + $0xa8] sm:$0xff]  }
  0x19   :  { %v5835_v24 = vld [vmem:[%s7563_s1 + $0xb0] sm:$0xff]   ;;  %v5836_v25 = vld [vmem:[%s7563_s1 + $0xb8] sm:$0xff]   ;;  %v5837_v26 = vld [vmem:[%s7563_s1 + $0xc0] sm:$0xff]  }
  0x1a   :  { %5189 = vmatmul.mubr.msk.bf16.vlgmr.msra.gmra.mrb[0].mxu0 %vm1003_vm0, %v5814_v3  ;;  %v5838_v27 = vld [vmem:[%s7563_s1 + $0xc8] sm:$0xff]   ;;  %v5839_v28 = vld [vmem:[%s7563_s1 + $0xd0] sm:$0xff]   ;;  %v5840_v29 = vld [vmem:[%s7563_s1 + $0xd8] sm:$0xff]  }
  0x1b   :  { %5192 = vmatprep.mubr.msk.bf16.mxu0 %vm1003_vm0, %v5815_v4  ;;  %v5841_v30 = vld [vmem:[%s7563_s1 + $0xe0] sm:$0xff]   ;;  %v5842_v31 = vld [vmem:[%s7563_s1 + $0xe8] sm:$0xff]   ;;  %v5843_v32 = vld [vmem:[%s7563_s1 + $0xf0] sm:$0xff]  }
  0x1c   :  { %v5844_v33 = vld [vmem:[%s7563_s1 + $0xf8] sm:$0xff]   ;;  %v5845_v34 = vld [vmem:[%s7563_s1 + $0x100] sm:$0xff]   ;;  %v5846_v35 = vld [vmem:[%s7563_s1 + $0x108] sm:$0xff]  }
  0x1d   :  { %v5877_v36 = vld [vmem:[%s7563_s1 + $0x3c0] sm:$0xff]   ;;  %v5878_v37 = vld [vmem:[%s7563_s1 + $0x3c8] sm:$0xff]   ;;  %v5847_v38 = vld [vmem:[%s7563_s1 + $0x110] sm:$0xff]  }
  0x1e   :  { %5428 = vmatprep.mubr.msk.bf16.mxu1 %vm1003_vm0, %v5877_v36  ;;  %v5848_v39 = vld [vmem:[%s7563_s1 + $0x118] sm:$0xff]   ;;  %v5849_v40 = vld [vmem:[%s7563_s1 + $0x120] sm:$0xff]   ;;  %v5850_v41 = vld [vmem:[%s7563_s1 + $0x128] sm:$0xff]  }
  0x1f   :  { %5429 = vmatmul.mubr.msk.bf16.vlgmr.msra.gmra.mrb[0].mxu1 %vm1003_vm0, %v5878_v37 }
  0x22   :  { %5193 = vmatmul.mubr.msk.bf16.gmra.mrb[4].mxu0 %vm1003_vm0, %v5816_v5 }
  0x23   :  { %5196 = vmatprep.mubr.msk.bf16.mxu0 %vm1003_vm0, %v5817_v6 }
  0x2a   :  { %5197 = vmatmul.mubr.msk.bf16.gmra.mrb[8].mxu0 %vm1003_vm0, %v5818_v7 }
  0x2b   :  { %5200 = vmatprep.mubr.msk.bf16.mxu0 %vm1003_vm0, %v5819_v8 }
  0x32   :  { %5201 = vmatmul.mubr.msk.bf16.gmra.mrb[12].mxu0 %vm1003_vm0, %v5820_v9 }
  0x33   :  { %5204 = vmatprep.mubr.msk.bf16.mxu0 %vm1003_vm0, %v5821_v10 }
  0x3a   :  { %5205 = vmatmul.mubr.msk.bf16.gmra.mrb[16].mxu0 %vm1003_vm0, %v5822_v11 }
  0x3b   :  { %5208 = vmatprep.mubr.msk.bf16.mxu0 %vm1003_vm0, %v5823_v12 }
  0x42   :  { %5209 = vmatmul.mubr.msk.bf16.gmra.mrb[20].mxu0 %vm1003_vm0, %v5824_v13 }
  0x43   :  { %5212 = vmatprep.mubr.msk.bf16.mxu0 %vm1003_vm0, %v5825_v14 }
  0x4a   :  { %5213 = vmatmul.mubr.msk.bf16.gmra.mrb[24].mxu0 %vm1003_vm0, %v5826_v15 }
  0x4b   :  { %5216 = vmatprep.mubr.msk.bf16.mxu0 %vm1003_vm0, %v5827_v16 }
  0x52   :  { %5217 = vmatmul.mubr.msk.bf16.gmra.mrb[28].mxu0 %vm1003_vm0, %v5828_v17 }
  0x53   :  { %5220 = vmatprep.mubr.msk.bf16.mxu0 %vm1003_vm0, %v5829_v18 }
  0x5a   :  { %5221 = vmatmul.mubr.msk.bf16.gmra.mrb[32].mxu0 %vm1003_vm0, %v5830_v19 }
  0x5b   :  { %5224 = vmatprep.mubr.msk.bf16.mxu0 %vm1003_vm0, %v5831_v20 }
  0x62   :  { %5225 = vmatmul.mubr.msk.bf16.gmra.mrb[36].mxu0 %vm1003_vm0, %v5832_v21 }
  0x63   :  { %5228 = vmatprep.mubr.msk.bf16.mxu0 %vm1003_vm0, %v5833_v22 }
  0x6a   :  { %5229 = vmatmul.mubr.msk.bf16.gmra.mrb[40].mxu0 %vm1003_vm0, %v5834_v23 }
  0x6b   :  { %5232 = vmatprep.mubr.msk.bf16.mxu0 %vm1003_vm0, %v5835_v24 }
  0x72   :  { %5233 = vmatmul.mubr.msk.bf16.gmra.mrb[44].mxu0 %vm1003_vm0, %v5836_v25 }
  0x73   :  { %5236 = vmatprep.mubr.msk.bf16.mxu0 %vm1003_vm0, %v5837_v26 }
  0x7a   :  { %5237 = vmatmul.mubr.msk.bf16.gmra.mrb[48].mxu0 %vm1003_vm0, %v5838_v27 }
  0x7b   :  { %5240 = vmatprep.mubr.msk.bf16.mxu0 %vm1003_vm0, %v5839_v28 }
  0x82   :  { %5241 = vmatmul.mubr.msk.bf16.gmra.mrb[52].mxu0 %vm1003_vm0, %v5840_v29 }
  0x83   :  { %5244 = vmatprep.mubr.msk.bf16.mxu0 %vm1003_vm0, %v5841_v30 }
  0x8a   :  { %5245 = vmatmul.mubr.msk.bf16.gmra.mrb[56].mxu0 %vm1003_vm0, %v5842_v31 }
  0x8b   :  { %5248 = vmatprep.mubr.msk.bf16.mxu0 %vm1003_vm0, %v5843_v32 }
  0x92   :  { %5249 = vmatmul.mubr.msk.bf16.gmra.mrb[60].mxu0 %vm1003_vm0, %v5844_v33 }
  0x93   :  { %5252 = vmatprep.mubr.msk.bf16.mxu0 %vm1003_vm0, %v5845_v34 }
  0x9a   :  { %5253 = vmatmul.mubr.msk.bf16.gmra.mrb[64].mxu0 %vm1003_vm0, %v5846_v35 }
  0x9b   :  { %5256 = vmatprep.mubr.msk.bf16.mxu0 %vm1003_vm0, %v5847_v38 }
  0xa2   :  { %5257 = vmatmul.mubr.msk.bf16.gmra.mrb[68].mxu0 %vm1003_vm0, %v5848_v39 }
  0xa3   :  { %5260 = vmatprep.mubr.msk.bf16.mxu0 %vm1003_vm0, %v5849_v40 }
  0xa4   :  { %31 = vsyncpa [#allocation4], 0  ;;  %v5851_v42 = vld [vmem:[%s7563_s1 + $0x130] sm:$0xff]   ;;  %v5852_v43 = vld [vmem:[%s7563_s1 + $0x138] sm:$0xff]   ;;  %v6056_v61 = vmov 1.0   ;;  %s7564_s8 = sld [smem:[#allocation8_spill]] }
  0xa5   :  { %v5853_v44 = vld [vmem:[%s7563_s1 + $0x140] sm:$0xff]   ;;  %v5854_v45 = vld [vmem:[%s7563_s1 + $0x148] sm:$0xff]   ;;  %v5855_v46 = vld [vmem:[%s7563_s1 + $0x150] sm:$0xff]   ;;  %vm3283_vm1 = vcmask 1040384   ;;  %vm3285_vm2 = vcmask 1041408   ;;  %vm3287_vm3 = vcmask 1042432  }
  0xa6   :  { %v5889_v47 = vld [vmem:[%s7563_s1 + $0x3d0] sm:$0xff]   ;;  %v5856_v48 = vld [vmem:[%s7563_s1 + $0x158] sm:$0xff]   ;;  %v5857_v50 = vld [vmem:[%s7563_s1 + $0x160] sm:$0xff]   ;;  %vm3289_vm4 = vcmask 1043456   ;;  %s7565_s5 = sld [smem:[#allocation9_spill]]  ;;  %s7566_s30 = sld [smem:[#allocation11_spill]] }
  0xa7   :  { %v5890_v49 = vld [vmem:[%s7563_s1 + $0x3d8] sm:$0xff]   ;;  %5432 = vmatprep.mubr.msk.bf16.mxu1 %vm1003_vm0, %v5889_v47  ;;  %v5893_v51 = vld [vmem:[%s7563_s1 + $0x3e0] sm:$0xff]   ;;  %v5858_v52 = vld [vmem:[%s7563_s1 + $0x168] sm:$0xff]   ;;  %vm3291_vm5 = vcmask 1044480   ;;  %vm3293_vm6 = vcmask 1045504   ;;  %vm3295_vm7 = vcmask 1046528  }
  0xa8   :  { %5433 = vmatmul.mubr.msk.bf16.gmra.mrb[4].mxu1 %vm1003_vm0, %v5890_v49  ;;  %v5894_v53 = vld [vmem:[%s7563_s1 + $0x3e8] sm:$0xff]   ;;  %v5859_v54 = vld [vmem:[%s7563_s1 + $0x170] sm:$0xff]   ;;  %v5860_v56 = vld [vmem:[%s7563_s1 + $0x178] sm:$0xff]   ;;  %s7567_s27 = sld [smem:[#allocation10_spill]]  ;;  %vm6059_vm8 = vmmov 0   ;;  %s7569_s9 = sld [smem:[#allocation12_spill]] }
  0xa9   :  { %5436 = vmatprep.mubr.msk.bf16.mxu1 %vm1003_vm0, %v5893_v51  ;;  %v5897_v55 = vld [vmem:[%s7563_s1 + $0x3f0] sm:$0xff]   ;;  %v5898_v57 = vld [vmem:[%s7563_s1 + $0x3f8] sm:$0xff]   ;;  %v5861_v58 = vld [vmem:[%s7563_s1 + $0x180] sm:$0xff]   ;;  %s7570_s29 = sld [smem:[#allocation15_spill]]  ;;  %s7571_s4 = sld [smem:[#allocation14_spill]]  ;;  %vm3785_vm9 = vcmask 523264  }
  0xaa   :  { %5261 = vmatmul.mubr.msk.bf16.gmra.mrb[72].mxu0 %vm1003_vm0, %v5850_v41  ;;  %v5862_v59 = vld [vmem:[%s7563_s1 + $0x188] sm:$0xff]   ;;  %v5863_v60 = vld [vmem:[%s7563_s1 + $0x190] sm:$0xff]   ;;  %v5864_v62 = vld [vmem:[%s7563_s1 + $0x198] sm:$0xff]   ;;  %vm3914_vm10 = vcmask 130048  }
  0xab   :  { %5264 = vmatprep.mubr.msk.bf16.mxu0 %vm1003_vm0, %v5851_v42  ;;  %v5865_v63 = vld [vmem:[%s7563_s1 + $0x1a0] sm:$0xff]   ;;  %v5866_v0 = vld [vmem:[%s7563_s1 + $0x1a8] sm:$0xff]   ;;  %v5867_v1 = vld [vmem:[%s7563_s1 + $0x1b0] sm:$0xff]  }
  0xac   :  { %v6456_v2 = vld [vmem:[%s7564_s8] ss:$0 sm:$0xff]  ;;  %v5868_v6 = vld [vmem:[%s7563_s1 + $0x1b8] sm:$0xff]   ;;  %v5870_v22 = vld [vmem:[%s7563_s1 + $0x1c8] sm:$0xff]  }
  0xad   :  { %v5869_v9 = vld [vmem:[%s7563_s1 + $0x1c0] sm:$0xff]   ;;  %v5871_v25 = vld [vmem:[%s7563_s1 + $0x1d0] sm:$0xff]   ;;  %v5872_v38 = vld [vmem:[%s7563_s1 + $0x1d8] sm:$0xff]  }
  0xae   :  { %v5873_v41 = vld [vmem:[%s7563_s1 + $0x1e0] sm:$0xff]  }
  0xb0   :  { %5437 = vmatmul.mubr.msk.bf16.gmra.mrb[8].mxu1 %vm1003_vm0, %v5894_v53 }
  0xb1   :  { %5440 = vmatprep.mubr.msk.bf16.mxu1 %vm1003_vm0, %v5897_v55 }
  0xb2   :  { %5265 = vmatmul.mubr.msk.bf16.gmra.mrb[76].mxu0 %vm1003_vm0, %v5852_v43 }
  0xb3   :  { %5268 = vmatprep.mubr.msk.bf16.mxu0 %vm1003_vm0, %v5853_v44 }
  0xb8   :  { %5441 = vmatmul.mubr.msk.bf16.gmra.mrb[12].mxu1 %vm1003_vm0, %v5898_v57  ;;  %v5875_v57 = vld [vmem:[%s7563_s1 + $0x1f0] sm:$0xff]  }
  0xb9   :  { %2765 = vmatprep.mubr.f32.mxu1 %v6056_v61 }
  0xba   :  { %5269 = vmatmul.mubr.msk.bf16.gmra.mrb[80].mxu0 %vm1003_vm0, %v5854_v45 }
  0xbb   :  { %5272 = vmatprep.mubr.msk.bf16.mxu0 %vm1003_vm0, %v5855_v46 }
  0xc2   :  { %5273 = vmatmul.mubr.msk.bf16.gmra.mrb[84].mxu0 %vm1003_vm0, %v5856_v48 }
  0xc3   :  { %5276 = vmatprep.mubr.msk.bf16.mxu0 %vm1003_vm0, %v5857_v50 }
  0xca   :  { %5277 = vmatmul.mubr.msk.bf16.gmra.mrb[88].mxu0 %vm1003_vm0, %v5858_v52 }
  0xcb   :  { %5280 = vmatprep.mubr.msk.bf16.mxu0 %vm1003_vm0, %v5859_v54  ;;  %v5874_v54 = vld [vmem:[%s7563_s1 + $0x1e8] sm:$0xff]  }
  0xd2   :  { %5281 = vmatmul.mubr.msk.bf16.gmra.mrb[92].mxu0 %vm1003_vm0, %v5860_v56 }
  0xd3   :  { %5284 = vmatprep.mubr.msk.bf16.mxu0 %vm1003_vm0, %v5861_v58 }
  0xda   :  { %5285 = vmatmul.mubr.msk.bf16.gmra.mrb[96].mxu0 %vm1003_vm0, %v5862_v59 }
  0xdb   :  { %5288 = vmatprep.mubr.msk.bf16.mxu0 %vm1003_vm0, %v5863_v60 }
  0xe2   :  { %5289 = vmatmul.mubr.msk.bf16.gmra.mrb[100].mxu0 %vm1003_vm0, %v5864_v62 }
  0xe3   :  { %5292 = vmatprep.mubr.msk.bf16.mxu0 %vm1003_vm0, %v5865_v63 }
  0xea   :  { %5293 = vmatmul.mubr.msk.bf16.gmra.mrb[104].mxu0 %vm1003_vm0, %v5866_v0 }
  0xeb   :  { %5296 = vmatprep.mubr.msk.bf16.mxu0 %vm1003_vm0, %v5867_v1 }
  0xed   :  { %v5190_v3 = vpop.f32.mrb[0].mxu0 }
  0xee   :  { %v1431_v4 = vadd.f32 %v5190_v3, %v6456_v2  ;;  %v1422_v5 = vpop.f32.mrb[1].mxu0 }
  0xef   :  { %v1423_v7 = vadd.f32 %v6456_v2, %v1422_v5  ;;  %v5191_v8 = vpop.f32.mrb[2].mxu0 }
  0xf0   :  { %v1434_v10 = vadd.f32 %v5191_v8, %v6456_v2  ;;  %v1425_v11 = vpop.f32.mrb[3].mxu0  ;;  %v2447_v13 = vmax.f32 %v1431_v4, 0.0  ;;  %v5876_v8 = vld [vmem:[%s7563_s1 + $0x1f8] sm:$0xff]  }
  0xf1   :  { %v1426_v12 = vadd.f32 %v6456_v2, %v1425_v11  ;;  %v2445_v15 = vmax.f32 %v1423_v7, 0.0  ;;  %v5879_v11 = vld [vmem:[%s7563_s1 + $0x200] sm:$0xff]  }
  0xf2   :  { %v2448_v14 = vmax.f32 %v1434_v10, 0.0  ;;  %5297 = vmatmul.mubr.msk.bf16.gmra.mrb[108].mxu0 %vm1003_vm0, %v5868_v6 }
  0xf3   :  { %v2446_v16 = vmax.f32 %v1426_v12, 0.0  ;;  %5300 = vmatprep.mubr.msk.bf16.mxu0 %vm1003_vm0, %v5869_v9 }
  0xf4   :  { %v6471_v17 = vpack.c.bf16 %v2448_v14, %v2447_v13 }
  0xf5   :  { %v6473_v18 = vpack.c.bf16 %v2446_v16, %v2445_v15  ;;  %v5194_v19 = vpop.f32.mrb[4].mxu0 }
  0xf6   :  { %v1447_v20 = vadd.f32 %v5194_v19, %v6456_v2  ;;  %v1438_v21 = vpop.f32.mrb[5].mxu0 }
  0xf7   :  { %v1439_v23 = vadd.f32 %v6456_v2, %v1438_v21  ;;  %v5195_v24 = vpop.f32.mrb[6].mxu0 }
  0xf8   :  { %v1450_v26 = vadd.f32 %v5195_v24, %v6456_v2  ;;  %v1441_v27 = vpop.f32.mrb[7].mxu0  ;;  %v2451_v29 = vmax.f32 %v1447_v20, 0.0 }
  0xf9   :  { %v1442_v28 = vadd.f32 %v6456_v2, %v1441_v27  ;;  %v2449_v31 = vmax.f32 %v1439_v23, 0.0 }
  0xfa   :  { %v2452_v30 = vmax.f32 %v1450_v26, 0.0  ;;  %5301 = vmatmul.mubr.msk.bf16.gmra.mrb[112].mxu0 %vm1003_vm0, %v5870_v22  ;;  %v5880_v26 = vld [vmem:[%s7563_s1 + $0x208] sm:$0xff]  }
  0xfb   :  { %v2450_v32 = vmax.f32 %v1442_v28, 0.0  ;;  %5304 = vmatprep.mubr.msk.bf16.mxu0 %vm1003_vm0, %v5871_v25 }
  0xfc   :  { %v6487_v33 = vpack.c.bf16 %v2452_v30, %v2451_v29  ;;  %v5881_v29 = vld [vmem:[%s7563_s1 + $0x210] sm:$0xff]  }
  0xfd   :  { %v6489_v34 = vpack.c.bf16 %v2450_v32, %v2449_v31  ;;  %v5198_v35 = vpop.f32.mrb[8].mxu0 }
  0xfe   :  { %v1463_v36 = vadd.f32 %v5198_v35, %v6456_v2  ;;  %v1454_v37 = vpop.f32.mrb[9].mxu0 }
  0xff   :  { %v1455_v39 = vadd.f32 %v6456_v2, %v1454_v37  ;;  %v5199_v40 = vpop.f32.mrb[10].mxu0 }
 0x100   :  { %v1466_v42 = vadd.f32 %v5199_v40, %v6456_v2  ;;  %v1457_v43 = vpop.f32.mrb[11].mxu0  ;;  %v2455_v45 = vmax.f32 %v1463_v36, 0.0 }
 0x101   :  { %v1458_v44 = vadd.f32 %v6456_v2, %v1457_v43  ;;  %v2453_v47 = vmax.f32 %v1455_v39, 0.0 }
 0x102   :  { %v2456_v46 = vmax.f32 %v1466_v42, 0.0  ;;  %5305 = vmatmul.mubr.msk.bf16.gmra.mrb[116].mxu0 %vm1003_vm0, %v5872_v38 }
 0x103   :  { %v2454_v48 = vmax.f32 %v1458_v44, 0.0  ;;  %5308 = vmatprep.mubr.msk.bf16.mxu0 %vm1003_vm0, %v5873_v41 }
 0x104   :  { %v6503_v49 = vpack.c.bf16 %v2456_v46, %v2455_v45  ;;  %v5883_v46 = vld [vmem:[%s7563_s1 + $0x220] sm:$0xff]  }
 0x105   :  { %v6505_v50 = vpack.c.bf16 %v2454_v48, %v2453_v47  ;;  %v5202_v51 = vpop.f32.mrb[12].mxu0 }
 0x106   :  { %v1479_v52 = vadd.f32 %v5202_v51, %v6456_v2  ;;  %v1470_v53 = vpop.f32.mrb[13].mxu0 }
 0x107   :  { %v1471_v55 = vadd.f32 %v6456_v2, %v1470_v53  ;;  %v5203_v56 = vpop.f32.mrb[14].mxu0 }
 0x108   :  { %v1482_v58 = vadd.f32 %v5203_v56, %v6456_v2  ;;  %v1473_v59 = vpop.f32.mrb[15].mxu0  ;;  %v2459_v62 = vmax.f32 %v1479_v52, 0.0 }
 0x109   :  { %v1474_v60 = vadd.f32 %v6456_v2, %v1473_v59  ;;  %v2457_v0 = vmax.f32 %v1471_v55, 0.0 }
 0x10a   :  { %v2460_v63 = vmax.f32 %v1482_v58, 0.0  ;;  %5309 = vmatmul.mubr.msk.bf16.gmra.mrb[120].mxu0 %vm1003_vm0, %v5874_v54 }
 0x10b   :  { %v2458_v1 = vmax.f32 %v1474_v60, 0.0  ;;  %5312 = vmatprep.mubr.msk.bf16.mxu0 %vm1003_vm0, %v5875_v57 }
 0x10c   :  { %v6519_v3 = vpack.c.bf16 %v2460_v63, %v2459_v62  ;;  %v5885_v63 = vld [vmem:[%s7563_s1 + $0x230] sm:$0xff]  }
 0x10d   :  { %v6521_v4 = vpack.c.bf16 %v2458_v1, %v2457_v0  ;;  %v5206_v5 = vpop.f32.mrb[16].mxu0 }
 0x10e   :  { %v1495_v6 = vadd.f32 %v5206_v5, %v6456_v2  ;;  %v1486_v7 = vpop.f32.mrb[17].mxu0 }
 0x10f   :  { %v1487_v9 = vadd.f32 %v6456_v2, %v1486_v7  ;;  %v5207_v10 = vpop.f32.mrb[18].mxu0 }
 0x110   :  { %v1498_v12 = vadd.f32 %v5207_v10, %v6456_v2  ;;  %v1489_v13 = vpop.f32.mrb[19].mxu0  ;;  %v2463_v15 = vmax.f32 %v1495_v6, 0.0 }
 0x111   :  { %v1490_v14 = vadd.f32 %v6456_v2, %v1489_v13  ;;  %v2461_v19 = vmax.f32 %v1487_v9, 0.0 }
 0x112   :  { %v2464_v16 = vmax.f32 %v1498_v12, 0.0  ;;  %5313 = vmatmul.mubr.msk.bf16.gmra.mrb[124].mxu0 %vm1003_vm0, %v5876_v8 }
 0x113   :  { %v2462_v20 = vmax.f32 %v1490_v14, 0.0  ;;  %5316 = vmatprep.mubr.msk.bf16.mxu0 %vm1003_vm0, %v5879_v11 }
 0x114   :  { %v5546_v21 = vpack.c.bf16 %v2464_v16, %v2463_v15  ;;  %v5887_v16 = vld [vmem:[%s7563_s1 + $0x240] sm:$0xff]  }
 0x115   :  { %v5542_v22 = vpack.c.bf16 %v2462_v20, %v2461_v19  ;;  %v5210_v23 = vpop.f32.mrb[20].mxu0 }
 0x116   :  { %v1511_v24 = vadd.f32 %v5210_v23, %v6456_v2  ;;  %v1502_v25 = vpop.f32.mrb[21].mxu0 }
 0x117   :  { %v1503_v27 = vadd.f32 %v6456_v2, %v1502_v25  ;;  %v5211_v28 = vpop.f32.mrb[22].mxu0  ;;  %5543 = vmatprep.subr.bf16.mxu1 %v5542_v22 }
 0x118   :  { %v1514_v30 = vadd.f32 %v5211_v28, %v6456_v2  ;;  %v1505_v31 = vpop.f32.mrb[23].mxu0  ;;  %5545 = vmatpush3.bf16.msra.mxu1 %v6473_v18  ;;  %v2467_v35 = vmax.f32 %v1511_v24, 0.0  ;;  %v5882_v18 = vld [vmem:[%s7563_s1 + $0x218] sm:$0xff]  }
 0x119   :  { %v1506_v32 = vadd.f32 %v6456_v2, %v1505_v31  ;;  %5547 = vmatprep.subr.bf16.mxu1 %v5546_v21  ;;  %v2465_v37 = vmax.f32 %v1503_v27, 0.0 }
 0x11a   :  { %v2468_v36 = vmax.f32 %v1514_v30, 0.0  ;;  %5317 = vmatmul.mubr.msk.bf16.gmra.mrb[128].mxu0 %vm1003_vm0, %v5880_v26 }
 0x11b   :  { %v2466_v38 = vmax.f32 %v1506_v32, 0.0  ;;  %5320 = vmatprep.mubr.msk.bf16.mxu0 %vm1003_vm0, %v5881_v29  ;;  %v5888_v29 = vld [vmem:[%s7563_s1 + $0x248] sm:$0xff]   ;;  %v5891_v32 = vld [vmem:[%s7563_s1 + $0x250] sm:$0xff]  }
 0x11c   :  { %v5554_v39 = vpack.c.bf16 %v2468_v36, %v2467_v35  ;;  %5549 = vmatpush3.bf16.msra.mxu1 %v6471_v17 }
 0x11d   :  { %v5550_v40 = vpack.c.bf16 %v2466_v38, %v2465_v37  ;;  %v5214_v41 = vpop.f32.mrb[24].mxu0 }
 0x11e   :  { %v1527_v42 = vadd.f32 %v5214_v41, %v6456_v2  ;;  %v1518_v43 = vpop.f32.mrb[25].mxu0 }
 0x11f   :  { %v1519_v44 = vadd.f32 %v6456_v2, %v1518_v43  ;;  %v5215_v45 = vpop.f32.mrb[26].mxu0  ;;  %5551 = vmatprep.subr.bf16.mxu1 %v5550_v40 }
 0x120   :  { %v1530_v47 = vadd.f32 %v5215_v45, %v6456_v2  ;;  %v1521_v17 = vpop.f32.mrb[27].mxu0  ;;  %5553 = vmatpush3.bf16.msra.mxu1 %v6489_v34  ;;  %v2471_v51 = vmax.f32 %v1527_v42, 0.0  ;;  %v5884_v34 = vld [vmem:[%s7563_s1 + $0x228] sm:$0xff]   ;;  %v5892_v45 = vld [vmem:[%s7563_s1 + $0x258] sm:$0xff]  }
 0x121   :  { %v1522_v48 = vadd.f32 %v6456_v2, %v1521_v17  ;;  %5555 = vmatprep.subr.bf16.mxu1 %v5554_v39  ;;  %v2469_v53 = vmax.f32 %v1519_v44, 0.0  ;;  %v5895_v17 = vld [vmem:[%s7563_s1 + $0x260] sm:$0xff]  }
 0x122   :  { %v2472_v52 = vmax.f32 %v1530_v47, 0.0  ;;  %5321 = vmatmul.mubr.msk.bf16.gmra.mrb[132].mxu0 %vm1003_vm0, %v5882_v18 }
 0x123   :  { %v2470_v54 = vmax.f32 %v1522_v48, 0.0  ;;  %5324 = vmatprep.mubr.msk.bf16.mxu0 %vm1003_vm0, %v5883_v46 }
 0x124   :  { %v5562_v55 = vpack.c.bf16 %v2472_v52, %v2471_v51  ;;  %5557 = vmatpush3.bf16.msra.mxu1 %v6487_v33 }
 0x125   :  { %v5558_v56 = vpack.c.bf16 %v2470_v54, %v2469_v53  ;;  %v5218_v57 = vpop.f32.mrb[28].mxu0 }
 0x126   :  { %v1543_v58 = vadd.f32 %v5218_v57, %v6456_v2  ;;  %v1534_v59 = vpop.f32.mrb[29].mxu0 }
 0x127   :  { %v1535_v60 = vadd.f32 %v6456_v2, %v1534_v59  ;;  %v5219_v62 = vpop.f32.mrb[30].mxu0  ;;  %5559 = vmatprep.subr.bf16.mxu1 %v5558_v56 }
 0x128   :  { %v1546_v0 = vadd.f32 %v5219_v62, %v6456_v2  ;;  %v1537_v33 = vpop.f32.mrb[31].mxu0  ;;  %5561 = vmatpush3.bf16.msra.mxu1 %v6505_v50  ;;  %v2475_v5 = vmax.f32 %v1543_v58, 0.0  ;;  %v5886_v50 = vld [vmem:[%s7563_s1 + $0x238] sm:$0xff]   ;;  %v5896_v62 = vld [vmem:[%s7563_s1 + $0x268] sm:$0xff]  }
 0x129   :  { %v1538_v1 = vadd.f32 %v6456_v2, %v1537_v33  ;;  %5563 = vmatprep.subr.bf16.mxu1 %v5562_v55  ;;  %v2473_v7 = vmax.f32 %v1535_v60, 0.0  ;;  %v5899_v33 = vld [vmem:[%s7563_s1 + $0x270] sm:$0xff]  }
 0x12a   :  { %v2476_v6 = vmax.f32 %v1546_v0, 0.0  ;;  %5325 = vmatmul.mubr.msk.bf16.gmra.mrb[136].mxu0 %vm1003_vm0, %v5884_v34 }
 0x12b   :  { %v2474_v8 = vmax.f32 %v1538_v1, 0.0  ;;  %5328 = vmatprep.mubr.msk.bf16.mxu0 %vm1003_vm0, %v5885_v63 }
 0x12c   :  { %v5570_v9 = vpack.c.bf16 %v2476_v6, %v2475_v5  ;;  %5565 = vmatpush3.bf16.msra.mxu1 %v6503_v49 }
 0x12d   :  { %v5566_v10 = vpack.c.bf16 %v2474_v8, %v2473_v7  ;;  %v5222_v11 = vpop.f32.mrb[32].mxu0 }
 0x12e   :  { %v1559_v12 = vadd.f32 %v5222_v11, %v6456_v2  ;;  %v1550_v13 = vpop.f32.mrb[33].mxu0 }
 0x12f   :  { %v1551_v14 = vadd.f32 %v6456_v2, %v1550_v13  ;;  %v5223_v15 = vpop.f32.mrb[34].mxu0  ;;  %5567 = vmatprep.subr.bf16.mxu1 %v5566_v10 }
 0x130   :  { %v1562_v19 = vadd.f32 %v5223_v15, %v6456_v2  ;;  %v1553_v49 = vpop.f32.mrb[35].mxu0  ;;  %5569 = vmatpush3.bf16.msra.mxu1 %v6521_v4  ;;  %v2479_v21 = vmax.f32 %v1559_v12, 0.0  ;;  %v5900_v15 = vld [vmem:[%s7563_s1 + $0x278] sm:$0xff]  }
 0x131   :  { %v1554_v20 = vadd.f32 %v6456_v2, %v1553_v49  ;;  %5571 = vmatprep.subr.bf16.mxu1 %v5570_v9  ;;  %v2477_v23 = vmax.f32 %v1551_v14, 0.0  ;;  %v5901_v49 = vld [vmem:[%s7563_s1 + $0x280] sm:$0xff]  }
 0x132   :  { %v2480_v22 = vmax.f32 %v1562_v19, 0.0  ;;  %5329 = vmatmul.mubr.msk.bf16.gmra.mrb[140].mxu0 %vm1003_vm0, %v5886_v50 }
 0x133   :  { %v2478_v24 = vmax.f32 %v1554_v20, 0.0  ;;  %5332 = vmatprep.mubr.msk.bf16.mxu0 %vm1003_vm0, %v5887_v16 }
 0x134   :  { %v6590_v25 = vpack.c.bf16 %v2480_v22, %v2479_v21  ;;  %5573 = vmatpush3.bf16.msra.mxu1 %v6519_v3 }
 0x135   :  { %v6593_v26 = vpack.c.bf16 %v2478_v24, %v2477_v23  ;;  %v5226_v27 = vpop.f32.mrb[36].mxu0 }
 0x136   :  { %v1575_v4 = vadd.f32 %v5226_v27, %v6456_v2  ;;  %v1566_v28 = vpop.f32.mrb[37].mxu0 }
 0x137   :  { %v1567_v30 = vadd.f32 %v6456_v2, %v1566_v28  ;;  %v5227_v31 = vpop.f32.mrb[38].mxu0  ;;  %2766 = vmatmul.mubr.f32.vlgmr.msra.gmra.mrb[16].mxu1 %v6056_v61 }
 0x138   :  { %v1578_v3 = vadd.f32 %v5227_v31, %v6456_v2  ;;  %v1569_v35 = vpop.f32.mrb[39].mxu0  ;;  %2835 = vmatprep.mubr.f32.mxu1 %v6056_v61  ;;  %v2483_v37 = vmax.f32 %v1575_v4, 0.0 }
 0x139   :  { %v1570_v36 = vadd.f32 %v6456_v2, %v1569_v35  ;;  %v2481_v39 = vmax.f32 %v1567_v30, 0.0 }
 0x13a   :  { %v2484_v38 = vmax.f32 %v1578_v3, 0.0  ;;  %5333 = vmatmul.mubr.msk.bf16.gmra.mrb[144].mxu0 %vm1003_vm0, %v5888_v29  ;;  %v5902_v3 = vld [vmem:[%s7563_s1 + $0x288] sm:$0xff]  }
 0x13b   :  { %v2482_v40 = vmax.f32 %v1570_v36, 0.0  ;;  %5336 = vmatprep.mubr.msk.bf16.mxu0 %vm1003_vm0, %v5891_v32 }
 0x13c   :  { %v6609_v41 = vpack.c.bf16 %v2484_v38, %v2483_v37  ;;  %v5903_v37 = vld [vmem:[%s7563_s1 + $0x290] sm:$0xff]  }
 0x13d   :  { %v6611_v42 = vpack.c.bf16 %v2482_v40, %v2481_v39  ;;  %v5230_v43 = vpop.f32.mrb[40].mxu0 }
 0x13e   :  { %v1591_v18 = vadd.f32 %v5230_v43, %v6456_v2  ;;  %v1582_v44 = vpop.f32.mrb[41].mxu0 }
 0x13f   :  { %v1583_v46 = vadd.f32 %v6456_v2, %v1582_v44  ;;  %v5231_v47 = vpop.f32.mrb[42].mxu0 }
 0x140   :  { %v1594_v48 = vadd.f32 %v5231_v47, %v6456_v2  ;;  %v1585_v51 = vpop.f32.mrb[43].mxu0  ;;  %v2487_v53 = vmax.f32 %v1591_v18, 0.0 }
 0x141   :  { %v1586_v52 = vadd.f32 %v6456_v2, %v1585_v51  ;;  %v2485_v55 = vmax.f32 %v1583_v46, 0.0 }
 0x142   :  { %v2488_v54 = vmax.f32 %v1594_v48, 0.0  ;;  %5337 = vmatmul.mubr.msk.bf16.gmra.mrb[148].mxu0 %vm1003_vm0, %v5892_v45 }
 0x143   :  { %v2486_v56 = vmax.f32 %v1586_v52, 0.0  ;;  %5340 = vmatprep.mubr.msk.bf16.mxu0 %vm1003_vm0, %v5895_v17 }
 0x144   :  { %v6625_v57 = vpack.c.bf16 %v2488_v54, %v2487_v53  ;;  %v5905_v54 = vld [vmem:[%s7563_s1 + $0x2a0] sm:$0xff]  }
 0x145   :  { %v6627_v58 = vpack.c.bf16 %v2486_v56, %v2485_v55  ;;  %v5234_v59 = vpop.f32.mrb[44].mxu0 }
 0x146   :  { %v1607_v34 = vadd.f32 %v5234_v59, %v6456_v2  ;;  %v1598_v60 = vpop.f32.mrb[45].mxu0 }
 0x147   :  { %v1599_v63 = vadd.f32 %v6456_v2, %v1598_v60  ;;  %v5235_v0 = vpop.f32.mrb[46].mxu0 }
 0x148   :  { %v1610_v1 = vadd.f32 %v5235_v0, %v6456_v2  ;;  %v1601_v5 = vpop.f32.mrb[47].mxu0  ;;  %v2491_v7 = vmax.f32 %v1607_v34, 0.0 }
 0x149   :  { %v1602_v6 = vadd.f32 %v6456_v2, %v1601_v5  ;;  %v2489_v9 = vmax.f32 %v1599_v63, 0.0 }
 0x14a   :  { %v2492_v8 = vmax.f32 %v1610_v1, 0.0  ;;  %5341 = vmatmul.mubr.msk.bf16.gmra.mrb[152].mxu0 %vm1003_vm0, %v5896_v62 }
 0x14b   :  { %v2490_v10 = vmax.f32 %v1602_v6, 0.0  ;;  %5344 = vmatprep.mubr.msk.bf16.mxu0 %vm1003_vm0, %v5899_v33 }
 0x14c   :  { %v6641_v11 = vpack.c.bf16 %v2492_v8, %v2491_v7  ;;  %v5907_v8 = vld [vmem:[%s7563_s1 + $0x2b0] sm:$0xff]  }
 0x14d   :  { %v6643_v12 = vpack.c.bf16 %v2490_v10, %v2489_v9  ;;  %v5238_v13 = vpop.f32.mrb[48].mxu0 }
 0x14e   :  { %v1623_v50 = vadd.f32 %v5238_v13, %v6456_v2  ;;  %v1614_v14 = vpop.f32.mrb[49].mxu0 }
 0x14f   :  { %v1615_v16 = vadd.f32 %v6456_v2, %v1614_v14  ;;  %v5239_v19 = vpop.f32.mrb[50].mxu0 }
 0x150   :  { %v1626_v20 = vadd.f32 %v5239_v19, %v6456_v2  ;;  %v1617_v21 = vpop.f32.mrb[51].mxu0  ;;  %v2495_v23 = vmax.f32 %v1623_v50, 0.0 }
 0x151   :  { %v1618_v22 = vadd.f32 %v6456_v2, %v1617_v21  ;;  %v2493_v27 = vmax.f32 %v1615_v16, 0.0 }
 0x152   :  { %v2496_v24 = vmax.f32 %v1626_v20, 0.0  ;;  %5345 = vmatmul.mubr.msk.bf16.gmra.mrb[156].mxu0 %vm1003_vm0, %v5900_v15 }
 0x153   :  { %v2494_v4 = vmax.f32 %v1618_v22, 0.0  ;;  %5348 = vmatprep.mubr.msk.bf16.mxu0 %vm1003_vm0, %v5901_v49 }
 0x154   :  { %v5578_v28 = vpack.c.bf16 %v2496_v24, %v2495_v23  ;;  %v5909_v24 = vld [vmem:[%s7563_s1 + $0x2c0] sm:$0xff]  }
 0x155   :  { %v5574_v29 = vpack.c.bf16 %v2494_v4, %v2493_v27  ;;  %v5242_v30 = vpop.f32.mrb[52].mxu0 }
 0x156   :  { %v1639_v31 = vadd.f32 %v5242_v30, %v6456_v2  ;;  %v1630_v32 = vpop.f32.mrb[53].mxu0 }
 0x157   :  { %v1631_v35 = vadd.f32 %v6456_v2, %v1630_v32  ;;  %v5243_v36 = vpop.f32.mrb[54].mxu0  ;;  %5575 = vmatprep.subr.bf16.mxu1 %v5574_v29 }
 0x158   :  { %v1642_v38 = vadd.f32 %v5243_v36, %v6456_v2  ;;  %v1633_v39 = vpop.f32.mrb[55].mxu0  ;;  %5577 = vmatpush3.bf16.msra.mxu1 %v6593_v26  ;;  %v2499_v43 = vmax.f32 %v1639_v31, 0.0  ;;  %v5904_v26 = vld [vmem:[%s7563_s1 + $0x298] sm:$0xff]  }
 0x159   :  { %v1634_v40 = vadd.f32 %v6456_v2, %v1633_v39  ;;  %5579 = vmatprep.subr.bf16.mxu1 %v5578_v28  ;;  %v2497_v44 = vmax.f32 %v1631_v35, 0.0 }
 0x15a   :  { %v2500_v18 = vmax.f32 %v1642_v38, 0.0  ;;  %5349 = vmatmul.mubr.msk.bf16.gmra.mrb[160].mxu0 %vm1003_vm0, %v5902_v3 }
 0x15b   :  { %v2498_v45 = vmax.f32 %v1634_v40, 0.0  ;;  %5352 = vmatprep.mubr.msk.bf16.mxu0 %vm1003_vm0, %v5903_v37  ;;  %v5910_v37 = vld [vmem:[%s7563_s1 + $0x2c8] sm:$0xff]   ;;  %v5911_v40 = vld [vmem:[%s7563_s1 + $0x2d0] sm:$0xff]  }
 0x15c   :  { %v5586_v46 = vpack.c.bf16 %v2500_v18, %v2499_v43  ;;  %5581 = vmatpush3.bf16.msra.mxu1 %v6590_v25 }
 0x15d   :  { %v5582_v47 = vpack.c.bf16 %v2498_v45, %v2497_v44  ;;  %v5246_v17 = vpop.f32.mrb[56].mxu0 }
 0x15e   :  { %v1655_v48 = vadd.f32 %v5246_v17, %v6456_v2  ;;  %v1646_v51 = vpop.f32.mrb[57].mxu0 }
 0x15f   :  { %v1647_v52 = vadd.f32 %v6456_v2, %v1646_v51  ;;  %v5247_v53 = vpop.f32.mrb[58].mxu0  ;;  %5583 = vmatprep.subr.bf16.mxu1 %v5582_v47 }
 0x160   :  { %v1658_v55 = vadd.f32 %v5247_v53, %v6456_v2  ;;  %v1649_v25 = vpop.f32.mrb[59].mxu0  ;;  %5585 = vmatpush3.bf16.msra.mxu1 %v6611_v42  ;;  %v2503_v59 = vmax.f32 %v1655_v48, 0.0  ;;  %v5906_v42 = vld [vmem:[%s7563_s1 + $0x2a8] sm:$0xff]   ;;  %v5912_v53 = vld [vmem:[%s7563_s1 + $0x2d8] sm:$0xff]  }
 0x161   :  { %v1650_v56 = vadd.f32 %v6456_v2, %v1649_v25  ;;  %5587 = vmatprep.subr.bf16.mxu1 %v5586_v46  ;;  %v2501_v60 = vmax.f32 %v1647_v52, 0.0  ;;  %v5913_v25 = vld [vmem:[%s7563_s1 + $0x2e0] sm:$0xff]  }
 0x162   :  { %v2504_v34 = vmax.f32 %v1658_v55, 0.0  ;;  %5353 = vmatmul.mubr.msk.bf16.gmra.mrb[164].mxu0 %vm1003_vm0, %v5904_v26 }
 0x163   :  { %v2502_v62 = vmax.f32 %v1650_v56, 0.0  ;;  %5356 = vmatprep.mubr.msk.bf16.mxu0 %vm1003_vm0, %v5905_v54 }
 0x164   :  { %v5594_v63 = vpack.c.bf16 %v2504_v34, %v2503_v59  ;;  %5589 = vmatpush3.bf16.msra.mxu1 %v6609_v41 }
 0x165   :  { %v5590_v0 = vpack.c.bf16 %v2502_v62, %v2501_v60  ;;  %v5250_v33 = vpop.f32.mrb[60].mxu0 }
 0x166   :  { %v1671_v1 = vadd.f32 %v5250_v33, %v6456_v2  ;;  %v1662_v5 = vpop.f32.mrb[61].mxu0 }
 0x167   :  { %v1663_v6 = vadd.f32 %v6456_v2, %v1662_v5  ;;  %v5251_v7 = vpop.f32.mrb[62].mxu0  ;;  %5591 = vmatprep.subr.bf16.mxu1 %v5590_v0 }
 0x168   :  { %v1674_v9 = vadd.f32 %v5251_v7, %v6456_v2  ;;  %v1665_v41 = vpop.f32.mrb[63].mxu0  ;;  %5593 = vmatpush3.bf16.msra.mxu1 %v6627_v58  ;;  %v2507_v13 = vmax.f32 %v1671_v1, 0.0  ;;  %v5908_v58 = vld [vmem:[%s7563_s1 + $0x2b8] sm:$0xff]   ;;  %v5914_v7 = vld [vmem:[%s7563_s1 + $0x2e8] sm:$0xff]  }
 0x169   :  { %v1666_v10 = vadd.f32 %v6456_v2, %v1665_v41  ;;  %5595 = vmatprep.subr.bf16.mxu1 %v5594_v63  ;;  %v2505_v14 = vmax.f32 %v1663_v6, 0.0  ;;  %v5915_v41 = vld [vmem:[%s7563_s1 + $0x2f0] sm:$0xff]  }
 0x16a   :  { %v2508_v50 = vmax.f32 %v1674_v9, 0.0  ;;  %5357 = vmatmul.mubr.msk.bf16.gmra.mrb[168].mxu0 %vm1003_vm0, %v5906_v42 }
 0x16b   :  { %v2506_v15 = vmax.f32 %v1666_v10, 0.0  ;;  %5360 = vmatprep.mubr.msk.bf16.mxu0 %vm1003_vm0, %v5907_v8 }
 0x16c   :  { %v5602_v16 = vpack.c.bf16 %v2508_v50, %v2507_v13  ;;  %5597 = vmatpush3.bf16.msra.mxu1 %v6625_v57 }
 0x16d   :  { %v5598_v19 = vpack.c.bf16 %v2506_v15, %v2505_v14  ;;  %v5254_v49 = vpop.f32.mrb[64].mxu0 }
 0x16e   :  { %v1687_v20 = vadd.f32 %v5254_v49, %v6456_v2  ;;  %v1678_v21 = vpop.f32.mrb[65].mxu0 }
 0x16f   :  { %v1679_v22 = vadd.f32 %v6456_v2, %v1678_v21  ;;  %v5255_v23 = vpop.f32.mrb[66].mxu0  ;;  %5599 = vmatprep.subr.bf16.mxu1 %v5598_v19 }
 0x170   :  { %v1690_v27 = vadd.f32 %v5255_v23, %v6456_v2  ;;  %v1681_v57 = vpop.f32.mrb[67].mxu0  ;;  %5601 = vmatpush3.bf16.msra.mxu1 %v6643_v12  ;;  %v2511_v28 = vmax.f32 %v1687_v20, 0.0  ;;  %v5916_v23 = vld [vmem:[%s7563_s1 + $0x2f8] sm:$0xff]  }
 0x171   :  { %v1682_v4 = vadd.f32 %v6456_v2, %v1681_v57  ;;  %5603 = vmatprep.subr.bf16.mxu1 %v5602_v16  ;;  %v2509_v30 = vmax.f32 %v1679_v22, 0.0  ;;  %v5917_v57 = vld [vmem:[%s7563_s1 + $0x300] sm:$0xff]  }
 0x172   :  { %v2512_v29 = vmax.f32 %v1690_v27, 0.0  ;;  %5361 = vmatmul.mubr.msk.bf16.gmra.mrb[172].mxu0 %vm1003_vm0, %v5908_v58 }
 0x173   :  { %v2510_v31 = vmax.f32 %v1682_v4, 0.0  ;;  %5364 = vmatprep.mubr.msk.bf16.mxu0 %vm1003_vm0, %v5909_v24 }
 0x174   :  { %v6712_v32 = vpack.c.bf16 %v2512_v29, %v2511_v28  ;;  %5605 = vmatpush3.bf16.msra.mxu1 %v6641_v11 }
 0x175   :  { %v6715_v3 = vpack.c.bf16 %v2510_v31, %v2509_v30  ;;  %v5258_v35 = vpop.f32.mrb[68].mxu0 }
 0x176   :  { %v1703_v12 = vadd.f32 %v5258_v35, %v6456_v2  ;;  %v1694_v36 = vpop.f32.mrb[69].mxu0 }
 0x177   :  { %v1695_v38 = vadd.f32 %v6456_v2, %v1694_v36  ;;  %v5259_v39 = vpop.f32.mrb[70].mxu0  ;;  %2836 = vmatmul.mubr.f32.vlgmr.msra.gmra.mrb[18].mxu1 %v6056_v61 }
 0x178   :  { %v1706_v11 = vadd.f32 %v5259_v39, %v6456_v2  ;;  %v1697_v43 = vpop.f32.mrb[71].mxu0  ;;  %2905 = vmatprep.mubr.f32.mxu1 %v6056_v61  ;;  %v2515_v44 = vmax.f32 %v1703_v12, 0.0 }
 0x179   :  { %v1698_v18 = vadd.f32 %v6456_v2, %v1697_v43  ;;  %v2513_v46 = vmax.f32 %v1695_v38, 0.0 }
 0x17a   :  { %v2516_v45 = vmax.f32 %v1706_v11, 0.0  ;;  %5365 = vmatmul.mubr.msk.bf16.gmra.mrb[176].mxu0 %vm1003_vm0, %v5910_v37  ;;  %v5918_v11 = vld [vmem:[%s7563_s1 + $0x308] sm:$0xff]  }
 0x17b   :  { %v2514_v47 = vmax.f32 %v1698_v18, 0.0  ;;  %5368 = vmatprep.mubr.msk.bf16.mxu0 %vm1003_vm0, %v5911_v40 }
 0x17c   :  { %v6731_v17 = vpack.c.bf16 %v2516_v45, %v2515_v44  ;;  %v5919_v44 = vld [vmem:[%s7563_s1 + $0x310] sm:$0xff]  }
 0x17d   :  { %v6733_v48 = vpack.c.bf16 %v2514_v47, %v2513_v46  ;;  %v5262_v51 = vpop.f32.mrb[72].mxu0 }
 0x17e   :  { %v1719_v26 = vadd.f32 %v5262_v51, %v6456_v2  ;;  %v1710_v52 = vpop.f32.mrb[73].mxu0 }
 0x17f   :  { %v1711_v54 = vadd.f32 %v6456_v2, %v1710_v52  ;;  %v5263_v55 = vpop.f32.mrb[74].mxu0 }
 0x180   :  { %v1722_v56 = vadd.f32 %v5263_v55, %v6456_v2  ;;  %v1713_v59 = vpop.f32.mrb[75].mxu0  ;;  %v2519_v60 = vmax.f32 %v1719_v26, 0.0 }
 0x181   :  { %v1714_v34 = vadd.f32 %v6456_v2, %v1713_v59  ;;  %v2517_v63 = vmax.f32 %v1711_v54, 0.0 }
 0x182   :  { %v2520_v62 = vmax.f32 %v1722_v56, 0.0  ;;  %5369 = vmatmul.mubr.msk.bf16.gmra.mrb[180].mxu0 %vm1003_vm0, %v5912_v53 }
 0x183   :  { %v2518_v0 = vmax.f32 %v1714_v34, 0.0  ;;  %5372 = vmatprep.mubr.msk.bf16.mxu0 %vm1003_vm0, %v5913_v25 }
 0x184   :  { %v6747_v33 = vpack.c.bf16 %v2520_v62, %v2519_v60  ;;  %v5921_v62 = vld [vmem:[%s7563_s1 + $0x320] sm:$0xff]  }
 0x185   :  { %v6749_v1 = vpack.c.bf16 %v2518_v0, %v2517_v63  ;;  %v5266_v5 = vpop.f32.mrb[76].mxu0 }
 0x186   :  { %v1735_v42 = vadd.f32 %v5266_v5, %v6456_v2  ;;  %v1726_v6 = vpop.f32.mrb[77].mxu0 }
 0x187   :  { %v1727_v8 = vadd.f32 %v6456_v2, %v1726_v6  ;;  %v5267_v9 = vpop.f32.mrb[78].mxu0 }
 0x188   :  { %v1738_v10 = vadd.f32 %v5267_v9, %v6456_v2  ;;  %v1729_v13 = vpop.f32.mrb[79].mxu0  ;;  %v2523_v14 = vmax.f32 %v1735_v42, 0.0 }
 0x189   :  { %v1730_v50 = vadd.f32 %v6456_v2, %v1729_v13  ;;  %v2521_v16 = vmax.f32 %v1727_v8, 0.0 }
 0x18a   :  { %v2524_v15 = vmax.f32 %v1738_v10, 0.0  ;;  %5373 = vmatmul.mubr.msk.bf16.gmra.mrb[184].mxu0 %vm1003_vm0, %v5914_v7 }
 0x18b   :  { %v2522_v19 = vmax.f32 %v1730_v50, 0.0  ;;  %5376 = vmatprep.mubr.msk.bf16.mxu0 %vm1003_vm0, %v5915_v41 }
 0x18c   :  { %v6763_v49 = vpack.c.bf16 %v2524_v15, %v2523_v14  ;;  %v5923_v15 = vld [vmem:[%s7563_s1 + $0x330] sm:$0xff]  }
 0x18d   :  { %v6765_v20 = vpack.c.bf16 %v2522_v19, %v2521_v16  ;;  %v5270_v21 = vpop.f32.mrb[80].mxu0 }
 0x18e   :  { %v1751_v58 = vadd.f32 %v5270_v21, %v6456_v2  ;;  %v1742_v22 = vpop.f32.mrb[81].mxu0 }
 0x18f   :  { %v1743_v24 = vadd.f32 %v6456_v2, %v1742_v22  ;;  %v5271_v27 = vpop.f32.mrb[82].mxu0 }
 0x190   :  { %v1754_v4 = vadd.f32 %v5271_v27, %v6456_v2  ;;  %v1745_v28 = vpop.f32.mrb[83].mxu0  ;;  %v2527_v30 = vmax.f32 %v1751_v58, 0.0 }
 0x191   :  { %v1746_v29 = vadd.f32 %v6456_v2, %v1745_v28  ;;  %v2525_v35 = vmax.f32 %v1743_v24, 0.0 }
 0x192   :  { %v2528_v31 = vmax.f32 %v1754_v4, 0.0  ;;  %5377 = vmatmul.mubr.msk.bf16.gmra.mrb[188].mxu0 %vm1003_vm0, %v5916_v23 }
 0x193   :  { %v2526_v12 = vmax.f32 %v1746_v29, 0.0  ;;  %5380 = vmatprep.mubr.msk.bf16.mxu0 %vm1003_vm0, %v5917_v57 }
 0x194   :  { %v5610_v36 = vpack.c.bf16 %v2528_v31, %v2527_v30  ;;  %v5925_v31 = vld [vmem:[%s7563_s1 + $0x340] sm:$0xff]  }
 0x195   :  { %v5606_v37 = vpack.c.bf16 %v2526_v12, %v2525_v35  ;;  %v5274_v38 = vpop.f32.mrb[84].mxu0 }
 0x196   :  { %v1767_v39 = vadd.f32 %v5274_v38, %v6456_v2  ;;  %v1758_v40 = vpop.f32.mrb[85].mxu0 }
 0x197   :  { %v1759_v43 = vadd.f32 %v6456_v2, %v1758_v40  ;;  %v5275_v18 = vpop.f32.mrb[86].mxu0  ;;  %5607 = vmatprep.subr.bf16.mxu1 %v5606_v37 }
 0x198   :  { %v1770_v45 = vadd.f32 %v5275_v18, %v6456_v2  ;;  %v1761_v46 = vpop.f32.mrb[87].mxu0  ;;  %5609 = vmatpush3.bf16.msra.mxu1 %v6715_v3  ;;  %v2531_v51 = vmax.f32 %v1767_v39, 0.0  ;;  %v5920_v3 = vld [vmem:[%s7563_s1 + $0x318] sm:$0xff]  }
 0x199   :  { %v1762_v47 = vadd.f32 %v6456_v2, %v1761_v46  ;;  %5611 = vmatprep.subr.bf16.mxu1 %v5610_v36  ;;  %v2529_v52 = vmax.f32 %v1759_v43, 0.0 }
 0x19a   :  { %v2532_v26 = vmax.f32 %v1770_v45, 0.0  ;;  %5381 = vmatmul.mubr.msk.bf16.gmra.mrb[192].mxu0 %vm1003_vm0, %v5918_v11 }
 0x19b   :  { %v2530_v53 = vmax.f32 %v1762_v47, 0.0  ;;  %5384 = vmatprep.mubr.msk.bf16.mxu0 %vm1003_vm0, %v5919_v44  ;;  %v5926_v44 = vld [vmem:[%s7563_s1 + $0x348] sm:$0xff]   ;;  %v5927_v47 = vld [vmem:[%s7563_s1 + $0x350] sm:$0xff]  }
 0x19c   :  { %v5618_v54 = vpack.c.bf16 %v2532_v26, %v2531_v51  ;;  %5613 = vmatpush3.bf16.msra.mxu1 %v6712_v32 }
 0x19d   :  { %v5614_v55 = vpack.c.bf16 %v2530_v53, %v2529_v52  ;;  %v5278_v25 = vpop.f32.mrb[88].mxu0 }
 0x19e   :  { %v1783_v56 = vadd.f32 %v5278_v25, %v6456_v2  ;;  %v1774_v59 = vpop.f32.mrb[89].mxu0 }
 0x19f   :  { %v1775_v34 = vadd.f32 %v6456_v2, %v1774_v59  ;;  %v5279_v60 = vpop.f32.mrb[90].mxu0  ;;  %5615 = vmatprep.subr.bf16.mxu1 %v5614_v55 }
 0x1a0   :  { %v1786_v63 = vadd.f32 %v5279_v60, %v6456_v2  ;;  %v1777_v32 = vpop.f32.mrb[91].mxu0  ;;  %5617 = vmatpush3.bf16.msra.mxu1 %v6733_v48  ;;  %v2535_v5 = vmax.f32 %v1783_v56, 0.0  ;;  %v5922_v48 = vld [vmem:[%s7563_s1 + $0x328] sm:$0xff]   ;;  %v5928_v60 = vld [vmem:[%s7563_s1 + $0x358] sm:$0xff]  }
 0x1a1   :  { %v1778_v0 = vadd.f32 %v6456_v2, %v1777_v32  ;;  %5619 = vmatprep.subr.bf16.mxu1 %v5618_v54  ;;  %v2533_v6 = vmax.f32 %v1775_v34, 0.0  ;;  %v5929_v32 = vld [vmem:[%s7563_s1 + $0x360] sm:$0xff]  }
 0x1a2   :  { %v2536_v42 = vmax.f32 %v1786_v63, 0.0  ;;  %5385 = vmatmul.mubr.msk.bf16.gmra.mrb[196].mxu0 %vm1003_vm0, %v5920_v3 }
 0x1a3   :  { %v2534_v7 = vmax.f32 %v1778_v0, 0.0  ;;  %5388 = vmatprep.mubr.msk.bf16.mxu0 %vm1003_vm0, %v5921_v62 }
 0x1a4   :  { %v5626_v8 = vpack.c.bf16 %v2536_v42, %v2535_v5  ;;  %5621 = vmatpush3.bf16.msra.mxu1 %v6731_v17 }
 0x1a5   :  { %v5622_v9 = vpack.c.bf16 %v2534_v7, %v2533_v6  ;;  %v5282_v41 = vpop.f32.mrb[92].mxu0 }
 0x1a6   :  { %v1799_v10 = vadd.f32 %v5282_v41, %v6456_v2  ;;  %v1790_v13 = vpop.f32.mrb[93].mxu0 }
 0x1a7   :  { %v1791_v50 = vadd.f32 %v6456_v2, %v1790_v13  ;;  %v5283_v14 = vpop.f32.mrb[94].mxu0  ;;  %5623 = vmatprep.subr.bf16.mxu1 %v5622_v9 }
 0x1a8   :  { %v1802_v16 = vadd.f32 %v5283_v14, %v6456_v2  ;;  %v1793_v17 = vpop.f32.mrb[95].mxu0  ;;  %5625 = vmatpush3.bf16.msra.mxu1 %v6749_v1  ;;  %v2539_v21 = vmax.f32 %v1799_v10, 0.0  ;;  %v5924_v1 = vld [vmem:[%s7563_s1 + $0x338] sm:$0xff]   ;;  %v5930_v14 = vld [vmem:[%s7563_s1 + $0x368] sm:$0xff]  }
 0x1a9   :  { %v1794_v19 = vadd.f32 %v6456_v2, %v1793_v17  ;;  %5627 = vmatprep.subr.bf16.mxu1 %v5626_v8  ;;  %v2537_v22 = vmax.f32 %v1791_v50, 0.0  ;;  %v5931_v17 = vld [vmem:[%s7563_s1 + $0x370] sm:$0xff]  }
 0x1aa   :  { %v2540_v58 = vmax.f32 %v1802_v16, 0.0  ;;  %5389 = vmatmul.mubr.msk.bf16.gmra.mrb[200].mxu0 %vm1003_vm0, %v5922_v48 }
 0x1ab   :  { %v2538_v23 = vmax.f32 %v1794_v19, 0.0  ;;  %5392 = vmatprep.mubr.msk.bf16.mxu0 %vm1003_vm0, %v5923_v15 }
 0x1ac   :  { %v5634_v24 = vpack.c.bf16 %v2540_v58, %v2539_v21  ;;  %5629 = vmatpush3.bf16.msra.mxu1 %v6747_v33 }
 0x1ad   :  { %v5630_v27 = vpack.c.bf16 %v2538_v23, %v2537_v22  ;;  %v5286_v57 = vpop.f32.mrb[96].mxu0 }
 0x1ae   :  { %v1815_v4 = vadd.f32 %v5286_v57, %v6456_v2  ;;  %v1806_v28 = vpop.f32.mrb[97].mxu0 }
 0x1af   :  { %v1807_v29 = vadd.f32 %v6456_v2, %v1806_v28  ;;  %v5287_v30 = vpop.f32.mrb[98].mxu0  ;;  %5631 = vmatprep.subr.bf16.mxu1 %v5630_v27 }
 0x1b0   :  { %v1818_v35 = vadd.f32 %v5287_v30, %v6456_v2  ;;  %v1809_v33 = vpop.f32.mrb[99].mxu0  ;;  %5633 = vmatpush3.bf16.msra.mxu1 %v6765_v20  ;;  %v2543_v36 = vmax.f32 %v1815_v4, 0.0  ;;  %v5932_v30 = vld [vmem:[%s7563_s1 + $0x378] sm:$0xff]  }
 0x1b1   :  { %v1810_v12 = vadd.f32 %v6456_v2, %v1809_v33  ;;  %5635 = vmatprep.subr.bf16.mxu1 %v5634_v24  ;;  %v2541_v38 = vmax.f32 %v1807_v29, 0.0  ;;  %v5933_v33 = vld [vmem:[%s7563_s1 + $0x380] sm:$0xff]  }
 0x1b2   :  { %v2544_v37 = vmax.f32 %v1818_v35, 0.0  ;;  %5393 = vmatmul.mubr.msk.bf16.gmra.mrb[204].mxu0 %vm1003_vm0, %v5924_v1 }
 0x1b3   :  { %v2542_v39 = vmax.f32 %v1810_v12, 0.0  ;;  %5396 = vmatprep.mubr.msk.bf16.mxu0 %vm1003_vm0, %v5925_v31 }
 0x1b4   :  { %v6834_v40 = vpack.c.bf16 %v2544_v37, %v2543_v36  ;;  %5637 = vmatpush3.bf16.msra.mxu1 %v6763_v49  ;;  %v6851_v49 = vld [vmem:[%s7564_s8] ss:$0 sm:$0xff] }
 0x1b5   :  { %v6837_v11 = vpack.c.bf16 %v2542_v39, %v2541_v38  ;;  %v5290_v43 = vpop.f32.mrb[100].mxu0 }
 0x1b6   :  { %v1831_v20 = vadd.f32 %v5290_v43, %v6456_v2  ;;  %v1822_v18 = vpop.f32.mrb[101].mxu0 }
 0x1b7   :  { %v1823_v45 = vadd.f32 %v6456_v2, %v1822_v18  ;;  %v5291_v46 = vpop.f32.mrb[102].mxu0  ;;  %2906 = vmatmul.mubr.f32.vlgmr.msra.gmra.mrb[20].mxu1 %v6056_v61 }
 0x1b8   :  { %v1834_v51 = vadd.f32 %v6851_v49, %v5291_v46  ;;  %v1825_v26 = vpop.f32.mrb[103].mxu0  ;;  %2975 = vmatprep.mubr.f32.mxu1 %v6056_v61  ;;  %v2547_v2 = vmax.f32 %v1831_v20, 0.0 }
 0x1b9   :  { %v1826_v52 = vadd.f32 %v6851_v49, %v1825_v26  ;;  %v2545_v54 = vmax.f32 %v1823_v45, 0.0 }
 0x1ba   :  { %v2548_v53 = vmax.f32 %v1834_v51, 0.0  ;;  %5397 = vmatmul.mubr.msk.bf16.gmra.mrb[208].mxu0 %vm1003_vm0, %v5926_v44  ;;  %v5934_v51 = vld [vmem:[%s7563_s1 + $0x388] sm:$0xff]  }
 0x1bb   :  { %v2546_v55 = vmax.f32 %v1826_v52, 0.0  ;;  %5400 = vmatprep.mubr.msk.bf16.mxu0 %vm1003_vm0, %v5927_v47 }
 0x1bc   :  { %v6858_v25 = vpack.c.bf16 %v2548_v53, %v2547_v2  ;;  %v5935_v2 = vld [vmem:[%s7563_s1 + $0x390] sm:$0xff]  }
 0x1bd   :  { %v6860_v56 = vpack.c.bf16 %v2546_v55, %v2545_v54  ;;  %v5294_v59 = vpop.f32.mrb[104].mxu0 }
 0x1be   :  { %v1847_v3 = vadd.f32 %v6851_v49, %v5294_v59  ;;  %v1838_v34 = vpop.f32.mrb[105].mxu0 }
 0x1bf   :  { %v1839_v62 = vadd.f32 %v6851_v49, %v1838_v34  ;;  %v5295_v63 = vpop.f32.mrb[106].mxu0 }
 0x1c0   :  { %v1850_v0 = vadd.f32 %v6851_v49, %v5295_v63  ;;  %v1841_v5 = vpop.f32.mrb[107].mxu0  ;;  %v2551_v6 = vmax.f32 %v1847_v3, 0.0 }
 0x1c1   :  { %v1842_v42 = vadd.f32 %v6851_v49, %v1841_v5  ;;  %v2549_v8 = vmax.f32 %v1839_v62, 0.0 }
 0x1c2   :  { %v2552_v7 = vmax.f32 %v1850_v0, 0.0  ;;  %5401 = vmatmul.mubr.msk.bf16.gmra.mrb[212].mxu0 %vm1003_vm0, %v5928_v60 }
 0x1c3   :  { %v2550_v9 = vmax.f32 %v1842_v42, 0.0  ;;  %5404 = vmatprep.mubr.msk.bf16.mxu0 %vm1003_vm0, %v5929_v32 }
 0x1c4   :  { %v6874_v41 = vpack.c.bf16 %v2552_v7, %v2551_v6  ;;  %v5937_v7 = vld [vmem:[%s7563_s1 + $0x3a0] sm:$0xff]  }
 0x1c5   :  { %v6876_v10 = vpack.c.bf16 %v2550_v9, %v2549_v8  ;;  %v5298_v13 = vpop.f32.mrb[108].mxu0 }
 0x1c6   :  { %v1863_v48 = vadd.f32 %v6851_v49, %v5298_v13  ;;  %v1854_v50 = vpop.f32.mrb[109].mxu0 }
 0x1c7   :  { %v1855_v15 = vadd.f32 %v6851_v49, %v1854_v50  ;;  %v5299_v16 = vpop.f32.mrb[110].mxu0 }
 0x1c8   :  { %v1866_v19 = vadd.f32 %v6851_v49, %v5299_v16  ;;  %v1857_v21 = vpop.f32.mrb[111].mxu0  ;;  %v2555_v22 = vmax.f32 %v1863_v48, 0.0 }
 0x1c9   :  { %v1858_v58 = vadd.f32 %v6851_v49, %v1857_v21  ;;  %v2553_v24 = vmax.f32 %v1855_v15, 0.0 }
 0x1ca   :  { %v2556_v23 = vmax.f32 %v1866_v19, 0.0  ;;  %5405 = vmatmul.mubr.msk.bf16.gmra.mrb[216].mxu0 %vm1003_vm0, %v5930_v14 }
 0x1cb   :  { %v2554_v27 = vmax.f32 %v1858_v58, 0.0  ;;  %5408 = vmatprep.mubr.msk.bf16.mxu0 %vm1003_vm0, %v5931_v17 }
 0x1cc   :  { %v6890_v57 = vpack.c.bf16 %v2556_v23, %v2555_v22  ;;  %v5939_v23 = vld [vmem:[%s7563_s1 + $0x3b0] sm:$0xff]  }
 0x1cd   :  { %v6892_v4 = vpack.c.bf16 %v2554_v27, %v2553_v24  ;;  %v5302_v28 = vpop.f32.mrb[112].mxu0 }
 0x1ce   :  { %v1879_v1 = vadd.f32 %v6851_v49, %v5302_v28  ;;  %v1870_v29 = vpop.f32.mrb[113].mxu0 }
 0x1cf   :  { %v1871_v31 = vadd.f32 %v6851_v49, %v1870_v29  ;;  %v5303_v35 = vpop.f32.mrb[114].mxu0 }
 0x1d0   :  { %v1882_v12 = vadd.f32 %v6851_v49, %v5303_v35  ;;  %v1873_v36 = vpop.f32.mrb[115].mxu0  ;;  %v2559_v38 = vmax.f32 %v1879_v1, 0.0 }
 0x1d1   :  { %v1874_v37 = vadd.f32 %v6851_v49, %v1873_v36  ;;  %v2557_v43 = vmax.f32 %v1871_v31, 0.0 }
 0x1d2   :  { %v2560_v39 = vmax.f32 %v1882_v12, 0.0  ;;  %5409 = vmatmul.mubr.msk.bf16.gmra.mrb[220].mxu0 %vm1003_vm0, %v5932_v30 }
 0x1d3   :  { %v2558_v20 = vmax.f32 %v1874_v37, 0.0  ;;  %5412 = vmatprep.mubr.msk.bf16.mxu0 %vm1003_vm0, %v5933_v33 }
 0x1d4   :  { %v5642_v18 = vpack.c.bf16 %v2560_v39, %v2559_v38 }
 0x1d5   :  { %v5638_v44 = vpack.c.bf16 %v2558_v20, %v2557_v43  ;;  %v5306_v45 = vpop.f32.mrb[116].mxu0 }
 0x1d6   :  { %v1895_v46 = vadd.f32 %v6851_v49, %v5306_v45  ;;  %v1886_v47 = vpop.f32.mrb[117].mxu0 }
 0x1d7   :  { %v1887_v26 = vadd.f32 %v6851_v49, %v1886_v47  ;;  %v5307_v52 = vpop.f32.mrb[118].mxu0  ;;  %5639 = vmatprep.subr.bf16.mxu1 %v5638_v44 }
 0x1d8   :  { %v1898_v53 = vadd.f32 %v6851_v49, %v5307_v52  ;;  %v1889_v54 = vpop.f32.mrb[119].mxu0  ;;  %5641 = vmatpush3.bf16.msra.mxu1 %v6837_v11  ;;  %v2563_v59 = vmax.f32 %v1895_v46, 0.0  ;;  %v5936_v11 = vld [vmem:[%s7563_s1 + $0x398] sm:$0xff]  }
 0x1d9   :  { %v1890_v55 = vadd.f32 %v6851_v49, %v1889_v54  ;;  %5643 = vmatprep.subr.bf16.mxu1 %v5642_v18  ;;  %v2561_v34 = vmax.f32 %v1887_v26, 0.0 }
 0x1da   :  { %v2564_v3 = vmax.f32 %v1898_v53, 0.0  ;;  %5413 = vmatmul.mubr.msk.bf16.gmra.mrb[224].mxu0 %vm1003_vm0, %v5934_v51 }
 0x1db   :  { %v2562_v60 = vmax.f32 %v1890_v55, 0.0  ;;  %5416 = vmatprep.mubr.msk.bf16.mxu0 %vm1003_vm0, %v5935_v2 }
 0x1dc   :  { %v5650_v62 = vpack.c.bf16 %v2564_v3, %v2563_v59  ;;  %5645 = vmatpush3.bf16.msra.mxu1 %v6834_v40 }
 0x1dd   :  { %v5646_v63 = vpack.c.bf16 %v2562_v60, %v2561_v34  ;;  %v5310_v32 = vpop.f32.mrb[120].mxu0 }
 0x1de   :  { %v1911_v0 = vadd.f32 %v6851_v49, %v5310_v32  ;;  %v1902_v5 = vpop.f32.mrb[121].mxu0 }
 0x1df   :  { %v1903_v42 = vadd.f32 %v6851_v49, %v1902_v5  ;;  %v5311_v6 = vpop.f32.mrb[122].mxu0  ;;  %5647 = vmatprep.subr.bf16.mxu1 %v5646_v63 }
 0x1e0   :  { %v1914_v8 = vadd.f32 %v6851_v49, %v5311_v6  ;;  %v1905_v40 = vpop.f32.mrb[123].mxu0  ;;  %5649 = vmatpush3.bf16.msra.mxu1 %v6860_v56  ;;  %v2567_v13 = vmax.f32 %v1911_v0, 0.0  ;;  %v5938_v56 = vld [vmem:[%s7563_s1 + $0x3a8] sm:$0xff]  }
 0x1e1   :  { %v1906_v9 = vadd.f32 %v6851_v49, %v1905_v40  ;;  %5651 = vmatprep.subr.bf16.mxu1 %v5650_v62  ;;  %v2565_v50 = vmax.f32 %v1903_v42, 0.0 }
 0x1e2   :  { %v2568_v48 = vmax.f32 %v1914_v8, 0.0  ;;  %5417 = vmatmul.mubr.msk.bf16.gmra.mrb[228].mxu0 %vm1003_vm0, %v5936_v11 }
 0x1e3   :  { %v2566_v14 = vmax.f32 %v1906_v9, 0.0  ;;  %5420 = vmatprep.mubr.msk.bf16.mxu0 %vm1003_vm0, %v5937_v7 }
 0x1e4   :  { %v5658_v15 = vpack.c.bf16 %v2568_v48, %v2567_v13  ;;  %5653 = vmatpush3.bf16.msra.mxu1 %v6858_v25 }
 0x1e5   :  { %v5654_v16 = vpack.c.bf16 %v2566_v14, %v2565_v50  ;;  %v5314_v17 = vpop.f32.mrb[124].mxu0 }
 0x1e6   :  { %v1927_v19 = vadd.f32 %v6851_v49, %v5314_v17  ;;  %v1918_v21 = vpop.f32.mrb[125].mxu0 }
 0x1e7   :  { %v1919_v58 = vadd.f32 %v6851_v49, %v1918_v21  ;;  %v5315_v22 = vpop.f32.mrb[126].mxu0  ;;  %5655 = vmatprep.subr.bf16.mxu1 %v5654_v16 }
 0x1e8   :  { %v1930_v24 = vadd.f32 %v6851_v49, %v5315_v22  ;;  %v1921_v25 = vpop.f32.mrb[127].mxu0  ;;  %5657 = vmatpush3.bf16.msra.mxu1 %v6876_v10  ;;  %v2571_v28 = vmax.f32 %v1927_v19, 0.0  ;;  %v5940_v10 = vld [vmem:[%s7563_s1 + $0x3b8] sm:$0xff]   ;;  %s7568_s1 = sld [smem:[#allocation13_spill]] }
 0x1e9   :  { %v1922_v27 = vadd.f32 %v6851_v49, %v1921_v25  ;;  %5659 = vmatprep.subr.bf16.mxu1 %v5658_v15  ;;  %v2569_v29 = vmax.f32 %v1919_v58, 0.0 }
 0x1ea   :  { %v2572_v1 = vmax.f32 %v1930_v24, 0.0  ;;  %5421 = vmatmul.mubr.msk.bf16.gmra.mrb[232].mxu0 %vm1003_vm0, %v5938_v56 }
 0x1eb   :  { %v2570_v30 = vmax.f32 %v1922_v27, 0.0  ;;  %5424 = vmatprep.mubr.msk.bf16.mxu0 %vm1003_vm0, %v5939_v23 }
 0x1ec   :  { %v5666_v31 = vpack.c.bf16 %v2572_v1, %v2571_v28  ;;  %5661 = vmatpush3.bf16.msra.mxu1 %v6874_v41 }
 0x1ed   :  { %v5662_v35 = vpack.c.bf16 %v2570_v30, %v2569_v29  ;;  %v5318_v33 = vpop.f32.mrb[128].mxu0 }
 0x1ee   :  { %v1943_v12 = vadd.f32 %v6851_v49, %v5318_v33  ;;  %v1934_v36 = vpop.f32.mrb[129].mxu0 }
 0x1ef   :  { %v1935_v37 = vadd.f32 %v6851_v49, %v1934_v36  ;;  %v5319_v38 = vpop.f32.mrb[130].mxu0  ;;  %5663 = vmatprep.subr.bf16.mxu1 %v5662_v35 }
 0x1f0   :  { %v1946_v39 = vadd.f32 %v6851_v49, %v5319_v38  ;;  %v1937_v43 = vpop.f32.mrb[131].mxu0  ;;  %5665 = vmatpush3.bf16.msra.mxu1 %v6892_v4  ;;  %v2575_v20 = vmax.f32 %v1943_v12, 0.0 }
 0x1f1   :  { %v1938_v41 = vadd.f32 %v6851_v49, %v1937_v43  ;;  %5667 = vmatprep.subr.bf16.mxu1 %v5666_v31  ;;  %v2573_v44 = vmax.f32 %v1935_v37, 0.0 }
 0x1f2   :  { %v2576_v18 = vmax.f32 %v1946_v39, 0.0  ;;  %5425 = vmatmul.mubr.msk.bf16.gmra.mrb[236].mxu0 %vm1003_vm0, %v5940_v10 }
 0x1f3   :  { %v2574_v45 = vmax.f32 %v1938_v41, 0.0 }
 0x1f4   :  { %v6957_v46 = vpack.c.bf16 %v2576_v18, %v2575_v20  ;;  %5669 = vmatpush3.bf16.msra.mxu1 %v6890_v57 }
 0x1f5   :  { %v6960_v47 = vpack.c.bf16 %v2574_v45, %v2573_v44  ;;  %v5322_v51 = vpop.f32.mrb[132].mxu0 }
 0x1f6   :  { %v1959_v26 = vadd.f32 %v6851_v49, %v5322_v51  ;;  %v1950_v52 = vpop.f32.mrb[133].mxu0 }
 0x1f7   :  { %v1951_v4 = vadd.f32 %v6851_v49, %v1950_v52  ;;  %v5323_v2 = vpop.f32.mrb[134].mxu0  ;;  %2976 = vmatmul.mubr.f32.vlgmr.msra.gmra.mrb[22].mxu1 %v6056_v61 }
 0x1f8   :  { %v1962_v53 = vadd.f32 %v6851_v49, %v5323_v2  ;;  %v1953_v54 = vpop.f32.mrb[135].mxu0  ;;  %3045 = vmatprep.mubr.f32.mxu1 %v6056_v61  ;;  %v2579_v59 = vmax.f32 %v1959_v26, 0.0 }
 0x1f9   :  { %v1954_v55 = vadd.f32 %v6851_v49, %v1953_v54  ;;  %v2577_v3 = vmax.f32 %v1951_v4, 0.0 }
 0x1fa   :  { %v2580_v57 = vmax.f32 %v1962_v53, 0.0 }
 0x1fb   :  { %v2578_v34 = vmax.f32 %v1954_v55, 0.0 }
 0x1fc   :  { %v6968_v60 = vpack.c.bf16 %v2580_v57, %v2579_v59 }
 0x1fd   :  { %v6970_v62 = vpack.c.bf16 %v2578_v34, %v2577_v3  ;;  %v5326_v63 = vpop.f32.mrb[136].mxu0 }
 0x1fe   :  { %v1975_v32 = vadd.f32 %v6851_v49, %v5326_v63  ;;  %v1966_v0 = vpop.f32.mrb[137].mxu0 }
 0x1ff   :  { %v1967_v5 = vadd.f32 %v6851_v49, %v1966_v0  ;;  %v5327_v11 = vpop.f32.mrb[138].mxu0 }
 0x200   :  { %v1978_v42 = vadd.f32 %v6851_v49, %v5327_v11  ;;  %v1969_v6 = vpop.f32.mrb[139].mxu0  ;;  %v2583_v8 = vmax.f32 %v1975_v32, 0.0 }
 0x201   :  { %v1970_v7 = vadd.f32 %v6851_v49, %v1969_v6  ;;  %v2581_v9 = vmax.f32 %v1967_v5, 0.0 }
 0x202   :  { %v2584_v40 = vmax.f32 %v1978_v42, 0.0 }
 0x203   :  { %v2582_v13 = vmax.f32 %v1970_v7, 0.0 }
 0x204   :  { %v6976_v48 = vpack.c.bf16 %v2584_v40, %v2583_v8 }
 0x205   :  { %v6978_v50 = vpack.c.bf16 %v2582_v13, %v2581_v9  ;;  %v5330_v14 = vpop.f32.mrb[140].mxu0 }
 0x206   :  { %v1991_v15 = vadd.f32 %v6851_v49, %v5330_v14  ;;  %v1982_v16 = vpop.f32.mrb[141].mxu0 }
 0x207   :  { %v1983_v17 = vadd.f32 %v6851_v49, %v1982_v16  ;;  %v5331_v19 = vpop.f32.mrb[142].mxu0 }
 0x208   :  { %v1994_v21 = vadd.f32 %v6851_v49, %v5331_v19  ;;  %v1985_v56 = vpop.f32.mrb[143].mxu0  ;;  %v2587_v22 = vmax.f32 %v1991_v15, 0.0  ;;  %v5430_v19 = vpop.f32.mrb[0].mxu1 }
 0x209   :  { %v1986_v58 = vadd.f32 %v6851_v49, %v1985_v56  ;;  %v2585_v24 = vmax.f32 %v1983_v17, 0.0  ;;  %v2382_v56 = vpop.f32.mrb[1].mxu1 }
 0x20a   :  { %v2588_v23 = vmax.f32 %v1994_v21, 0.0 }
 0x20b   :  { %v2586_v25 = vmax.f32 %v1986_v58, 0.0 }
 0x20c   :  { %v6984_v27 = vpack.c.bf16 %v2588_v23, %v2587_v22  ;;  %v5431_v22 = vpop.f32.mrb[2].mxu1 }
 0x20d   :  { %v6986_v28 = vpack.c.bf16 %v2586_v25, %v2585_v24  ;;  %v5334_v1 = vpop.f32.mrb[144].mxu0  ;;  %v2385_v25 = vpop.f32.mrb[3].mxu1 }
 0x20e   :  { %v2007_v29 = vadd.f32 %v6851_v49, %v5334_v1  ;;  %v1998_v30 = vpop.f32.mrb[145].mxu0 }
 0x20f   :  { %v1999_v31 = vadd.f32 %v6851_v49, %v1998_v30  ;;  %v5335_v35 = vpop.f32.mrb[146].mxu0  ;;  %v2383_v30 = vadd.f32 %v6851_v49, %v2382_v56 }
 0x210   :  { %v2010_v33 = vadd.f32 %v6851_v49, %v5335_v35  ;;  %v2001_v12 = vpop.f32.mrb[147].mxu0  ;;  %v2591_v10 = vmax.f32 %v2007_v29, 0.0  ;;  %v2391_v29 = vadd.f32 %v6851_v49, %v5430_v19 }
 0x211   :  { %v2002_v36 = vadd.f32 %v6851_v49, %v2001_v12  ;;  %v2589_v38 = vmax.f32 %v1999_v31, 0.0 }
 0x212   :  { %v2592_v37 = vmax.f32 %v2010_v33, 0.0  ;;  %v2386_v33 = vadd.f32 %v6851_v49, %v2385_v25 }
 0x213   :  { %v2590_v39 = vmax.f32 %v2002_v36, 0.0 }
 0x214   :  { %v5674_v43 = vpack.c.bf16 %v2592_v37, %v2591_v10  ;;  %v2687_v10 = vmax.f32 %v2391_v29, 0.0  ;;  %v2685_v37 = vmax.f32 %v2383_v30, 0.0 }
 0x215   :  { %v5670_v41 = vpack.c.bf16 %v2590_v39, %v2589_v38  ;;  %v5338_v20 = vpop.f32.mrb[148].mxu0 }
 0x216   :  { %v2023_v18 = vadd.f32 %v6851_v49, %v5338_v20  ;;  %v2014_v44 = vpop.f32.mrb[149].mxu0 }
 0x217   :  { %v2015_v45 = vadd.f32 %v6851_v49, %v2014_v44  ;;  %v5339_v51 = vpop.f32.mrb[150].mxu0  ;;  %5671 = vmatprep.subr.bf16.mxu1 %v5670_v41  ;;  %v5434_v44 = vpop.f32.mrb[4].mxu1 }
 0x218   :  { %v2026_v26 = vadd.f32 %v6851_v49, %v5339_v51  ;;  %v2017_v52 = vpop.f32.mrb[151].mxu0  ;;  %5673 = vmatpush3.bf16.msra.mxu1 %v6960_v47  ;;  %v2595_v2 = vmax.f32 %v2023_v18, 0.0 }
 0x219   :  { %v2018_v4 = vadd.f32 %v6851_v49, %v2017_v52  ;;  %5675 = vmatprep.subr.bf16.mxu1 %v5674_v43  ;;  %v2593_v54 = vmax.f32 %v2015_v45, 0.0 }
 0x21a   :  { %v2596_v53 = vmax.f32 %v2026_v26, 0.0  ;;  %v2398_v26 = vpop.f32.mrb[5].mxu1 }
 0x21b   :  { %v2594_v55 = vmax.f32 %v2018_v4, 0.0 }
 0x21c   :  { %v5682_v59 = vpack.c.bf16 %v2596_v53, %v2595_v2  ;;  %5677 = vmatpush3.bf16.msra.mxu1 %v6957_v46  ;;  %v5435_v2 = vpop.f32.mrb[6].mxu1 }
 0x21d   :  { %v5678_v57 = vpack.c.bf16 %v2594_v55, %v2593_v54  ;;  %v5342_v3 = vpop.f32.mrb[152].mxu0  ;;  %v2401_v55 = vpop.f32.mrb[7].mxu1 }
 0x21e   :  { %v2039_v34 = vadd.f32 %v6851_v49, %v5342_v3  ;;  %v2030_v63 = vpop.f32.mrb[153].mxu0  ;;  %v2410_v3 = vadd.f32 %v6851_v49, %v5435_v2 }
 0x21f   :  { %v2031_v32 = vadd.f32 %v6851_v49, %v2030_v63  ;;  %v5343_v0 = vpop.f32.mrb[154].mxu0  ;;  %5679 = vmatprep.subr.bf16.mxu1 %v5678_v57  ;;  %v2399_v57 = vadd.f32 %v6851_v49, %v2398_v26 }
 0x220   :  { %v2042_v47 = vadd.f32 %v6851_v49, %v5343_v0  ;;  %v2033_v5 = vpop.f32.mrb[155].mxu0  ;;  %5681 = vmatpush3.bf16.msra.mxu1 %v6970_v62  ;;  %v2599_v42 = vmax.f32 %v2039_v34, 0.0 }
 0x221   :  { %v2034_v11 = vadd.f32 %v6851_v49, %v2033_v5  ;;  %5683 = vmatprep.subr.bf16.mxu1 %v5682_v59  ;;  %v2597_v46 = vmax.f32 %v2031_v32, 0.0  ;;  %v2402_v32 = vadd.f32 %v6851_v49, %v2401_v55 }
 0x222   :  { %v2600_v6 = vmax.f32 %v2042_v47, 0.0 }
 0x223   :  { %v2598_v7 = vmax.f32 %v2034_v11, 0.0  ;;  %v2689_v11 = vmax.f32 %v2399_v57, 0.0 }
 0x224   :  { %v5690_v8 = vpack.c.bf16 %v2600_v6, %v2599_v42  ;;  %5685 = vmatpush3.bf16.msra.mxu1 %v6968_v60  ;;  %v2692_v42 = vmax.f32 %v2410_v3, 0.0 }
 0x225   :  { %v5686_v40 = vpack.c.bf16 %v2598_v7, %v2597_v46  ;;  %v5346_v9 = vpop.f32.mrb[156].mxu0  ;;  %v2690_v46 = vmax.f32 %v2402_v32, 0.0 }
 0x226   :  { %v2055_v13 = vadd.f32 %v6851_v49, %v5346_v9  ;;  %v2046_v14 = vpop.f32.mrb[157].mxu0  ;;  %v5438_v9 = vpop.f32.mrb[8].mxu1 }
 0x227   :  { %v2047_v15 = vadd.f32 %v6851_v49, %v2046_v14  ;;  %v5347_v16 = vpop.f32.mrb[158].mxu0  ;;  %5687 = vmatprep.subr.bf16.mxu1 %v5686_v40  ;;  %v7040_v14 = vpack.c.bf16 %v2690_v46, %v2689_v11 }
 0x228   :  { %v2058_v62 = vadd.f32 %v6851_v49, %v5347_v16  ;;  %v2049_v17 = vpop.f32.mrb[159].mxu0  ;;  %5689 = vmatpush3.bf16.msra.mxu1 %v6978_v50  ;;  %v2603_v60 = vmax.f32 %v2055_v13, 0.0  ;;  %v2394_v50 = vadd.f32 %v6851_v49, %v5431_v22 }
 0x229   :  { %v2050_v21 = vadd.f32 %v6851_v49, %v2049_v17  ;;  %5691 = vmatprep.subr.bf16.mxu1 %v5690_v8  ;;  %v2601_v23 = vmax.f32 %v2047_v15, 0.0  ;;  %v2414_v15 = vpop.f32.mrb[9].mxu1 }
 0x22a   :  { %v2604_v58 = vmax.f32 %v2058_v62, 0.0  ;;  %v2688_v38 = vmax.f32 %v2394_v50, 0.0  ;;  %v5439_v17 = vpop.f32.mrb[10].mxu1  ;;  %v2415_v22 = vadd.f32 %v6851_v49, %v2414_v15 }
 0x22b   :  { %v2602_v24 = vmax.f32 %v2050_v21, 0.0  ;;  %v2417_v56 = vpop.f32.mrb[11].mxu1 }
 0x22c   :  { %v5698_v1 = vpack.c.bf16 %v2604_v58, %v2603_v60  ;;  %5693 = vmatpush3.bf16.msra.mxu1 %v6976_v48  ;;  %v2686_v48 = vmax.f32 %v2386_v33, 0.0  ;;  %v7018_v18 = vpack.c.bf16 %v2688_v38, %v2687_v10  ;;  %v2423_v58 = vadd.f32 %v6851_v49, %v5438_v9 }
 0x22d   :  { %v5694_v31 = vpack.c.bf16 %v2602_v24, %v2601_v23  ;;  %v5350_v35 = vpop.f32.mrb[160].mxu0  ;;  %v2426_v23 = vadd.f32 %v6851_v49, %v5439_v17 }
 0x22e   :  { %v2071_v12 = vadd.f32 %v6851_v49, %v5350_v35  ;;  %v2062_v36 = vpop.f32.mrb[161].mxu0  ;;  %v7021_v51 = vpack.c.bf16 %v2686_v48, %v2685_v37  ;;  %v2695_v50 = vmax.f32 %v2423_v58, 0.0 }
 0x22f   :  { %v2063_v39 = vadd.f32 %v6851_v49, %v2062_v36  ;;  %v5351_v43 = vpop.f32.mrb[162].mxu0  ;;  %5695 = vmatprep.subr.bf16.mxu1 %v5694_v31  ;;  %v2693_v31 = vmax.f32 %v2415_v22, 0.0  ;;  %v2696_v35 = vmax.f32 %v2426_v23, 0.0 }
 0x230   :  { %v2074_v41 = vadd.f32 %v6851_v49, %v5351_v43  ;;  %v2065_v20 = vpop.f32.mrb[163].mxu0  ;;  %5697 = vmatpush3.bf16.msra.mxu1 %v6986_v28  ;;  %v2607_v52 = vmax.f32 %v2071_v12, 0.0  ;;  %v2407_v28 = vadd.f32 %v6851_v49, %v5434_v44 }
 0x231   :  { %v2066_v45 = vadd.f32 %v6851_v49, %v2065_v20  ;;  %5699 = vmatprep.subr.bf16.mxu1 %v5698_v1  ;;  %v2605_v53 = vmax.f32 %v2063_v39, 0.0  ;;  %v2418_v1 = vadd.f32 %v6851_v49, %v2417_v56  ;;  %v7053_v38 = vpack.c.bf16 %v2696_v35, %v2695_v50  ;;  %v5442_v39 = vpop.f32.mrb[12].mxu1 }
 0x232   :  { %v2608_v4 = vmax.f32 %v2074_v41, 0.0  ;;  %v2691_v5 = vmax.f32 %v2407_v28, 0.0  ;;  %v2430_v41 = vpop.f32.mrb[13].mxu1 }
 0x233   :  { %v2606_v54 = vmax.f32 %v2066_v45, 0.0  ;;  %v2694_v36 = vmax.f32 %v2418_v1, 0.0  ;;  %v5443_v45 = vpop.f32.mrb[14].mxu1 }
 0x234   :  { %v7023_v59 = vpack.c.bf16 %v2608_v4, %v2607_v52  ;;  %5701 = vmatpush3.bf16.msra.mxu1 %v6984_v27  ;;  %v7037_v40 = vpack.c.bf16 %v2692_v42, %v2691_v5  ;;  %v2433_v4 = vpop.f32.mrb[15].mxu1  ;;  %v2442_v55 = vadd.f32 %v6851_v49, %v5443_v45 }
 0x235   :  { %v7029_v34 = vpack.c.bf16 %v2606_v54, %v2605_v53  ;;  %v5354_v63 = vpop.f32.mrb[164].mxu0  ;;  %v7056_v48 = vpack.c.bf16 %v2694_v36, %v2693_v31  ;;  %v2439_v53 = vadd.f32 %v6851_v49, %v5442_v39  ;;  %v2431_v54 = vadd.f32 %v6851_v49, %v2430_v41  ;;  %v4872_v28 = vpop.f32.mrb[16].mxu1 }
 0x236   :  { %v2087_v0 = vadd.f32 %v6851_v49, %v5354_v63  ;;  %v2078_v47 = vpop.f32.mrb[165].mxu0  ;;  %v2434_v63 = vadd.f32 %v6851_v49, %v2433_v4  ;;  %v4873_v32 = vpop.f32.mrb[17].mxu1  ;;  %v2700_v42 = vmax.f32 %v2442_v55, 0.0 }
 0x237   :  { %v2079_v6 = vadd.f32 %v6851_v49, %v2078_v47  ;;  %v5355_v27 = vpop.f32.mrb[166].mxu0  ;;  %3046 = vmatmul.mubr.f32.vlgmr.msra.gmra.mrb[24].mxu1 %v6056_v61  ;;  %v2699_v5 = vmax.f32 %v2439_v53, 0.0  ;;  %v2697_v11 = vmax.f32 %v2431_v54, 0.0 }
 0x238   :  { %v2090_v7 = vadd.f32 %v6851_v49, %v5355_v27  ;;  %v2081_v8 = vpop.f32.mrb[167].mxu0  ;;  %3115 = vmatprep.mubr.f32.mxu1 %v6056_v61  ;;  %v2611_v16 = vmax.f32 %v2087_v0, 0.0  ;;  %v2698_v46 = vmax.f32 %v2434_v63, 0.0 }
 0x239   :  { %v2082_v13 = vadd.f32 %v6851_v49, %v2081_v8  ;;  %v2609_v19 = vmax.f32 %v2079_v6, 0.0  ;;  %v7069_v9 = vpack.c.bf16 %v2700_v42, %v2699_v5 }
 0x23a   :  { %v2612_v62 = vmax.f32 %v2090_v7, 0.0 }
 0x23b   :  { %v2610_v21 = vmax.f32 %v2082_v13, 0.0  ;;  %v4874_v13 = vadd.f32 %v4873_v32, %v4872_v28 }
 0x23c   :  { %v7042_v60 = vpack.c.bf16 %v2612_v62, %v2611_v16  ;;  %v7072_v16 = vpack.c.bf16 %v2698_v46, %v2697_v11 }
 0x23d   :  { %v7047_v24 = vpack.c.bf16 %v2610_v21, %v2609_v19  ;;  %v5358_v25 = vpop.f32.mrb[168].mxu0 }
 0x23e   :  { %v2103_v29 = vadd.f32 %v6851_v49, %v5358_v25  ;;  %v2094_v30 = vpop.f32.mrb[169].mxu0 }
 0x23f   :  { %v2095_v33 = vadd.f32 %v6851_v49, %v2094_v30  ;;  %v5359_v12 = vpop.f32.mrb[170].mxu0 }
 0x240   :  { %v2106_v10 = vadd.f32 %v6851_v49, %v5359_v12  ;;  %v2097_v37 = vpop.f32.mrb[171].mxu0  ;;  %v2615_v20 = vmax.f32 %v2103_v29, 0.0 }
 0x241   :  { %v2098_v43 = vadd.f32 %v6851_v49, %v2097_v37  ;;  %v2613_v26 = vmax.f32 %v2095_v33, 0.0 }
 0x242   :  { %v2616_v44 = vmax.f32 %v2106_v10, 0.0 }
 0x243   :  { %v2614_v52 = vmax.f32 %v2098_v43, 0.0 }
 0x244   :  { %v7058_v2 = vpack.c.bf16 %v2616_v44, %v2615_v20 }
 0x245   :  { %v7063_v57 = vpack.c.bf16 %v2614_v52, %v2613_v26  ;;  %v5362_v3 = vpop.f32.mrb[172].mxu0 }
 0x246   :  { %v2119_v0 = vadd.f32 %v6851_v49, %v5362_v3  ;;  %v2110_v47 = vpop.f32.mrb[173].mxu0 }
 0x247   :  { %v2111_v6 = vadd.f32 %v6851_v49, %v2110_v47  ;;  %v5363_v27 = vpop.f32.mrb[174].mxu0 }
 0x248   :  { %v2122_v7 = vadd.f32 %v6851_v49, %v5363_v27  ;;  %v2113_v8 = vpop.f32.mrb[175].mxu0  ;;  %v2619_v62 = vmax.f32 %v2119_v0, 0.0 }
 0x249   :  { %v2114_v15 = vadd.f32 %v6851_v49, %v2113_v8  ;;  %v2617_v21 = vmax.f32 %v2111_v6, 0.0 }
 0x24a   :  { %v2620_v17 = vmax.f32 %v2122_v7, 0.0  ;;  %v4907_v19 = vpop.f32.mrb[18].mxu1 }
 0x24b   :  { %v2618_v56 = vmax.f32 %v2114_v15, 0.0  ;;  %v4908_v58 = vpop.f32.mrb[19].mxu1 }
 0x24c   :  { %v7074_v22 = vpack.c.bf16 %v2620_v17, %v2619_v62  ;;  %v4909_v23 = vadd.f32 %v4908_v58, %v4907_v19 }
 0x24d   :  { %v7076_v25 = vpack.c.bf16 %v2618_v56, %v2617_v21  ;;  %v5366_v1 = vpop.f32.mrb[176].mxu0 }
 0x24e   :  { %v2135_v29 = vadd.f32 %v6851_v49, %v5366_v1  ;;  %v2126_v30 = vpop.f32.mrb[177].mxu0  ;;  %v3263_v50 = vrot.slane %v4909_v23, 7 }
 0x24f   :  { %v2127_v31 = vadd.f32 %v6851_v49, %v2126_v30  ;;  %v5367_v35 = vpop.f32.mrb[178].mxu0 }
 0x250   :  { %v2138_v33 = vadd.f32 %v6851_v49, %v5367_v35  ;;  %v2129_v12 = vpop.f32.mrb[179].mxu0  ;;  %v7081_v36 = vsel %vm3283_vm1, %v4874_v13, %v3263_v50  ;;  %v2623_v37 = vmax.f32 %v2135_v29, 0.0 }
 0x251   :  { %v2130_v10 = vadd.f32 %v6851_v49, %v2129_v12  ;;  %v2621_v43 = vmax.f32 %v2127_v31, 0.0 }
 0x252   :  { %v2624_v39 = vmax.f32 %v2138_v33, 0.0 }
 0x253   :  { %v2622_v41 = vmax.f32 %v2130_v10, 0.0 }
 0x254   :  { %v5706_v20 = vpack.c.bf16 %v2624_v39, %v2623_v37 }
 0x255   :  { %v5702_v44 = vpack.c.bf16 %v2622_v41, %v2621_v43  ;;  %v5370_v45 = vpop.f32.mrb[180].mxu0 }
 0x256   :  { %v2151_v26 = vadd.f32 %v6851_v49, %v5370_v45  ;;  %v2142_v52 = vpop.f32.mrb[181].mxu0 }
 0x257   :  { %v2143_v4 = vadd.f32 %v6851_v49, %v2142_v52  ;;  %v5371_v53 = vpop.f32.mrb[182].mxu0  ;;  %5703 = vmatprep.subr.bf16.mxu1 %v5702_v44 }
 0x258   :  { %v2154_v54 = vadd.f32 %v6851_v49, %v5371_v53  ;;  %v2145_v55 = vpop.f32.mrb[183].mxu0  ;;  %5705 = vmatpush3.bf16.msra.mxu1 %v7029_v34  ;;  %v2627_v3 = vmax.f32 %v2151_v26, 0.0 }
 0x259   :  { %v2146_v28 = vadd.f32 %v6851_v49, %v2145_v55  ;;  %5707 = vmatprep.subr.bf16.mxu1 %v5706_v20  ;;  %v2625_v32 = vmax.f32 %v2143_v4, 0.0 }
 0x25a   :  { %v2628_v63 = vmax.f32 %v2154_v54, 0.0 }
 0x25b   :  { %v2626_v0 = vmax.f32 %v2146_v28, 0.0 }
 0x25c   :  { %v5714_v47 = vpack.c.bf16 %v2628_v63, %v2627_v3  ;;  %5709 = vmatpush3.bf16.msra.mxu1 %v7023_v59 }
 0x25d   :  { %v5710_v5 = vpack.c.bf16 %v2626_v0, %v2625_v32  ;;  %v5374_v11 = vpop.f32.mrb[184].mxu0 }
 0x25e   :  { %v2167_v42 = vadd.f32 %v6851_v49, %v5374_v11  ;;  %v2158_v6 = vpop.f32.mrb[185].mxu0 }
 0x25f   :  { %v2159_v27 = vadd.f32 %v6851_v49, %v2158_v6  ;;  %v5375_v46 = vpop.f32.mrb[186].mxu0  ;;  %5711 = vmatprep.subr.bf16.mxu1 %v5710_v5 }
 0x260   :  { %v2170_v34 = vadd.f32 %v6851_v49, %v5375_v46  ;;  %v2161_v7 = vpop.f32.mrb[187].mxu0  ;;  %5713 = vmatpush3.bf16.msra.mxu1 %v7047_v24  ;;  %v2631_v13 = vmax.f32 %v2167_v42, 0.0 }
 0x261   :  { %v2162_v8 = vadd.f32 %v6851_v49, %v2161_v7  ;;  %5715 = vmatprep.subr.bf16.mxu1 %v5714_v47  ;;  %v2629_v59 = vmax.f32 %v2159_v27, 0.0 }
 0x262   :  { %v2632_v15 = vmax.f32 %v2170_v34, 0.0 }
 0x263   :  { %v2630_v62 = vmax.f32 %v2162_v8, 0.0 }
 0x264   :  { %v5722_v17 = vpack.c.bf16 %v2632_v15, %v2631_v13  ;;  %5717 = vmatpush3.bf16.msra.mxu1 %v7042_v60 }
 0x265   :  { %v5718_v19 = vpack.c.bf16 %v2630_v62, %v2629_v59  ;;  %v5378_v21 = vpop.f32.mrb[188].mxu0 }
 0x266   :  { %v2183_v56 = vadd.f32 %v6851_v49, %v5378_v21  ;;  %v2174_v58 = vpop.f32.mrb[189].mxu0 }
 0x267   :  { %v2175_v23 = vadd.f32 %v6851_v49, %v2174_v58  ;;  %v5379_v1 = vpop.f32.mrb[190].mxu0  ;;  %5719 = vmatprep.subr.bf16.mxu1 %v5718_v19 }
 0x268   :  { %v2186_v24 = vadd.f32 %v6851_v49, %v5379_v1  ;;  %v2177_v29 = vpop.f32.mrb[191].mxu0  ;;  %5721 = vmatpush3.bf16.msra.mxu1 %v7063_v57  ;;  %v2635_v50 = vmax.f32 %v2183_v56, 0.0 }
 0x269   :  { %v2178_v30 = vadd.f32 %v6851_v49, %v2177_v29  ;;  %5723 = vmatprep.subr.bf16.mxu1 %v5722_v17  ;;  %v2633_v60 = vmax.f32 %v2175_v23, 0.0 }
 0x26a   :  { %v2636_v31 = vmax.f32 %v2186_v24, 0.0 }
 0x26b   :  { %v2634_v35 = vmax.f32 %v2178_v30, 0.0 }
 0x26c   :  { %v5730_v33 = vpack.c.bf16 %v2636_v31, %v2635_v50  ;;  %5725 = vmatpush3.bf16.msra.mxu1 %v7058_v2  ;;  %v7135_v50 = vld [vmem:[%s7564_s8] ss:$0 sm:$0xff] }
 0x26d   :  { %v5726_v12 = vpack.c.bf16 %v2634_v35, %v2633_v60  ;;  %v5382_v10 = vpop.f32.mrb[192].mxu0 }
 0x26e   :  { %v2199_v37 = vadd.f32 %v6851_v49, %v5382_v10  ;;  %v2190_v39 = vpop.f32.mrb[193].mxu0 }
 0x26f   :  { %v2191_v43 = vadd.f32 %v6851_v49, %v2190_v39  ;;  %v5383_v41 = vpop.f32.mrb[194].mxu0  ;;  %5727 = vmatprep.subr.bf16.mxu1 %v5726_v12 }
 0x270   :  { %v2202_v57 = vadd.f32 %v6851_v49, %v5383_v41  ;;  %v2193_v20 = vpop.f32.mrb[195].mxu0  ;;  %5729 = vmatpush3.bf16.msra.mxu1 %v7076_v25  ;;  %v2639_v45 = vmax.f32 %v2199_v37, 0.0 }
 0x271   :  { %v2194_v44 = vadd.f32 %v6851_v49, %v2193_v20  ;;  %5731 = vmatprep.subr.bf16.mxu1 %v5730_v33  ;;  %v2637_v2 = vmax.f32 %v2191_v43, 0.0 }
 0x272   :  { %v2640_v26 = vmax.f32 %v2202_v57, 0.0 }
 0x273   :  { %v2638_v52 = vmax.f32 %v2194_v44, 0.0 }
 0x274   :  { %v7107_v4 = vpack.c.bf16 %v2640_v26, %v2639_v45  ;;  %5733 = vmatpush3.bf16.msra.mxu1 %v7074_v22 }
 0x275   :  { %v7110_v53 = vpack.c.bf16 %v2638_v52, %v2637_v2  ;;  %v5386_v54 = vpop.f32.mrb[196].mxu0 }
 0x276   :  { %v2215_v55 = vadd.f32 %v6851_v49, %v5386_v54  ;;  %v2206_v28 = vpop.f32.mrb[197].mxu0 }
 0x277   :  { %v2207_v3 = vadd.f32 %v6851_v49, %v2206_v28  ;;  %v5387_v25 = vpop.f32.mrb[198].mxu0  ;;  %3116 = vmatmul.mubr.f32.vlgmr.msra.gmra.mrb[26].mxu1 %v6056_v61 }
 0x278   :  { %v2218_v63 = vadd.f32 %v6851_v49, %v5387_v25  ;;  %v2209_v32 = vpop.f32.mrb[199].mxu0  ;;  %3185 = vmatprep.mubr.f32.mxu1 %v6056_v61  ;;  %v2643_v47 = vmax.f32 %v2215_v55, 0.0 }
 0x279   :  { %v2210_v0 = vadd.f32 %v6851_v49, %v2209_v32  ;;  %v2641_v5 = vmax.f32 %v2207_v3, 0.0 }
 0x27a   :  { %v2644_v22 = vmax.f32 %v2218_v63, 0.0 }
 0x27b   :  { %v2642_v11 = vmax.f32 %v2210_v0, 0.0 }
 0x27c   :  { %v7118_v42 = vpack.c.bf16 %v2644_v22, %v2643_v47 }
 0x27d   :  { %v7120_v6 = vpack.c.bf16 %v2642_v11, %v2641_v5  ;;  %v5390_v27 = vpop.f32.mrb[200].mxu0 }
 0x27e   :  { %v2231_v46 = vadd.f32 %v6851_v49, %v5390_v27  ;;  %v2222_v34 = vpop.f32.mrb[201].mxu0 }
 0x27f   :  { %v2223_v7 = vadd.f32 %v6851_v49, %v2222_v34  ;;  %v5391_v8 = vpop.f32.mrb[202].mxu0 }
 0x280   :  { %v2234_v13 = vadd.f32 %v6851_v49, %v5391_v8  ;;  %v2225_v15 = vpop.f32.mrb[203].mxu0  ;;  %v2647_v62 = vmax.f32 %v2231_v46, 0.0 }
 0x281   :  { %v2226_v59 = vadd.f32 %v6851_v49, %v2225_v15  ;;  %v2645_v19 = vmax.f32 %v2223_v7, 0.0 }
 0x282   :  { %v2648_v17 = vmax.f32 %v2234_v13, 0.0 }
 0x283   :  { %v2646_v21 = vmax.f32 %v2226_v59, 0.0 }
 0x284   :  { %v7126_v56 = vpack.c.bf16 %v2648_v17, %v2647_v62 }
 0x285   :  { %v7128_v58 = vpack.c.bf16 %v2646_v21, %v2645_v19  ;;  %v5394_v23 = vpop.f32.mrb[204].mxu0 }
 0x286   :  { %v2247_v1 = vadd.f32 %v6851_v49, %v5394_v23  ;;  %v2238_v24 = vpop.f32.mrb[205].mxu0 }
 0x287   :  { %v2239_v29 = vadd.f32 %v6851_v49, %v2238_v24  ;;  %v5395_v30 = vpop.f32.mrb[206].mxu0 }
 0x288   :  { %v2250_v31 = vadd.f32 %v7135_v50, %v5395_v30  ;;  %v2241_v60 = vpop.f32.mrb[207].mxu0  ;;  %v2651_v33 = vmax.f32 %v2247_v1, 0.0 }
 0x289   :  { %v2242_v35 = vadd.f32 %v7135_v50, %v2241_v60  ;;  %v2649_v37 = vmax.f32 %v2239_v29, 0.0 }
 0x28a   :  { %v2652_v12 = vmax.f32 %v2250_v31, 0.0  ;;  %v4942_v10 = vpop.f32.mrb[20].mxu1 }
 0x28b   :  { %v2650_v39 = vmax.f32 %v2242_v35, 0.0  ;;  %v4943_v43 = vpop.f32.mrb[21].mxu1 }
 0x28c   :  { %v7139_v41 = vpack.c.bf16 %v2652_v12, %v2651_v33  ;;  %v4944_v49 = vadd.f32 %v4943_v43, %v4942_v10 }
 0x28d   :  { %v7141_v57 = vpack.c.bf16 %v2650_v39, %v2649_v37  ;;  %v5398_v20 = vpop.f32.mrb[208].mxu0 }
 0x28e   :  { %v2263_v44 = vadd.f32 %v7135_v50, %v5398_v20  ;;  %v2254_v45 = vpop.f32.mrb[209].mxu0  ;;  %v3266_v26 = vrot.slane %v4944_v49, 6 }
 0x28f   :  { %v2255_v2 = vadd.f32 %v7135_v50, %v2254_v45  ;;  %v5399_v52 = vpop.f32.mrb[210].mxu0 }
 0x290   :  { %v2266_v54 = vadd.f32 %v7135_v50, %v5399_v52  ;;  %v2257_v55 = vpop.f32.mrb[211].mxu0  ;;  %v7147_v28 = vsel %vm3285_vm2, %v7081_v36, %v3266_v26  ;;  %v2655_v25 = vmax.f32 %v2263_v44, 0.0 }
 0x291   :  { %v2258_v3 = vadd.f32 %v7135_v50, %v2257_v55  ;;  %v2653_v32 = vmax.f32 %v2255_v2, 0.0 }
 0x292   :  { %v2656_v63 = vmax.f32 %v2266_v54, 0.0 }
 0x293   :  { %v2654_v0 = vmax.f32 %v2258_v3, 0.0 }
 0x294   :  { %v5738_v47 = vpack.c.bf16 %v2656_v63, %v2655_v25 }
 0x295   :  { %v5734_v22 = vpack.c.bf16 %v2654_v0, %v2653_v32  ;;  %v5402_v5 = vpop.f32.mrb[212].mxu0 }
 0x296   :  { %v2279_v11 = vadd.f32 %v7135_v50, %v5402_v5  ;;  %v2270_v27 = vpop.f32.mrb[213].mxu0 }
 0x297   :  { %v2271_v46 = vadd.f32 %v7135_v50, %v2270_v27  ;;  %v5403_v34 = vpop.f32.mrb[214].mxu0  ;;  %5735 = vmatprep.subr.bf16.mxu1 %v5734_v22 }
 0x298   :  { %v2282_v7 = vadd.f32 %v7135_v50, %v5403_v34  ;;  %v2273_v36 = vpop.f32.mrb[215].mxu0  ;;  %5737 = vmatpush3.bf16.msra.mxu1 %v7110_v53  ;;  %v2659_v13 = vmax.f32 %v2279_v11, 0.0 }
 0x299   :  { %v2274_v8 = vadd.f32 %v7135_v50, %v2273_v36  ;;  %5739 = vmatprep.subr.bf16.mxu1 %v5738_v47  ;;  %v2657_v59 = vmax.f32 %v2271_v46, 0.0 }
 0x29a   :  { %v2660_v15 = vmax.f32 %v2282_v7, 0.0 }
 0x29b   :  { %v2658_v62 = vmax.f32 %v2274_v8, 0.0 }
 0x29c   :  { %v5746_v17 = vpack.c.bf16 %v2660_v15, %v2659_v13  ;;  %5741 = vmatpush3.bf16.msra.mxu1 %v7107_v4 }
 0x29d   :  { %v5742_v19 = vpack.c.bf16 %v2658_v62, %v2657_v59  ;;  %v5406_v21 = vpop.f32.mrb[216].mxu0 }
 0x29e   :  { %v2295_v23 = vadd.f32 %v7135_v50, %v5406_v21  ;;  %v2286_v1 = vpop.f32.mrb[217].mxu0 }
 0x29f   :  { %v2287_v24 = vadd.f32 %v7135_v50, %v2286_v1  ;;  %v5407_v29 = vpop.f32.mrb[218].mxu0  ;;  %5743 = vmatprep.subr.bf16.mxu1 %v5742_v19 }
 0x2a0   :  { %v2298_v53 = vadd.f32 %v7135_v50, %v5407_v29  ;;  %v2289_v30 = vpop.f32.mrb[219].mxu0  ;;  %5745 = vmatpush3.bf16.msra.mxu1 %v7120_v6  ;;  %v2663_v60 = vmax.f32 %v2295_v23, 0.0 }
 0x2a1   :  { %v2290_v31 = vadd.f32 %v7135_v50, %v2289_v30  ;;  %5747 = vmatprep.subr.bf16.mxu1 %v5746_v17  ;;  %v2661_v4 = vmax.f32 %v2287_v24, 0.0 }
 0x2a2   :  { %v2664_v35 = vmax.f32 %v2298_v53, 0.0 }
 0x2a3   :  { %v2662_v33 = vmax.f32 %v2290_v31, 0.0 }
 0x2a4   :  { %v5754_v12 = vpack.c.bf16 %v2664_v35, %v2663_v60  ;;  %5749 = vmatpush3.bf16.msra.mxu1 %v7118_v42 }
 0x2a5   :  { %v5750_v10 = vpack.c.bf16 %v2662_v33, %v2661_v4  ;;  %v5410_v37 = vpop.f32.mrb[220].mxu0 }
 0x2a6   :  { %v2311_v39 = vadd.f32 %v7135_v50, %v5410_v37  ;;  %v2302_v43 = vpop.f32.mrb[221].mxu0 }
 0x2a7   :  { %v2303_v49 = vadd.f32 %v7135_v50, %v2302_v43  ;;  %v5411_v20 = vpop.f32.mrb[222].mxu0  ;;  %5751 = vmatprep.subr.bf16.mxu1 %v5750_v10 }
 0x2a8   :  { %v2314_v6 = vadd.f32 %v7135_v50, %v5411_v20  ;;  %v2305_v44 = vpop.f32.mrb[223].mxu0  ;;  %5753 = vmatpush3.bf16.msra.mxu1 %v7128_v58  ;;  %v2667_v26 = vmax.f32 %v2311_v39, 0.0 }
 0x2a9   :  { %v2306_v45 = vadd.f32 %v7135_v50, %v2305_v44  ;;  %5755 = vmatprep.subr.bf16.mxu1 %v5754_v12  ;;  %v2665_v42 = vmax.f32 %v2303_v49, 0.0 }
 0x2aa   :  { %v2668_v2 = vmax.f32 %v2314_v6, 0.0 }
 0x2ab   :  { %v2666_v52 = vmax.f32 %v2306_v45, 0.0 }
 0x2ac   :  { %v5762_v54 = vpack.c.bf16 %v2668_v2, %v2667_v26  ;;  %5757 = vmatpush3.bf16.msra.mxu1 %v7126_v56 }
 0x2ad   :  { %v5758_v55 = vpack.c.bf16 %v2666_v52, %v2665_v42  ;;  %v5414_v3 = vpop.f32.mrb[224].mxu0 }
 0x2ae   :  { %v2327_v25 = vadd.f32 %v7135_v50, %v5414_v3  ;;  %v2318_v63 = vpop.f32.mrb[225].mxu0 }
 0x2af   :  { %v2319_v32 = vadd.f32 %v7135_v50, %v2318_v63  ;;  %v5415_v0 = vpop.f32.mrb[226].mxu0  ;;  %5759 = vmatprep.subr.bf16.mxu1 %v5758_v55 }
 0x2b0   :  { %v2671_v58 = vmax.f32 %v2327_v25, 0.0  ;;  %v2330_v47 = vadd.f32 %v7135_v50, %v5415_v0  ;;  %v2321_v22 = vpop.f32.mrb[227].mxu0  ;;  %5761 = vmatpush3.bf16.msra.mxu1 %v7141_v57 }
 0x2b1   :  { %v2322_v5 = vadd.f32 %v7135_v50, %v2321_v22  ;;  %5763 = vmatprep.subr.bf16.mxu1 %v5762_v54  ;;  %v2669_v56 = vmax.f32 %v2319_v32, 0.0  ;;  %v5947_v22 = vld [vmem:[%s7565_s5 + $0x20] ss:$8 sps:$4 sm:$0xff]  }
 0x2b2   :  { %v2672_v11 = vmax.f32 %v2330_v47, 0.0  ;;  %v5941_v47 = vld [vmem:[%s7565_s5] ss:$8 sps:$4 sm:$0xff]  }
 0x2b3   :  { %v2670_v27 = vmax.f32 %v2322_v5, 0.0  ;;  %v5952_v5 = vld [vmem:[%s7565_s5 + $0x34] ss:$8 sps:$4 sm:$0xff]  }
 0x2b4   :  { %v5772_v46 = vpack.c.bf16 %v2672_v11, %v2671_v58  ;;  %5765 = vmatpush3.bf16.msra.mxu1 %v7139_v41  ;;  %v5950_v11 = vld [vmem:[%s7565_s5 + $0x30] ss:$8 sps:$4 sm:$0xff]  }
 0x2b5   :  { %v5768_v34 = vpack.c.bf16 %v2670_v27, %v2669_v56  ;;  %v5418_v7 = vpop.f32.mrb[228].mxu0  ;;  %5767 = vmatprep.subr.bf16.mxu1 %v7021_v51  ;;  %v5955_v56 = vld [vmem:[%s7565_s5 + $0x44] ss:$8 sps:$4 sm:$0xff]   ;;  %v5953_v27 = vld [vmem:[%s7565_s5 + $0x40] ss:$8 sps:$4 sm:$0xff]  }
 0x2b6   :  { %v2343_v36 = vadd.f32 %v7135_v50, %v5418_v7  ;;  %v2334_v8 = vpop.f32.mrb[229].mxu0  ;;  %v5961_v7 = vld [vmem:[%s7565_s5 + $0x64] ss:$8 sps:$4 sm:$0xff]  }
 0x2b7   :  { %v2335_v13 = vadd.f32 %v7135_v50, %v2334_v8  ;;  %v5419_v15 = vpop.f32.mrb[230].mxu0  ;;  %3186 = vmatmul.mubr.f32.vlgmr.msra.gmra.mrb[28].mxu1 %v6056_v61  ;;  %v5964_v8 = vld [vmem:[%s7565_s5 + $0x74] ss:$8 sps:$4 sm:$0xff]  }
 0x2b8   :  { %v2675_v57 = vmax.f32 %v2343_v36, 0.0  ;;  %v2346_v59 = vadd.f32 %v7135_v50, %v5419_v15  ;;  %v2337_v62 = vpop.f32.mrb[231].mxu0  ;;  %5769 = vmatpush3.bf16.msra.mxu1 %v5768_v34  ;;  %3255 = vmatprep.mubr.f32.mxu1 %v6056_v61  ;;  %v5956_v34 = vld [vmem:[%s7565_s5 + $0x50] ss:$8 sps:$4 sm:$0xff]   ;;  %v5959_v36 = vld [vmem:[%s7565_s5 + $0x60] ss:$8 sps:$4 sm:$0xff]  }
 0x2b9   :  { %v2338_v41 = vadd.f32 %v7135_v50, %v2337_v62  ;;  %5771 = vmatprep.subr.bf16.mxu1 %v7018_v18  ;;  %v2673_v17 = vmax.f32 %v2335_v13, 0.0  ;;  %v5962_v13 = vld [vmem:[%s7565_s5 + $0x70] ss:$8 sps:$4 sm:$0xff]   ;;  %v6057_v15 = vmov 0  }
 0x2ba   :  { %v2676_v51 = vmax.f32 %v2346_v59, 0.0 }
 0x2bb   :  { %v2674_v19 = vmax.f32 %v2338_v41, 0.0 }
 0x2bc   :  { %v5780_v21 = vpack.c.bf16 %v2676_v51, %v2675_v57  ;;  %5773 = vmatpush3.bf16.msra.mxu1 %v5772_v46  ;;  %v5958_v46 = vld [vmem:[%s7565_s5 + $0x54] ss:$8 sps:$4 sm:$0xff]   ;;  %v5965_v57 = vld [vmem:[%s7566_s30 + $0x40] sm:$0xff]  }
 0x2bd   :  { %v5776_v23 = vpack.c.bf16 %v2674_v19, %v2673_v17  ;;  %v5422_v1 = vpop.f32.mrb[232].mxu0  ;;  %5775 = vmatprep.subr.bf16.mxu1 %v7040_v14 }
 0x2be   :  { %v2359_v24 = vadd.f32 %v7135_v50, %v5422_v1  ;;  %v2350_v29 = vpop.f32.mrb[233].mxu0 }
 0x2bf   :  { %v2351_v53 = vadd.f32 %v7135_v50, %v2350_v29  ;;  %v5423_v30 = vpop.f32.mrb[234].mxu0 }
 0x2c0   :  { %v2679_v31 = vmax.f32 %v2359_v24, 0.0  ;;  %v2362_v60 = vadd.f32 %v7135_v50, %v5423_v30  ;;  %v2353_v35 = vpop.f32.mrb[235].mxu0  ;;  %5777 = vmatpush3.bf16.msra.mxu1 %v5776_v23 }
 0x2c1   :  { %v2354_v18 = vadd.f32 %v7135_v50, %v2353_v35  ;;  %5779 = vmatprep.subr.bf16.mxu1 %v7037_v40  ;;  %v2677_v33 = vmax.f32 %v2351_v53, 0.0 }
 0x2c2   :  { %v2680_v4 = vmax.f32 %v2362_v60, 0.0 }
 0x2c3   :  { %v2678_v12 = vmax.f32 %v2354_v18, 0.0  ;;  %v5966_v18 = vld [vmem:[%s7566_s30] sm:$0xff]  }
 0x2c4   :  { %v5788_v10 = vpack.c.bf16 %v2680_v4, %v2679_v31  ;;  %5781 = vmatpush3.bf16.msra.mxu1 %v5780_v21 }
 0x2c5   :  { %v5784_v14 = vpack.c.bf16 %v2678_v12, %v2677_v33  ;;  %v5426_v37 = vpop.f32.mrb[236].mxu0  ;;  %5783 = vmatprep.subr.bf16.mxu1 %v7056_v48  ;;  %v5967_v33 = vld [vmem:[%s7566_s30 + $0x48] sm:$0xff]  }
 0x2c6   :  { %v2375_v39 = vadd.f32 %v7135_v50, %v5426_v37  ;;  %v2366_v43 = vpop.f32.mrb[237].mxu0  ;;  %v5968_v12 = vld [vmem:[%s7566_s30 + $0x8] sm:$0xff]   ;;  %v5971_v37 = vld [vmem:[%s7566_s30 + $0x58] sm:$0xff]  }
 0x2c7   :  { %v2367_v49 = vadd.f32 %v7135_v50, %v2366_v43  ;;  %v5427_v20 = vpop.f32.mrb[238].mxu0  ;;  %v5973_v43 = vld [vmem:[%s7566_s30 + $0x60] sm:$0xff]  }
 0x2c8   :  { %v2683_v6 = vmax.f32 %v2375_v39, 0.0  ;;  %v2378_v44 = vadd.f32 %v7135_v50, %v5427_v20  ;;  %v2369_v45 = vpop.f32.mrb[239].mxu0  ;;  %5785 = vmatpush3.bf16.msra.mxu1 %v5784_v14  ;;  %v5970_v14 = vld [vmem:[%s7566_s30 + $0x10] sm:$0xff]   ;;  %v5972_v39 = vld [vmem:[%s7566_s30 + $0x18] sm:$0xff]   ;;  %v5975_v20 = vld [vmem:[%s7566_s30 + $0x68] sm:$0xff]  }
 0x2c9   :  { %v2370_v40 = vadd.f32 %v7135_v50, %v2369_v45  ;;  %5787 = vmatprep.subr.bf16.mxu1 %v7053_v38  ;;  %v2681_v42 = vmax.f32 %v2367_v49, 0.0  ;;  %v5974_v49 = vld [vmem:[%s7566_s30 + $0x20] sm:$0xff]   ;;  %v5978_v45 = vld [vmem:[%s7566_s30 + $0x30] sm:$0xff]  }
 0x2ca   :  { %v2684_v26 = vmax.f32 %v2378_v44, 0.0  ;;  %v4977_v2 = vpop.f32.mrb[22].mxu1  ;;  %v5977_v44 = vld [vmem:[%s7566_s30 + $0x70] sm:$0xff]  }
 0x2cb   :  { %v2682_v52 = vmax.f32 %v2370_v40, 0.0  ;;  %v4978_v48 = vpop.f32.mrb[23].mxu1  ;;  %v5979_v40 = vld [vmem:[%s7566_s30 + $0x78] sm:$0xff]  }
 0x2cc   :  { %v5796_v54 = vpack.c.bf16 %v2684_v26, %v2683_v6  ;;  %v4979_v55 = vadd.f32 %v4978_v48, %v4977_v2  ;;  %5789 = vmatpush3.bf16.msra.mxu1 %v5788_v10  ;;  %v5969_v10 = vld [vmem:[%s7566_s30 + $0x50] sm:$0xff]   ;;  %v5976_v6 = vld [vmem:[%s7566_s30 + $0x28] sm:$0xff]   ;;  %v5980_v26 = vld [vmem:[%s7566_s30 + $0x38] sm:$0xff]   ;;  %v6058_v2 = vmov 0.0  }
 0x2cd   :  { %v5792_v3 = vpack.c.bf16 %v2682_v52, %v2681_v42  ;;  %5791 = vmatprep.subr.bf16.mxu1 %v7072_v16  ;;  %v5943_v16 = vld [vmem:[%s7565_s5 + $0x4] ss:$8 sps:$4 sm:$0xff]   ;;  %v3323_v42 = vlaneseq }
 0x2ce   :  { %v3269_v25 = vrot.slane %v4979_v55, 5 }
 0x2cf   :  { %v3324_v52 = vshrl.u32 %v3323_v42, 7 }
 0x2d0   :  { %v3288_v63 = vsel %vm3287_vm3, %v7147_v28, %v3269_v25  ;;  %5793 = vmatpush3.bf16.msra.mxu1 %v5792_v3  ;;  %v5949_v28 = vld [vmem:[%s7565_s5 + $0x24] ss:$8 sps:$4 sm:$0xff]  }
 0x2d1   :  { %5795 = vmatprep.subr.bf16.mxu1 %v7069_v9  ;;  %v5946_v9 = vld [vmem:[%s7565_s5 + $0x14] ss:$8 sps:$4 sm:$0xff]   ;;  %v3325_v48 = vsub.s32 0, %v3324_v52  ;;  %v3329_v55 = vsub.s32 1, %v3324_v52  ;;  %v5996_v52 = vld [vmem:[%s7535_s16] sm:$0xff]  }
 0x2d4   :  { %5797 = vmatpush3.bf16.msra.mxu1 %v5796_v54  ;;  %v3321_v54 = vld [vmem:[%s7567_s27] sm:$0x3] }
 0x2d5   :  { %3413 = vmatprep.subr.bf16.mxu1 %v5943_v16  ;;  %v3326_v3 = vrot.slane %v3321_v54, %v3325_v48  ;;  %v3330_v25 = vrot.slane %v3321_v54, %v3329_v55  ;;  %v5981_v16 = vld [vmem:[%s7568_s1] sm:$0xff]   ;;  %v5997_v48 = vld [vmem:[%s7535_s16 + $0x8] sm:$0xff]   ;;  %v5998_v54 = vld [vmem:[%s7535_s16 + $0x10] sm:$0xff]  }
 0x2d6   :  { %v5999_v55 = vld [vmem:[%s7535_s16 + $0x18] sm:$0xff]   ;;  %s6060_s16 = smov 96  }
 0x2d7   :  { %3256 = vmatmul.mubr.f32.vlgmr.msra.gmra.mrb[30].mxu1 %v6056_v61  ;;  %v5944_v61 = vld [vmem:[%s7565_s5 + $0x10] ss:$8 sps:$4 sm:$0xff]  }
 0x2d8   :  { %3414 = vmatpush1.bf16.msra.mxu1 %v5941_v47  ;;  %3445 = vmatprep.mubr.bf16.mxu1 %v6057_v15 }
 0x2d9   :  { %3415 = vmatprep.subr.bf16.mxu1 %v5946_v9 }
 0x2dc   :  { %3416 = vmatpush1.bf16.msra.mxu1 %v5944_v61  ;;  %v5982_v61 = vld [vmem:[%s7568_s1 + $0x8] sm:$0xff]  }
 0x2dd   :  { %3417 = vmatprep.subr.bf16.mxu1 %v5949_v28  ;;  %v5983_v28 = vld [vmem:[%s7568_s1 + $0x10] sm:$0xff]  }
 0x2e0   :  { %3418 = vmatpush1.bf16.msra.mxu1 %v5947_v22  ;;  %v5984_v22 = vld [vmem:[%s7568_s1 + $0x18] sm:$0xff]  }
 0x2e1   :  { %3419 = vmatprep.subr.bf16.mxu1 %v5952_v5  ;;  %v5985_v5 = vld [vmem:[%s7568_s1 + $0x20] sm:$0xff]  }
 0x2e4   :  { %3420 = vmatpush1.bf16.msra.mxu1 %v5950_v11  ;;  %v5986_v11 = vld [vmem:[%s7568_s1 + $0x28] sm:$0xff]  }
 0x2e5   :  { %3421 = vmatprep.subr.bf16.mxu1 %v5955_v56  ;;  %v5987_v56 = vld [vmem:[%s7568_s1 + $0x30] sm:$0xff]  }
 0x2e8   :  { %3422 = vmatpush1.bf16.msra.mxu1 %v5953_v27  ;;  %v5988_v27 = vld [vmem:[%s7568_s1 + $0x38] sm:$0xff]  }
 0x2e9   :  { %3423 = vmatprep.subr.bf16.mxu1 %v5958_v46 }
 0x2ec   :  { %3424 = vmatpush1.bf16.msra.mxu1 %v5956_v34  ;;  %v4644_v34 = vld [vmem:[%s7569_s9] ss:$0 sm:$0xff]  ;;  %s6061_s9 = smov 64  }
 0x2ed   :  { %3425 = vmatprep.subr.bf16.mxu1 %v5961_v7 }
 0x2f0   :  { %3426 = vmatpush1.bf16.msra.mxu1 %v5959_v36 }
 0x2f1   :  { %3427 = vmatprep.subr.bf16.mxu1 %v5964_v8 }
 0x2f4   :  { %3428 = vmatpush1.bf16.msra.mxu1 %v5962_v13 }
 0x2f5   :  { %5120 = vmatprep.subr.bf16.mxu1 %v5965_v57 }
 0x30a   :  { %v5012_v38 = vpop.f32.mrb[24].mxu1 }
 0x30b   :  { %v5013_v50 = vpop.f32.mrb[25].mxu1 }
 0x30c   :  { %v5014_v32 = vadd.f32 %v5013_v50, %v5012_v38 }
 0x30e   :  { %v3272_v0 = vrot.slane %v5014_v32, 4 }
 0x310   :  { %v3290_v58 = vsel %vm3289_vm4, %v3288_v63, %v3272_v0 }
 0x34a   :  { %v5047_v59 = vpop.f32.mrb[26].mxu1 }
 0x34b   :  { %v5048_v62 = vpop.f32.mrb[27].mxu1 }
 0x34c   :  { %v5049_v41 = vadd.f32 %v5048_v62, %v5047_v59  ;;  %v5989_v59 = vld [vmem:[%s7570_s29] sm:$0xff]  }
 0x34e   :  { %v3275_v51 = vrot.slane %v5049_v41, 3  ;;  %v5990_v41 = vld [vmem:[%s7570_s29 + $0x8] sm:$0xff]  }
 0x350   :  { %v3292_v17 = vsel %vm3291_vm5, %v3290_v58, %v3275_v51  ;;  %v5991_v51 = vld [vmem:[%s7570_s29 + $0x10] sm:$0xff]  }
 0x38a   :  { %v5082_v19 = vpop.f32.mrb[28].mxu1 }
 0x38b   :  { %v5083_v21 = vpop.f32.mrb[29].mxu1 }
 0x38c   :  { %v5084_v23 = vadd.f32 %v5083_v21, %v5082_v19  ;;  %v4661_v19 = vld [vmem:[%s7571_s4] ss:$0 sm:$0xff] }
 0x38e   :  { %v3278_v1 = vrot.slane %v5084_v23, 2 }
 0x390   :  { %v3294_v24 = vsel %vm3293_vm6, %v3292_v17, %v3278_v1  ;;  %v5992_v17 = vld [vmem:[%s7570_s29 + $0x18] sm:$0xff]  }
 0x3aa   :  { %v5117_v29 = vpop.f32.mrb[30].mxu1 }
 0x3ab   :  { %v5118_v53 = vpop.f32.mrb[31].mxu1 }
 0x3ac   :  { %v5119_v30 = vadd.f32 %v5118_v53, %v5117_v29 }
 0x3ae   :  { %v3281_v31 = vrot.slane %v5119_v30, 1  ;;  %v5993_v30 = vld [vmem:[%s7530_s11] sm:$0xff]  }
 0x3b0   :  { %v3296_v60 = vsel %vm3295_vm7, %v3294_v24, %v3281_v31 }
 0x3b1   :  { %v3303_v35 = vmul.f32 0.00390625, %v3296_v60  ;;  %v5994_v60 = vld [vmem:[%s7530_s11 + $0x8] sm:$0xff]  }
 0x3b3   :  { %v3304_v4 = vpack.c.bf16 %v3303_v35, %v3303_v35  ;;  %v4670_v35 = vld [vmem:[%s7529_s10] ss:$0 sm:$0xff] }
 0x3b5   :  { %3446 = vmatmul.mubr.bf16.vlgmr.msra.gmra.mrb[32].mxu1 %v3304_v4 }
 0x3b6   :  { %5121 = vmatpush3.bf16.msra.mxu1 %v5966_v18 }
 0x3b7   :  { %5122 = vmatprep.subr.bf16.mxu1 %v5967_v33 }
 0x3ba   :  { %5123 = vmatpush3.bf16.msra.mxu1 %v5968_v12 }
 0x3bb   :  { %5124 = vmatprep.subr.bf16.mxu1 %v5969_v10 }
 0x3be   :  { %5125 = vmatpush3.bf16.msra.mxu1 %v5970_v14 }
 0x3bf   :  { %5126 = vmatprep.subr.bf16.mxu1 %v5971_v37  ;;  %v5995_v37 = vld [vmem:[%s7532_s13] sm:$0xff]  }
 0x3c2   :  { %5127 = vmatpush3.bf16.msra.mxu1 %v5972_v39 }
 0x3c3   :  { %5128 = vmatprep.subr.bf16.mxu1 %v5973_v43  ;;  %v4676_v43 = vld [vmem:[%s7531_s12] ss:$0 sm:$0xff] }
 0x3c6   :  { %5129 = vmatpush3.bf16.msra.mxu1 %v5974_v49 }
 0x3c7   :  { %5130 = vmatprep.subr.bf16.mxu1 %v5975_v20 }
 0x3ca   :  { %5131 = vmatpush3.bf16.msra.mxu1 %v5976_v6 }
 0x3cb   :  { %5132 = vmatprep.subr.bf16.mxu1 %v5977_v44 }
 0x3ce   :  { %5133 = vmatpush3.bf16.msra.mxu1 %v5978_v45 }
 0x3cf   :  { %5134 = vmatprep.subr.bf16.mxu1 %v5979_v40 }
 0x3d2   :  { %5135 = vmatpush3.bf16.msra.mxu1 %v5980_v26 }
 0x3d3   :  { %5444 = vmatprep.subr.bf16.mxu1 %v6058_v2 }
 0x488   :  { %v3447_v63 = vpop.f32.mrb[32].mxu1 }
 0x489   :  { %v3448_v38 = vadd.f32 %v3447_v63, %v3326_v3  ;;  %v3449_v50 = vpop.f32.mrb[33].mxu1  ;;  %v4680_v3 = vld [vmem:[%s7533_s14] ss:$0 sm:$0xff] }
 0x48a   :  { %v3450_v32 = vadd.f32 %v3449_v50, %v3330_v25  ;;  %v3451_v0 = vpop.f32.mrb[34].mxu1 }
 0x48b   :  { %v3452_v58 = vpop.f32.mrb[35].mxu1  ;;  %v3454_v9 = vpack.c.bf16 %v3448_v38, %v3448_v38 }
 0x48c   :  { %v3455_v47 = vpack.c.bf16 %v3450_v32, %v3450_v32 }
 0x48e   :  { %3623 = vmatprep.mubr.bf16.mxu1 %v3455_v47 }
 0x48f   :  { %3624 = vmatmul.mubr.bf16.vlgmr.msra.gmra.mrb[36].mxu1 %v3454_v9 }
 0x490   :  { %5445 = vmatpush3.bf16.msra.mxu1 %v5981_v16  ;;  %5460 = vmatprep.mubr.msk.bf16.mxu1 %vm6059_vm8, %v6058_v2  ;;  %v4684_v16 = vld [vmem:[%s7534_s15] ss:$0 sm:$0xff] }
 0x491   :  { %5446 = vmatprep.subr.bf16.mxu1 %v6058_v2 }
 0x494   :  { %5447 = vmatpush3.bf16.msra.mxu1 %v5982_v61 }
 0x495   :  { %5448 = vmatprep.subr.bf16.mxu1 %v6058_v2 }
 0x498   :  { %5449 = vmatpush3.bf16.msra.mxu1 %v5983_v28  ;;  %v6000_v28 = vld [vmem:[%s7537_s18] sm:$0xff]  }
 0x499   :  { %5450 = vmatprep.subr.bf16.mxu1 %v6058_v2 }
 0x49c   :  { %5451 = vmatpush3.bf16.msra.mxu1 %v5984_v22 }
 0x49d   :  { %5452 = vmatprep.subr.bf16.mxu1 %v6058_v2 }
 0x4a0   :  { %5453 = vmatpush3.bf16.msra.mxu1 %v5985_v5 }
 0x4a1   :  { %5454 = vmatprep.subr.bf16.mxu1 %v6058_v2 }
 0x4a4   :  { %5455 = vmatpush3.bf16.msra.mxu1 %v5986_v11  ;;  %v6001_v11 = vld [vmem:[%s7537_s18 + $0x8] sm:$0xff]  }
 0x4a5   :  { %5456 = vmatprep.subr.bf16.mxu1 %v6058_v2 }
 0x4a8   :  { %5457 = vmatpush3.bf16.msra.mxu1 %v5987_v56  ;;  %v6002_v56 = vld [vmem:[%s7537_s18 + $0x10] sm:$0xff]  }
 0x4a9   :  { %5458 = vmatprep.subr.bf16.mxu1 %v6058_v2 }
 0x4ac   :  { %5459 = vmatpush3.bf16.msra.mxu1 %v5988_v27  ;;  %v6003_v27 = vld [vmem:[%s7537_s18 + $0x18] sm:$0xff]  }
 0x4ad   :  { %5464 = vmatprep.subr.bf16.mxu1 %v6058_v2 }
 0x562   :  { %v5136_v46 = vpop.f32.mrb[36].mxu1 }
 0x563   :  { %v5137_v7 = vpop.f32.mrb[37].mxu1 }
 0x564   :  { %v5138_v36 = vadd.f32 %v5137_v7, %v5136_v46  ;;  %v5139_v8 = vpop.f32.mrb[38].mxu1  ;;  %v6004_v46 = vld [vmem:[%s7537_s18 + $0x20] sm:$0xff]   ;;  %v6006_v7 = vld [vmem:[%s7537_s18 + $0x30] sm:$0xff]  }
 0x565   :  { %v5140_v13 = vpop.f32.mrb[39].mxu1  ;;  %v4685_v8 = vld [vmem:[%s7536_s17] ss:$0 sm:$0xff] }
 0x566   :  { %v3626_v15 = vadd.f32 %v5138_v36, %v4644_v34  ;;  %v6005_v34 = vld [vmem:[%s7537_s18 + $0x28] sm:$0xff]   ;;  %v6007_v36 = vld [vmem:[%s7537_s18 + $0x38] sm:$0xff]  }
 0x568   :  { %v3631_v57 = vmax.f32 %v3626_v15, 0.0 }
 0x56a   :  { %v3632_v62 = vpack.c.bf16 %v3631_v57, %v3631_v57 }
 0x56c   :  { %5461 = vmatmul.mubr.bf16.vlgmr.msra.gmra.mrb[40].mxu1 %v3632_v62 }
 0x56d   :  { %5465 = vmatpush3.bf16.msra.mxu1 %v5989_v59  ;;  %5472 = vmatprep.mubr.msk.bf16.mxu1 %vm6059_vm8, %v6058_v2 }
 0x56e   :  { %5466 = vmatprep.subr.bf16.mxu1 %v6058_v2 }
 0x571   :  { %5467 = vmatpush3.bf16.msra.mxu1 %v5990_v41 }
 0x572   :  { %5468 = vmatprep.subr.bf16.mxu1 %v6058_v2 }
 0x575   :  { %5469 = vmatpush3.bf16.msra.mxu1 %v5991_v51 }
 0x576   :  { %5470 = vmatprep.subr.bf16.mxu1 %v6058_v2 }
 0x579   :  { %5471 = vmatpush3.bf16.msra.mxu1 %v5992_v17  ;;  %v6008_v17 = vld [vmem:[%s7539_s20] sm:$0xff]  }
 0x57a   :  { %5476 = vmatprep.subr.bf16.mxu1 %v6058_v2 }
 0x63f   :  { %v3738_v21 = vpop.f32.mrb[40].mxu1 }
 0x640   :  { %v3739_v23 = vadd.f32 %v4661_v19, %v3738_v21  ;;  %v5462_v1 = vpop.f32.mrb[41].mxu1  ;;  %v6009_v19 = vld [vmem:[%s7539_s20 + $0x8] sm:$0xff]   ;;  %v6010_v21 = vld [vmem:[%s7539_s20 + $0x10] sm:$0xff]  }
 0x641   :  { %v3741_v24 = vpop.f32.mrb[42].mxu1  ;;  %v6012_v1 = vld [vmem:[%s7539_s20 + $0x20] sm:$0xff]  }
 0x642   :  { %v3744_v29 = vmax.f32 %v3739_v23, 0.0  ;;  %v5463_v53 = vpop.f32.mrb[43].mxu1  ;;  %v6011_v23 = vld [vmem:[%s7539_s20 + $0x18] sm:$0xff]   ;;  %v6013_v24 = vld [vmem:[%s7539_s20 + $0x28] sm:$0xff]  }
 0x643   :  { %v6015_v53 = vld [vmem:[%s7539_s20 + $0x38] sm:$0xff]  }
 0x644   :  { %v3745_v31 = vpack.c.bf16 %v3744_v29, %v3744_v29  ;;  %v6014_v29 = vld [vmem:[%s7539_s20 + $0x30] sm:$0xff]  }
 0x646   :  { %5473 = vmatmul.mubr.msk.bf16.vlgmr.msra.gmra.mrb[44].mxu1 %vm3785_vm9, %v3745_v31 }
 0x647   :  { %5477 = vmatpush3.bf16.msra.mxu1 %v5993_v30  ;;  %5480 = vmatprep.mubr.msk.bf16.mxu1 %vm6059_vm8, %v6058_v2  ;;  %v4691_v30 = vld [vmem:[%s7538_s19] ss:$0 sm:$0xff] }
 0x648   :  { %5478 = vmatprep.subr.bf16.mxu1 %v6058_v2 }
 0x64b   :  { %5479 = vmatpush3.bf16.msra.mxu1 %v5994_v60 }
 0x64c   :  { %5484 = vmatprep.subr.bf16.mxu1 %v6058_v2 }
 0x719   :  { %v3823_v18 = vpop.f32.mrb[44].mxu1 }
 0x71a   :  { %v3824_v4 = vadd.f32 %v4670_v35, %v3823_v18  ;;  %v5474_v33 = vpop.f32.mrb[45].mxu1 }
 0x71b   :  { %v3826_v12 = vpop.f32.mrb[46].mxu1 }
 0x71c   :  { %v3829_v10 = vmax.f32 %v3824_v4, 0.0  ;;  %v5475_v14 = vpop.f32.mrb[47].mxu1 }
 0x71d   :  { %v4169_v14 = vand.u32 127, %v3323_v42  ;;  %v4292_v42 = vld [vmem:[%s7541_s22] sm:$0xff] }
 0x71e   :  { %v3830_v39 = vpack.c.bf16 %v3829_v10, %v3829_v10 }
 0x71f   :  { %vm4170_vm11 = vcmp.lt.s32.totalorder %v4169_v14, 45 }
 0x720   :  { %5481 = vmatmul.mubr.msk.bf16.vlgmr.msra.gmra.mrb[48].mxu1 %vm1003_vm0, %v3830_v39 }
 0x721   :  { %5485 = vmatpush3.bf16.msra.mxu1 %v5995_v37  ;;  %5486 = vmatprep.mubr.msk.bf16.mxu1 %vm6059_vm8, %v6058_v2 }
 0x722   :  { %5490 = vmatprep.subr.bf16.mxu1 %v6058_v2 }
 0x7f3   :  { %v3891_v49 = vpop.f32.mrb[48].mxu1 }
 0x7f4   :  { %v3892_v20 = vadd.f32 %v4676_v43, %v3891_v49  ;;  %v5482_v6 = vpop.f32.mrb[49].mxu1  ;;  %v4701_v49 = vld [vmem:[%s7540_s21] ss:$0 sm:$0xff] }
 0x7f5   :  { %v3894_v44 = vpop.f32.mrb[50].mxu1 }
 0x7f6   :  { %v3897_v45 = vmax.f32 %v3892_v20, 0.0  ;;  %v5483_v40 = vpop.f32.mrb[51].mxu1 }
 0x7f8   :  { %v3898_v26 = vpack.c.bf16 %v3897_v45, %v3897_v45 }
 0x7fa   :  { %5487 = vmatmul.mubr.msk.bf16.vlgmr.msra.gmra.mrb[52].mxu1 %vm3914_vm10, %v3898_v26 }
 0x7fb   :  { %5498 = vmatprep.mubr.msk.bf16.mxu1 %vm6059_vm8, %v6058_v2  ;;  %5491 = vmatpush3.bf16.msra.mxu1 %v5996_v52  ;;  %v4293_v52 = vld [vmem:[%s7541_s22 + $0x8] sm:$0xff] }
 0x7fc   :  { %5492 = vmatprep.subr.bf16.mxu1 %v6058_v2 }
 0x7ff   :  { %5493 = vmatpush3.bf16.msra.mxu1 %v5997_v48 }
 0x800   :  { %5494 = vmatprep.subr.bf16.mxu1 %v6058_v2 }
 0x803   :  { %5495 = vmatpush3.bf16.msra.mxu1 %v5998_v54  ;;  %v4296_v54 = vld [vmem:[%s7541_s22 + $0x20] sm:$0xff] }
 0x804   :  { %5496 = vmatprep.subr.bf16.mxu1 %v6058_v2 }
 0x807   :  { %5497 = vmatpush3.bf16.msra.mxu1 %v5999_v55  ;;  %v4295_v55 = vld [vmem:[%s7541_s22 + $0x18] sm:$0xff] }
 0x808   :  { %5502 = vmatprep.subr.bf16.mxu1 %v6058_v2 }
 0x8cd   :  { %v3952_v25 = vpop.f32.mrb[52].mxu1 }
 0x8ce   :  { %v3953_v63 = vadd.f32 %v4680_v3, %v3952_v25  ;;  %v5488_v38 = vpop.f32.mrb[53].mxu1 }
 0x8cf   :  { %v3955_v50 = vpop.f32.mrb[54].mxu1  ;;  %v4294_v38 = vld [vmem:[%s7541_s22 + $0x10] sm:$0xff]  ;;  %s6063_s22 = smov 32  }
 0x8d0   :  { %v4683_v32 = vmul.f32 -1.442695, %v3953_v63  ;;  %v5489_v0 = vpop.f32.mrb[55].mxu1 }
 0x8d2   :  { %6016 = vpow2.f32 %v4683_v32 }
 0x8dc   :  { %v6017_v58 = vpop.eup %6016 }
 0x8dd   :  { %v3961_v47 = vadd.f32 1.0, %v6017_v58 }
 0x8df   :  { %6018 = vrcp.f32 %v3961_v47 }
 0x8e9   :  { %v6019_v9 = vpop.eup %6018 }
 0x8ea   :  { %v3971_v61 = vmul.f32 %v6019_v9, %v4684_v16  ;;  %v6062_v9 = vmov -1e-06  }
 0x8ec   :  { %v3972_v22 = vpack.c.bf16 %v3971_v61, %v3971_v61  ;;  %v4345_v5 = vsel %vm3785_vm9, %v3971_v61, 0.0 }
 0x8ed   :  { %4346 = vst [vmem:[%s7544_s25] sm:$0xff] %v4345_v5 }
 0x8ee   :  { %5499 = vmatmul.mubr.msk.bf16.vlgmr.msra.gmra.mrb[56].mxu1 %vm3785_vm9, %v3972_v22 }
 0x8ef   :  { %5503 = vmatpush3.bf16.msra.mxu1 %v6000_v28  ;;  %5518 = vmatprep.mubr.msk.bf16.mxu1 %vm6059_vm8, %v6058_v2 }
 0x8f0   :  { %5504 = vmatprep.subr.bf16.mxu1 %v6058_v2 }
 0x8f3   :  { %5505 = vmatpush3.bf16.msra.mxu1 %v6001_v11 }
 0x8f4   :  { %5506 = vmatprep.subr.bf16.mxu1 %v6058_v2 }
 0x8f7   :  { %5507 = vmatpush3.bf16.msra.mxu1 %v6002_v56 }
 0x8f8   :  { %5508 = vmatprep.subr.bf16.mxu1 %v6058_v2 }
 0x8fb   :  { %5509 = vmatpush3.bf16.msra.mxu1 %v6003_v27 }
 0x8fc   :  { %5510 = vmatprep.subr.bf16.mxu1 %v6058_v2 }
 0x8ff   :  { %5511 = vmatpush3.bf16.msra.mxu1 %v6004_v46 }
 0x900   :  { %5512 = vmatprep.subr.bf16.mxu1 %v6058_v2 }
 0x903   :  { %5513 = vmatpush3.bf16.msra.mxu1 %v6005_v34 }
 0x904   :  { %5514 = vmatprep.subr.bf16.mxu1 %v6058_v2 }
 0x907   :  { %5515 = vmatpush3.bf16.msra.mxu1 %v6006_v7 }
 0x908   :  { %5516 = vmatprep.subr.bf16.mxu1 %v6058_v2 }
 0x90b   :  { %5517 = vmatpush3.bf16.msra.mxu1 %v6007_v36 }
 0x90c   :  { %5522 = vmatprep.subr.bf16.mxu1 %v6058_v2 }
 0x9c1   :  { %v4049_v13 = vpop.f32.mrb[56].mxu1 }
 0x9c2   :  { %v4050_v15 = vadd.f32 %v4685_v8, %v4049_v13  ;;  %v5500_v57 = vpop.f32.mrb[57].mxu1 }
 0x9c3   :  { %v4052_v59 = vpop.f32.mrb[58].mxu1 }
 0x9c4   :  { %v4055_v62 = vmax.f32 %v4050_v15, 0.0  ;;  %v5501_v41 = vpop.f32.mrb[59].mxu1 }
 0x9c6   :  { %v4056_v51 = vpack.c.bf16 %v4055_v62, %v4055_v62 }
 0x9c8   :  { %5519 = vmatmul.mubr.bf16.vlgmr.msra.gmra.mrb[60].mxu1 %v4056_v51 }
 0x9c9   :  { %5538 = vmatprep.mubr.msk.bf16.mxu1 %vm6059_vm8, %v6058_v2  ;;  %5523 = vmatpush3.bf16.msra.mxu1 %v6008_v17 }
 0x9ca   :  { %5524 = vmatprep.subr.bf16.mxu1 %v6058_v2 }
 0x9cd   :  { %5525 = vmatpush3.bf16.msra.mxu1 %v6009_v19 }
 0x9ce   :  { %5526 = vmatprep.subr.bf16.mxu1 %v6058_v2 }
 0x9d1   :  { %5527 = vmatpush3.bf16.msra.mxu1 %v6010_v21 }
 0x9d2   :  { %5528 = vmatprep.subr.bf16.mxu1 %v6058_v2 }
 0x9d5   :  { %5529 = vmatpush3.bf16.msra.mxu1 %v6011_v23 }
 0x9d6   :  { %5530 = vmatprep.subr.bf16.mxu1 %v6058_v2 }
 0x9d9   :  { %5531 = vmatpush3.bf16.msra.mxu1 %v6012_v1 }
 0x9da   :  { %5532 = vmatprep.subr.bf16.mxu1 %v6058_v2 }
 0x9dd   :  { %5533 = vmatpush3.bf16.msra.mxu1 %v6013_v24 }
 0x9de   :  { %5534 = vmatprep.subr.bf16.mxu1 %v6058_v2 }
 0x9e1   :  { %5535 = vmatpush3.bf16.msra.mxu1 %v6014_v29 }
 0x9e2   :  { %5536 = vmatprep.subr.bf16.mxu1 %v6058_v2 }
 0x9e5   :  { %5537 = vmatpush3.bf16.msra.mxu1 %v6015_v53 }
 0xa9b   :  { %v4162_v31 = vpop.f32.mrb[60].mxu1 }
 0xa9c   :  { %v4163_v60 = vadd.f32 %v4691_v30, %v4162_v31  ;;  %v5520_v35 = vpop.f32.mrb[61].mxu1 }
 0xa9d   :  { %v4165_v18 = vpop.f32.mrb[62].mxu1 }
 0xa9e   :  { %v4700_v4 = vmul.f32 -1.442695, %v4163_v60  ;;  %v5521_v33 = vpop.f32.mrb[63].mxu1 }
 0xaa0   :  { %6020 = vpow2.f32 %v4700_v4 }
 0xaa1   :  { %6022 = vtanh.f32 %v4163_v60 }
 0xaaa   :  { %v6021_v12 = vpop.eup %6020 }
 0xaab   :  { %v4175_v10 = vadd.f32 1.0, %v6021_v12  ;;  %v6023_v2 = vpop.eup %6022 }
 0xaad   :  { %6024 = vrcp.f32 %v4175_v10 }
 0xab7   :  { %v6025_v37 = vpop.eup %6024 }
 0xab8   :  { %v4178_v39 = vsel %vm4170_vm11, %v6023_v2, %v6025_v37 }
 0xab9   :  { %v4179_v43 = vpack.c.bf16 %v4178_v39, %v4178_v39 }
 0xabb   :  { %5539 = vmatmul.mubr.bf16.vlgmr.msra.gmra.mrb[64].mxu1 %v4179_v43 }
 0xb8e   :  { %v4285_v20 = vpop.f32.mrb[64].mxu1 }
 0xb8f   :  { %v4286_v6 = vadd.f32 %v4701_v49, %v4285_v20  ;;  %v5540_v44 = vpop.f32.mrb[65].mxu1 }
 0xb90   :  { %v4288_v45 = vpop.f32.mrb[66].mxu1 }
 0xb91   :  { %6026 = vtanh.f32 %v4286_v6  ;;  %v5541_v40 = vpop.f32.mrb[67].mxu1 }
 0xb9b   :  { %v6027_v26 = vpop.eup %6026 }
 0xb9c   :  { %v4297_v48 = vmul.f32 %v6027_v26, %v4292_v42 }
 0xb9e   :  { %v4298_v3 = vadd.f32 %v4297_v48, %v4293_v52 }
 0xba0   :  { %v4301_v25 = vmul.f32 %v4298_v3, %v4296_v54  ;;  %4337 = vst [vmem:[%s7542_s23] sm:$0xff] %v4298_v3  ;;  %v4300_v63 = vmul.f32 %v4298_v3, %v4295_v55  ;;  %v4299_v50 = vmul.f32 %v4298_v3, %v4294_v38  ;;  %s6064_s23 = smov [#allocation3]  }
 0xba1   :  { %s4355_s0 = sshll.u32 %s6064_s23, 4  ;;  %s4356_s0 = int_to_ptr.vmem [resolvable:$true] %s4355_s0 }
 0xba2   :  { %4321 = vrot.lane.b32.xlu0 %v4301_v25, %s6060_s16  ;;  %4312 = vrot.lane.b32.xlu1 %v4300_v63, %s6060_s16  ;;  %s6032_s14 = scalar_lea.vmem %s4356_s0, 128  ;;  %p6037_p1 = scmp.lt.s32.totalorder %s4356_s0, %s4356_s0 }
 0xba3   :  { %p6033_p0 = scmp.ne.s32.totalorder %s4356_s0, %s6032_s14  ;;  %p6038_p2 = scmp.lt.s32.totalorder %s6032_s14, %s6032_s14 }
 0xba5   :  { %p6039_p3 = por %p6038_p2, %p6037_p1 }
 0xba6   :  { %4325 = vrot.lane.b32.xlu0 %v4301_v25, %s6061_s9  ;;  %4316 = vrot.lane.b32.xlu1 %v4300_v63, %s6061_s9 }
 0xba7   :  { %p6040_p4 = pnand %p6039_p3, %p6033_p0 }
 0xbaa   :  { %4307 = vrot.lane.b32.xlu1 %v4299_v50, %s6061_s9  ;;  %4303 = vrot.lane.b32.xlu0 %v4299_v50, %s6060_s16 }
 0xc14   :  { %v4322_v32 = vpop.permute.xlu0 %4321  ;;  %v4313_v22 = vpop.permute.xlu1 %4312 }
 0xc15   :  { %v4324_v0 = vadd.f32 %v4322_v32, %v4301_v25  ;;  %v4315_v11 = vadd.f32 %v4313_v22, %v4300_v63 }
 0xc18   :  { %v4326_v58 = vpop.permute.xlu0 %4325  ;;  %v4317_v5 = vpop.permute.xlu1 %4316 }
 0xc19   :  { %v4328_v47 = vadd.f32 %v4326_v58, %v4324_v0  ;;  %v4319_v56 = vadd.f32 %v4317_v5, %v4315_v11 }
 0xc1b   :  { %v4329_v16 = vand.u32 2147483647, %v4328_v47  ;;  %vm4331_vm12 = vcmp.ge.f32.partialorder %v4328_v47, 0.0 }
 0xc1c   :  { %v4332_v61 = vsel %vm4331_vm12, 1e-06, %v6062_v9  ;;  %v4304_v34 = vpop.permute.xlu0 %4303  ;;  %v4308_v36 = vpop.permute.xlu1 %4307 }
 0xc1d   :  { %vm4330_vm13 = vcmp.lt.f32.partialorder %v4329_v16, 1e-06  ;;  %v4306_v7 = vadd.f32 %v4304_v34, %v4299_v50 }
 0xc1e   :  { %v4333_v28 = vsel %vm4330_vm13, %v4332_v61, %v4328_v47 }
 0xc1f   :  { %6028 = vrcp.f32 %v4333_v28  ;;  %v4310_v8 = vadd.f32 %v4308_v36, %v4306_v7 }
 0xc29   :  { %v6029_v27 = vpop.eup %6028 }
 0xc2a   :  { %v4336_v46 = vmul.f32 %v6029_v27, %v4319_v56  ;;  %v4335_v13 = vmul.f32 %v6029_v27, %v4310_v8 }
 0xc2c   :  { %4339 = vrot.lane.b32.xlu0 %v4336_v46, %s6063_s22 }
 0xc9e   :  { %v4340_v15 = vpop.permute.xlu0 %4339 }
 0xc9f   :  { %v4342_v57 = vsel %vm1003_vm0, %v4335_v13, %v4340_v15 }
 0xca0   :  { %v4343_v59 = vsel %vm3785_vm9, %v4342_v57, 0.0 }
 0xca1   :  { %4344 = vst [vmem:[#allocation3] sm:$0xff] %v4343_v59 }
 0xca2   :  { %6043 = shalt.err (!%p6040_p4)
}
 0xca3   :  { %s6044_s2 = scalar_lea.hbm %s7543_s24, 128 }
 0xca4   :  { %p6045_p5 = scmp.ne.s32.totalorder %s7543_s24, %s6044_s2  ;;  %p6048_p6 = scmp.lt.u32.totalorder %s6044_s2, %s7543_s24 }
 0xca6   :  { %p6050_p7 = pnand %p6048_p6, %p6045_p5 }
 0xca8   :  { %6053 = shalt.err (!%p6050_p7)
}
 0xca9   :  { %4358 = dma.vmem_to_hbm [thread:$0]  %s4356_s0, 128, %s7543_s24, [#allocation4]  }
 0xcaa   :  { %6054 = dma.done.wait [#allocation4], 128  }
 0xcab   :  { %6055 = vsyncadd [#allocation4], 4294967168 }
 0xcac   :  { %4368 = vsyncpa [#allocation4], 1 }

</bundles_post_ra>
